<compile_context>
chip_gen: v6e
topology: v6e:2x2x1
jax: 0.10.0
libtpu: 0.0.40
codegen_flags: <defaults>
</compile_context>

<pallas_src>
import math
import functools

import jax
import jax.numpy as jnp
from jax import lax
from jax.experimental import pallas as pl
from jax.experimental.pallas import tpu as pltpu


MATMUL_DTYPE = jnp.bfloat16   # MXU input dtype; accumulation is always fp32.


# ----------------------------- kernel helpers ------------------------------

def _layernorm(v, w, b, eps=1e-5):
    # matches torch LayerNorm computed in fp32 (inputs already fp32 here)
    mu = jnp.mean(v, axis=-1, keepdims=True)
    var = jnp.mean(jnp.square(v - mu), axis=-1, keepdims=True)
    return (v - mu) * lax.rsqrt(var + eps) * w + b


def _quick_gelu(v):
    return v * jax.nn.sigmoid(1.702 * v)


# ------------------------------ Pallas kernel ------------------------------

def resblock_stack_kernel(x_ref,
                          ln1_w_ref, ln1_b_ref,
                          w_qkv_t_ref, b_qkv_ref,
                          w_out_t_ref, b_out_ref,
                          ln2_w_ref, ln2_b_ref,
                          w_fc_t_ref, b_fc_ref,
                          w_proj_t_ref, b_proj_ref,
                          o_ref,
                          res_ref, attn_ref,
                          *, n_head):
    l = pl.program_id(1)
    n_layers = pl.num_programs(1)

    Bt, S, W = x_ref.shape
    M = Bt * S
    Dh = W // n_head

    # Load the residual stream into VMEM scratch at the first layer only.
    @pl.when(l == 0)
    def _():
        res_ref[...] = x_ref[...].reshape(M, W)

    x = res_ref[...]                                   # (M, W) fp32

    # -------- attention branch:  x + out_proj(MHA(ln_1(x))) -----------------
    h = _layernorm(x, ln1_w_ref[0], ln1_b_ref[0])
    # pre-transposed weights: qkv = h @ W_qkv^T == h @ w_qkv_t ; the 1/sqrt(Dh)
    # scale is already folded into the Q columns of w_qkv_t / b_qkv.
    qkv = jnp.dot(h.astype(MATMUL_DTYPE), w_qkv_t_ref[0],
                  preferred_element_type=jnp.float32) + b_qkv_ref[0]
    q = qkv[:, 0 * W:1 * W]
    k = qkv[:, 1 * W:2 * W]
    v = qkv[:, 2 * W:3 * W]

    # Per-(batch-element, head) attention.  Head outputs are concatenated into
    # the attn_ref scratch so one full-K (M, W) @ (W, W) output projection runs
    # after the loop instead of n_head skinny K=Dh matmuls.
    for bi in range(Bt):
        r0 = bi * S
        for hh in range(n_head):
            lo = hh * Dh
            qh = q[r0:r0 + S, lo:lo + Dh].astype(MATMUL_DTYPE)   # scaled Q
            kh = k[r0:r0 + S, lo:lo + Dh].astype(MATMUL_DTYPE)
            vh = v[r0:r0 + S, lo:lo + Dh].astype(MATMUL_DTYPE)
            # scores = q @ k^T (contract last dims of both operands)
            s = lax.dot_general(qh, kh, (((1,), (1,)), ((), ())),
                                preferred_element_type=jnp.float32)  # (S, S)
            s = s - jnp.max(s, axis=-1, keepdims=True)
            p = jnp.exp(s)
            # normalize AFTER the PV matmul: scale (S, Dh) instead of (S, S)
            recip = pl.reciprocal(jnp.sum(p, axis=-1, keepdims=True),
                                  approx=True)
            oh = jnp.dot(p.astype(MATMUL_DTYPE), vh,
                         preferred_element_type=jnp.float32) * recip
            attn_ref[r0:r0 + S, lo:lo + Dh] = oh

    attn = jnp.dot(attn_ref[...].astype(MATMUL_DTYPE), w_out_t_ref[0],
                   preferred_element_type=jnp.float32) + b_out_ref[0]
    x = x + attn

    # -------- MLP branch:  x + c_proj(QuickGELU(c_fc(ln_2(x)))) -------------
    h2 = _layernorm(x, ln2_w_ref[0], ln2_b_ref[0])
    h2 = jnp.dot(h2.astype(MATMUL_DTYPE), w_fc_t_ref[0],
                 preferred_element_type=jnp.float32) + b_fc_ref[0]
    h2 = _quick_gelu(h2)
    h2 = jnp.dot(h2.astype(MATMUL_DTYPE), w_proj_t_ref[0],
                 preferred_element_type=jnp.float32) + b_proj_ref[0]
    x = x + h2

    # carry the residual to the next layer
    res_ref[...] = x

    @pl.when(l == n_layers - 1)
    def _():
        o_ref[...] = x.reshape(Bt, S, W)


# ------------------------------ JAX wrappers -------------------------------

def _pick_batch_tile(B, S, target_rows=256):
    """Largest divisor Bt of B with Bt*S <= target_rows, preferring to keep at
    least 2 grid steps on the parallel batch axis (keeps both v7x TCs busy)."""
    divisors = [d for d in range(1, B + 1) if B % d == 0]
    pref = [d for d in divisors if B // d >= 2] or divisors
    good = [d for d in pref if d * S <= max(target_rows, S)]
    return max(good) if good else min(pref)


def _vmem_limit_bytes(Bt, S, W, n_layers, stacked_params):
    """Explicit VMEM budget: double-buffered x/o blocks + double-buffered
    per-layer weights + scratch + matmul intermediates, with 1.5x headroom,
    capped at ~80% of the physical VMEM (queried) so it is safe on v7x
    (64 MiB total) while still able to exceed 64 MiB on v5e/v6e (128 MiB)."""
    M = Bt * S
    x_block = M * W * 4
    per_layer_w = sum(int(p.size) * p.dtype.itemsize
                      for p in stacked_params) // max(n_layers, 1)
    scratch = 2 * M * W * 4                       # residual + head-concat
    act_tmp = M * (8 * W) * 4                     # qkv / MLP intermediates
    need = 4 * x_block + 2 * per_layer_w + scratch + act_tmp
    budget = max(int(1.5 * need), 8 * 1024 * 1024)
    try:
        cap = getattr(pltpu.get_tpu_info(), "vmem_capacity_bytes", None)
        cap = int(0.8 * cap) if cap else 48 * 1024 * 1024
    except Exception:
        cap = 48 * 1024 * 1024                    # conservative, v7x-safe
    return int(min(budget, cap))


def transformer_pallas(x_bsw, stacked_params, n_head):
    """x_bsw: (batch, seq, width) fp32; stacked_params: 12 arrays, each with a
    leading layer axis."""
    B, S, W = x_bsw.shape
    L = stacked_params[0].shape[0]
    Bt = _pick_batch_tile(B, S)

    in_specs = [pl.BlockSpec((Bt, S, W), lambda b, l: (b, 0, 0))]
    in_specs += [pl.BlockSpec((1,) + tuple(p.shape[1:]), lambda b, l: (l, 0, 0))
                 for p in stacked_params]

    return pl.pallas_call(
        functools.partial(resblock_stack_kernel, n_head=n_head),
        grid=(B // Bt, L),
        in_specs=in_specs,
        out_specs=pl.BlockSpec((Bt, S, W), lambda b, l: (b, 0, 0)),
        out_shape=jax.ShapeDtypeStruct((B, S, W), jnp.float32),
        scratch_shapes=[pltpu.VMEM((Bt * S, W), jnp.float32),   # residual
                        pltpu.VMEM((Bt * S, W), jnp.float32)],  # head concat
        input_output_aliases={0: 0},
        compiler_params=pltpu.CompilerParams(
            dimension_semantics=("parallel", "arbitrary"),
            vmem_limit_bytes=_vmem_limit_bytes(Bt, S, W, L, stacked_params)),
    )(x_bsw, *stacked_params)


def prepare_stacked_params(layer_params, n_head):
    """Torch-layout fp32 params -> kernel layout: transposed bf16 weight
    matrices, 1/sqrt(Dh) folded into the Q rows, stacked on a layer axis.
    Call ONCE and reuse (hoisted out of the jitted forward)."""
    per_layer = []
    for (ln1_w, ln1_b, w_qkv, b_qkv, w_out, b_out,
         ln2_w, ln2_b, w_fc, b_fc, w_proj, b_proj) in layer_params:
        W = w_out.shape[0]
        scale = 1.0 / math.sqrt(W // n_head)
        w_qkv_s = w_qkv.at[:W, :].multiply(scale)          # (3W, W)
        b_qkv_s = b_qkv.at[:, :W].multiply(scale)          # (1, 3W)
        per_layer.append((
            ln1_w, ln1_b,
            jnp.transpose(w_qkv_s).astype(MATMUL_DTYPE),    # (W, 3W)
            b_qkv_s,
            jnp.transpose(w_out).astype(MATMUL_DTYPE),      # (W, W)
            b_out,
            ln2_w, ln2_b,
            jnp.transpose(w_fc).astype(MATMUL_DTYPE),       # (W, 4W)
            b_fc,
            jnp.transpose(w_proj).astype(MATMUL_DTYPE),     # (4W, W)
            b_proj,
        ))
    return tuple(jnp.stack([lp[i] for lp in per_layer], axis=0)
                 for i in range(12))


@functools.partial(jax.jit, static_argnames=("n_head",))
def transformer_forward(x_sbw, stacked_params, n_head):
    """x_sbw: (seq, batch, width) fp32 — PyTorch layout. Returns same layout."""
    x = jnp.transpose(x_sbw, (1, 0, 2))           # -> (batch, seq, width)
    x = transformer_pallas(x, stacked_params, n_head)
    return jnp.transpose(x, (1, 0, 2))            # -> (seq, batch, width)


# ------------------------- deterministic parameters ------------------------

def init_transformer_params(key, width, layers):
    layer_params = []
    for l in range(layers):
        ks = jax.random.split(jax.random.fold_in(key, l), 8)
        W = width
        ln1_w = jnp.ones((1, W), jnp.float32)
        ln1_b = jnp.zeros((1, W), jnp.float32)
        w_qkv = 0.02 * jax.random.normal(ks[0], (3 * W, W), jnp.float32)
        b_qkv = 0.01 * jax.random.normal(ks[1], (1, 3 * W), jnp.float32)
        w_out = 0.02 * jax.random.normal(ks[2], (W, W), jnp.float32)
        b_out = 0.01 * jax.random.normal(ks[3], (1, W), jnp.float32)
        ln2_w = jnp.ones((1, W), jnp.float32)
        ln2_b = jnp.zeros((1, W), jnp.float32)
        w_fc = 0.02 * jax.random.normal(ks[4], (4 * W, W), jnp.float32)
        b_fc = 0.01 * jax.random.normal(ks[5], (1, 4 * W), jnp.float32)
        w_proj = 0.02 * jax.random.normal(ks[6], (W, 4 * W), jnp.float32)
        b_proj = 0.01 * jax.random.normal(ks[7], (1, W), jnp.float32)
        layer_params.append((ln1_w, ln1_b, w_qkv, b_qkv, w_out, b_out,
                             ln2_w, ln2_b, w_fc, b_fc, w_proj, b_proj))
    return layer_params


# ----------------------------- pure-JAX reference --------------------------

def _ref_block(x, p, n_head):                     # x: (B, S, W), fp32 throughout
    (ln1_w, ln1_b, w_qkv, b_qkv, w_out, b_out,
     ln2_w, ln2_b, w_fc, b_fc, w_proj, b_proj) = p
    B, S, W = x.shape
    Dh = W // n_head

    h = _layernorm(x, ln1_w, ln1_b)
    qkv = h @ w_qkv.T + b_qkv
    q, k, v = qkv[..., :W], qkv[..., W:2 * W], qkv[..., 2 * W:]
    q = q.reshape(B, S, n_head, Dh).transpose(0, 2, 1, 3) / math.sqrt(Dh)
    k = k.reshape(B, S, n_head, Dh).transpose(0, 2, 1, 3)
    v = v.reshape(B, S, n_head, Dh).transpose(0, 2, 1, 3)
    s = jnp.einsum('bhqd,bhkd->bhqk', q, k)
    p_attn = jax.nn.softmax(s, axis=-1)
    a = jnp.einsum('bhqk,bhkd->bhqd', p_attn, v)
    a = a.transpose(0, 2, 1, 3).reshape(B, S, W)
    x = x + (a @ w_out.T + b_out)

    h2 = _layernorm(x, ln2_w, ln2_b)
    h2 = h2 @ w_fc.T + b_fc
    h2 = _quick_gelu(h2)
    x = x + (h2 @ w_proj.T + b_proj)
    return x


def _ref_transformer(x_sbw, layer_params, n_head):
    x = jnp.transpose(x_sbw, (1, 0, 2))
    for p in layer_params:
        x = _ref_block(x, p, n_head)
    return jnp.transpose(x, (1, 0, 2))


# ---------------------------------- main -----------------------------------

if __name__ == "__main__":
    # small but TPU-friendly shapes: seq multiple of 8, width multiple of 128,
    # batch big enough to exercise row-flattening + >=2 parallel grid steps.
    SEQ, BATCH, WIDTH, HEADS, LAYERS = 16, 8, 128, 4, 2

    key = jax.random.PRNGKey(0)
    k_x, k_p = jax.random.split(key)
    x = jax.random.normal(k_x, (SEQ, BATCH, WIDTH), jnp.float32)
    params = init_transformer_params(k_p, WIDTH, LAYERS)

    # one-time weight re-layout (transpose / bf16 / scale-fold / layer-stack)
    stacked = prepare_stacked_params(params, HEADS)

    out = transformer_forward(x, stacked, n_head=HEADS)
    out = jax.block_until_ready(out)

    ref = jax.block_until_ready(_ref_transformer(x, params, HEADS))
    assert out.shape == (SEQ, BATCH, WIDTH)
    # bf16 MXU inputs with fp32 accumulation -> loosened tolerance vs fp32 ref
    assert jnp.allclose(out, ref, atol=2e-2, rtol=2e-2), \
        f"max abs err = {jnp.max(jnp.abs(out - ref))}"

    print("KERNEL_OK")
</pallas_src>

<mosaic_0001>
module attributes {stable_mosaic.version = 11 : i64} {
  func.func @resblock_stack_kernel(%arg0: i32, %arg1: i32, %arg2: memref<4x16x128xf32, #tpu.memory_space<vmem>>, %arg3: memref<1x1x128xf32, #tpu.memory_space<vmem>>, %arg4: memref<1x1x128xf32, #tpu.memory_space<vmem>>, %arg5: memref<1x128x384xbf16, #tpu.memory_space<vmem>>, %arg6: memref<1x1x384xf32, #tpu.memory_space<vmem>>, %arg7: memref<1x128x128xbf16, #tpu.memory_space<vmem>>, %arg8: memref<1x1x128xf32, #tpu.memory_space<vmem>>, %arg9: memref<1x1x128xf32, #tpu.memory_space<vmem>>, %arg10: memref<1x1x128xf32, #tpu.memory_space<vmem>>, %arg11: memref<1x128x512xbf16, #tpu.memory_space<vmem>>, %arg12: memref<1x1x512xf32, #tpu.memory_space<vmem>>, %arg13: memref<1x512x128xbf16, #tpu.memory_space<vmem>>, %arg14: memref<1x1x128xf32, #tpu.memory_space<vmem>>, %arg15: memref<4x16x128xf32, #tpu.memory_space<vmem>>, %arg16: memref<64x128xf32, #tpu.memory_space<vmem>>, %arg17: memref<64x128xf32, #tpu.memory_space<vmem>>) attributes {dimension_semantics = [#tpu.dimension_semantics<parallel>, #tpu.dimension_semantics<arbitrary>], iteration_bounds = array<i64: 2, 2>, scalar_prefetch = 0 : i64, scratch_operands = 2 : i64, tpu.core_type = #tpu.core_type<tc>, window_params = [{transform_indices = @transform_0, window_bounds = array<i64: 4, 16, 128>}, {transform_indices = @transform_1, window_bounds = array<i64: 1, 1, 128>}, {transform_indices = @transform_2, window_bounds = array<i64: 1, 1, 128>}, {transform_indices = @transform_3, window_bounds = array<i64: 1, 128, 384>}, {transform_indices = @transform_4, window_bounds = array<i64: 1, 1, 384>}, {transform_indices = @transform_5, window_bounds = array<i64: 1, 128, 128>}, {transform_indices = @transform_6, window_bounds = array<i64: 1, 1, 128>}, {transform_indices = @transform_7, window_bounds = array<i64: 1, 1, 128>}, {transform_indices = @transform_8, window_bounds = array<i64: 1, 1, 128>}, {transform_indices = @transform_9, window_bounds = array<i64: 1, 128, 512>}, {transform_indices = @transform_10, window_bounds = array<i64: 1, 1, 512>}, {transform_indices = @transform_11, window_bounds = array<i64: 1, 512, 128>}, {transform_indices = @transform_12, window_bounds = array<i64: 1, 1, 128>}, {transform_indices = @transform_13, window_bounds = array<i64: 4, 16, 128>}]} {
    %c0_i32 = arith.constant 0 : i32
    %0 = arith.cmpi eq, %arg1, %c0_i32 : i32
    %1 = arith.extui %0 : i1 to i32
    %c0_i32_0 = arith.constant 0 : i32
    %2 = arith.cmpi ne, %1, %c0_i32_0 : i32
    scf.if %2 {
      %c0_149 = arith.constant 0 : index
      %c0_150 = arith.constant 0 : index
      %c0_151 = arith.constant 0 : index
      %426 = vector.load %arg2[%c0_149, %c0_150, %c0_151] : memref<4x16x128xf32, #tpu.memory_space<vmem>>, vector<4x16x128xf32>
      %427 = vector.shape_cast %426 : vector<4x16x128xf32> to vector<64x128xf32>
      %c0_152 = arith.constant 0 : index
      %c0_153 = arith.constant 0 : index
      %428 = vector.load %arg16[%c0_152, %c0_153] : memref<64x128xf32, #tpu.memory_space<vmem>>, vector<64x128xf32>
      tpu.vector_store %arg16[%c0_152, %c0_153], %427 {strides = array<i32>} : memref<64x128xf32, #tpu.memory_space<vmem>>, vector<64x128xf32>,
    } else {
    }
    %c0 = arith.constant 0 : index
    %c0_1 = arith.constant 0 : index
    %3 = vector.load %arg16[%c0, %c0_1] : memref<64x128xf32, #tpu.memory_space<vmem>>, vector<64x128xf32>
    %c0_2 = arith.constant 0 : index
    %c0_3 = arith.constant 0 : index
    %c0_4 = arith.constant 0 : index
    %4 = vector.load %arg3[%c0_2, %c0_3, %c0_4] : memref<1x1x128xf32, #tpu.memory_space<vmem>>, vector<1x1x128xf32>
    %5 = vector.shape_cast %4 : vector<1x1x128xf32> to vector<1x128xf32>
    %c0_5 = arith.constant 0 : index
    %c0_6 = arith.constant 0 : index
    %c0_7 = arith.constant 0 : index
    %6 = vector.load %arg4[%c0_5, %c0_6, %c0_7] : memref<1x1x128xf32, #tpu.memory_space<vmem>>, vector<1x1x128xf32>
    %7 = vector.shape_cast %6 : vector<1x1x128xf32> to vector<1x128xf32>
    %cst = arith.constant dense<0.000000e+00> : vector<64xf32>
    %8 = vector.multi_reduction <add>, %3, %cst [1] : vector<64x128xf32> to vector<64xf32>
    %9 = vector.shape_cast %8 : vector<64xf32> to vector<64x1xf32>
    %cst_8 = arith.constant 1.280000e+02 : f32
    %10 = vector.broadcast %cst_8 : f32 to vector<64x1xf32>
    %11 = arith.divf %9, %10 : vector<64x1xf32>
    %12 = vector.broadcast %11 : vector<64x1xf32> to vector<64x128xf32>
    %13 = arith.subf %3, %12 : vector<64x128xf32>
    %14 = arith.mulf %13, %13 : vector<64x128xf32>
    %cst_9 = arith.constant dense<0.000000e+00> : vector<64xf32>
    %15 = vector.multi_reduction <add>, %14, %cst_9 [1] : vector<64x128xf32> to vector<64xf32>
    %16 = vector.shape_cast %15 : vector<64xf32> to vector<64x1xf32>
    %cst_10 = arith.constant 1.280000e+02 : f32
    %17 = vector.broadcast %cst_10 : f32 to vector<64x1xf32>
    %18 = arith.divf %16, %17 : vector<64x1xf32>
    %19 = vector.broadcast %11 : vector<64x1xf32> to vector<64x128xf32>
    %20 = arith.subf %3, %19 : vector<64x128xf32>
    %cst_11 = arith.constant 9.99999974E-6 : f32
    %21 = vector.broadcast %cst_11 : f32 to vector<64x1xf32>
    %22 = arith.addf %18, %21 : vector<64x1xf32>
    %23 = math.rsqrt %22 : vector<64x1xf32>
    %24 = vector.broadcast %23 : vector<64x1xf32> to vector<64x128xf32>
    %25 = arith.mulf %20, %24 : vector<64x128xf32>
    %26 = vector.broadcast %5 : vector<1x128xf32> to vector<64x128xf32>
    %27 = arith.mulf %25, %26 : vector<64x128xf32>
    %28 = vector.broadcast %7 : vector<1x128xf32> to vector<64x128xf32>
    %29 = arith.addf %27, %28 : vector<64x128xf32>
    %30 = arith.truncf %29 : vector<64x128xf32> to vector<64x128xbf16>
    %c0_12 = arith.constant 0 : index
    %c0_13 = arith.constant 0 : index
    %c0_14 = arith.constant 0 : index
    %31 = vector.load %arg5[%c0_12, %c0_13, %c0_14] : memref<1x128x384xbf16, #tpu.memory_space<vmem>>, vector<1x128x384xbf16>
    %32 = vector.shape_cast %31 : vector<1x128x384xbf16> to vector<128x384xbf16>
    %cst_15 = arith.constant dense<0.000000e+00> : vector<64x384xf32>
    %33 = tpu.matmul %30, %32, %cst_15 {dimension_numbers = #tpu.dot_dimension_numbers<[1], [0], [0], [1], [0, 0, 1, 1], [], []>} : vector<64x128xbf16>, vector<128x384xbf16>, vector<64x384xf32> -> vector<64x384xf32>
    %c0_16 = arith.constant 0 : index
    %c0_17 = arith.constant 0 : index
    %c0_18 = arith.constant 0 : index
    %34 = vector.load %arg6[%c0_16, %c0_17, %c0_18] : memref<1x1x384xf32, #tpu.memory_space<vmem>>, vector<1x1x384xf32>
    %35 = vector.shape_cast %34 : vector<1x1x384xf32> to vector<1x384xf32>
    %36 = vector.broadcast %35 : vector<1x384xf32> to vector<64x384xf32>
    %37 = arith.addf %33, %36 : vector<64x384xf32>
    %38 = vector.extract_strided_slice %37 {offsets = [0, 0], sizes = [64, 128], strides = [1, 1]} : vector<64x384xf32> to vector<64x128xf32>
    %39 = vector.extract_strided_slice %37 {offsets = [0, 128], sizes = [64, 128], strides = [1, 1]} : vector<64x384xf32> to vector<64x128xf32>
    %40 = vector.extract_strided_slice %37 {offsets = [0, 256], sizes = [64, 128], strides = [1, 1]} : vector<64x384xf32> to vector<64x128xf32>
    %41 = vector.extract_strided_slice %38 {offsets = [0, 0], sizes = [16, 32], strides = [1, 1]} : vector<64x128xf32> to vector<16x32xf32>
    %42 = arith.truncf %41 : vector<16x32xf32> to vector<16x32xbf16>
    %43 = vector.extract_strided_slice %39 {offsets = [0, 0], sizes = [16, 32], strides = [1, 1]} : vector<64x128xf32> to vector<16x32xf32>
    %44 = arith.truncf %43 : vector<16x32xf32> to vector<16x32xbf16>
    %45 = vector.extract_strided_slice %40 {offsets = [0, 0], sizes = [16, 32], strides = [1, 1]} : vector<64x128xf32> to vector<16x32xf32>
    %46 = arith.truncf %45 : vector<16x32xf32> to vector<16x32xbf16>
    %cst_19 = arith.constant dense<0.000000e+00> : vector<16x16xf32>
    %47 = tpu.matmul %42, %44, %cst_19 {dimension_numbers = #tpu.dot_dimension_numbers<[1], [1], [0], [0], [0, 0, 1, 0], [], []>} : vector<16x32xbf16>, vector<16x32xbf16>, vector<16x16xf32> -> vector<16x16xf32>
    %cst_20 = arith.constant dense<0xFF800000> : vector<16xf32>
    %48 = vector.multi_reduction <maximumf>, %47, %cst_20 [1] : vector<16x16xf32> to vector<16xf32>
    %49 = vector.shape_cast %48 : vector<16xf32> to vector<16x1xf32>
    %50 = vector.broadcast %49 : vector<16x1xf32> to vector<16x16xf32>
    %51 = arith.subf %47, %50 : vector<16x16xf32>
    %52 = math.exp %51 : vector<16x16xf32>
    %cst_21 = arith.constant dense<0.000000e+00> : vector<16xf32>
    %53 = vector.multi_reduction <add>, %52, %cst_21 [1] : vector<16x16xf32> to vector<16xf32>
    %54 = vector.shape_cast %53 : vector<16xf32> to vector<16x1xf32>
    %55 = tpu.reciprocal %54 {approx = true} : vector<16x1xf32> -> vector<16x1xf32>
    %56 = arith.truncf %52 : vector<16x16xf32> to vector<16x16xbf16>
    %cst_22 = arith.constant dense<0.000000e+00> : vector<16x32xf32>
    %57 = tpu.matmul %56, %46, %cst_22 {dimension_numbers = #tpu.dot_dimension_numbers<[1], [0], [0], [1], [0, 0, 1, 1], [], []>} : vector<16x16xbf16>, vector<16x32xbf16>, vector<16x32xf32> -> vector<16x32xf32>
    %58 = vector.broadcast %55 : vector<16x1xf32> to vector<16x32xf32>
    %59 = arith.mulf %57, %58 : vector<16x32xf32>
    %c0_23 = arith.constant 0 : index
    %c0_24 = arith.constant 0 : index
    %60 = vector.load %arg17[%c0_23, %c0_24] : memref<64x128xf32, #tpu.memory_space<vmem>>, vector<16x32xf32>
    tpu.vector_store %arg17[%c0_23, %c0_24], %59 {strides = array<i32>} : memref<64x128xf32, #tpu.memory_space<vmem>>, vector<16x32xf32>,
    %61 = vector.extract_strided_slice %38 {offsets = [0, 32], sizes = [16, 32], strides = [1, 1]} : vector<64x128xf32> to vector<16x32xf32>
    %62 = arith.truncf %61 : vector<16x32xf32> to vector<16x32xbf16>
    %63 = vector.extract_strided_slice %39 {offsets = [0, 32], sizes = [16, 32], strides = [1, 1]} : vector<64x128xf32> to vector<16x32xf32>
    %64 = arith.truncf %63 : vector<16x32xf32> to vector<16x32xbf16>
    %65 = vector.extract_strided_slice %40 {offsets = [0, 32], sizes = [16, 32], strides = [1, 1]} : vector<64x128xf32> to vector<16x32xf32>
    %66 = arith.truncf %65 : vector<16x32xf32> to vector<16x32xbf16>
    %cst_25 = arith.constant dense<0.000000e+00> : vector<16x16xf32>
    %67 = tpu.matmul %62, %64, %cst_25 {dimension_numbers = #tpu.dot_dimension_numbers<[1], [1], [0], [0], [0, 0, 1, 0], [], []>} : vector<16x32xbf16>, vector<16x32xbf16>, vector<16x16xf32> -> vector<16x16xf32>
    %cst_26 = arith.constant dense<0xFF800000> : vector<16xf32>
    %68 = vector.multi_reduction <maximumf>, %67, %cst_26 [1] : vector<16x16xf32> to vector<16xf32>
    %69 = vector.shape_cast %68 : vector<16xf32> to vector<16x1xf32>
    %70 = vector.broadcast %69 : vector<16x1xf32> to vector<16x16xf32>
    %71 = arith.subf %67, %70 : vector<16x16xf32>
    %72 = math.exp %71 : vector<16x16xf32>
    %cst_27 = arith.constant dense<0.000000e+00> : vector<16xf32>
    %73 = vector.multi_reduction <add>, %72, %cst_27 [1] : vector<16x16xf32> to vector<16xf32>
    %74 = vector.shape_cast %73 : vector<16xf32> to vector<16x1xf32>
    %75 = tpu.reciprocal %74 {approx = true} : vector<16x1xf32> -> vector<16x1xf32>
    %76 = arith.truncf %72 : vector<16x16xf32> to vector<16x16xbf16>
    %cst_28 = arith.constant dense<0.000000e+00> : vector<16x32xf32>
    %77 = tpu.matmul %76, %66, %cst_28 {dimension_numbers = #tpu.dot_dimension_numbers<[1], [0], [0], [1], [0, 0, 1, 1], [], []>} : vector<16x16xbf16>, vector<16x32xbf16>, vector<16x32xf32> -> vector<16x32xf32>
    %78 = vector.broadcast %75 : vector<16x1xf32> to vector<16x32xf32>
    %79 = arith.mulf %77, %78 : vector<16x32xf32>
    %c0_29 = arith.constant 0 : index
    %c32 = arith.constant 32 : index
    %80 = vector.load %arg17[%c0_29, %c32] : memref<64x128xf32, #tpu.memory_space<vmem>>, vector<16x32xf32>
    tpu.vector_store %arg17[%c0_29, %c32], %79 {strides = array<i32>} : memref<64x128xf32, #tpu.memory_space<vmem>>, vector<16x32xf32>,
    %81 = vector.extract_strided_slice %38 {offsets = [0, 64], sizes = [16, 32], strides = [1, 1]} : vector<64x128xf32> to vector<16x32xf32>
    %82 = arith.truncf %81 : vector<16x32xf32> to vector<16x32xbf16>
    %83 = vector.extract_strided_slice %39 {offsets = [0, 64], sizes = [16, 32], strides = [1, 1]} : vector<64x128xf32> to vector<16x32xf32>
    %84 = arith.truncf %83 : vector<16x32xf32> to vector<16x32xbf16>
    %85 = vector.extract_strided_slice %40 {offsets = [0, 64], sizes = [16, 32], strides = [1, 1]} : vector<64x128xf32> to vector<16x32xf32>
    %86 = arith.truncf %85 : vector<16x32xf32> to vector<16x32xbf16>
    %cst_30 = arith.constant dense<0.000000e+00> : vector<16x16xf32>
    %87 = tpu.matmul %82, %84, %cst_30 {dimension_numbers = #tpu.dot_dimension_numbers<[1], [1], [0], [0], [0, 0, 1, 0], [], []>} : vector<16x32xbf16>, vector<16x32xbf16>, vector<16x16xf32> -> vector<16x16xf32>
    %cst_31 = arith.constant dense<0xFF800000> : vector<16xf32>
    %88 = vector.multi_reduction <maximumf>, %87, %cst_31 [1] : vector<16x16xf32> to vector<16xf32>
    %89 = vector.shape_cast %88 : vector<16xf32> to vector<16x1xf32>
    %90 = vector.broadcast %89 : vector<16x1xf32> to vector<16x16xf32>
    %91 = arith.subf %87, %90 : vector<16x16xf32>
    %92 = math.exp %91 : vector<16x16xf32>
    %cst_32 = arith.constant dense<0.000000e+00> : vector<16xf32>
    %93 = vector.multi_reduction <add>, %92, %cst_32 [1] : vector<16x16xf32> to vector<16xf32>
    %94 = vector.shape_cast %93 : vector<16xf32> to vector<16x1xf32>
    %95 = tpu.reciprocal %94 {approx = true} : vector<16x1xf32> -> vector<16x1xf32>
    %96 = arith.truncf %92 : vector<16x16xf32> to vector<16x16xbf16>
    %cst_33 = arith.constant dense<0.000000e+00> : vector<16x32xf32>
    %97 = tpu.matmul %96, %86, %cst_33 {dimension_numbers = #tpu.dot_dimension_numbers<[1], [0], [0], [1], [0, 0, 1, 1], [], []>} : vector<16x16xbf16>, vector<16x32xbf16>, vector<16x32xf32> -> vector<16x32xf32>
    %98 = vector.broadcast %95 : vector<16x1xf32> to vector<16x32xf32>
    %99 = arith.mulf %97, %98 : vector<16x32xf32>
    %c0_34 = arith.constant 0 : index
    %c64 = arith.constant 64 : index
    %100 = vector.load %arg17[%c0_34, %c64] : memref<64x128xf32, #tpu.memory_space<vmem>>, vector<16x32xf32>
    tpu.vector_store %arg17[%c0_34, %c64], %99 {strides = array<i32>} : memref<64x128xf32, #tpu.memory_space<vmem>>, vector<16x32xf32>,
    %101 = vector.extract_strided_slice %38 {offsets = [0, 96], sizes = [16, 32], strides = [1, 1]} : vector<64x128xf32> to vector<16x32xf32>
    %102 = arith.truncf %101 : vector<16x32xf32> to vector<16x32xbf16>
    %103 = vector.extract_strided_slice %39 {offsets = [0, 96], sizes = [16, 32], strides = [1, 1]} : vector<64x128xf32> to vector<16x32xf32>
    %104 = arith.truncf %103 : vector<16x32xf32> to vector<16x32xbf16>
    %105 = vector.extract_strided_slice %40 {offsets = [0, 96], sizes = [16, 32], strides = [1, 1]} : vector<64x128xf32> to vector<16x32xf32>
    %106 = arith.truncf %105 : vector<16x32xf32> to vector<16x32xbf16>
    %cst_35 = arith.constant dense<0.000000e+00> : vector<16x16xf32>
    %107 = tpu.matmul %102, %104, %cst_35 {dimension_numbers = #tpu.dot_dimension_numbers<[1], [1], [0], [0], [0, 0, 1, 0], [], []>} : vector<16x32xbf16>, vector<16x32xbf16>, vector<16x16xf32> -> vector<16x16xf32>
    %cst_36 = arith.constant dense<0xFF800000> : vector<16xf32>
    %108 = vector.multi_reduction <maximumf>, %107, %cst_36 [1] : vector<16x16xf32> to vector<16xf32>
    %109 = vector.shape_cast %108 : vector<16xf32> to vector<16x1xf32>
    %110 = vector.broadcast %109 : vector<16x1xf32> to vector<16x16xf32>
    %111 = arith.subf %107, %110 : vector<16x16xf32>
    %112 = math.exp %111 : vector<16x16xf32>
    %cst_37 = arith.constant dense<0.000000e+00> : vector<16xf32>
    %113 = vector.multi_reduction <add>, %112, %cst_37 [1] : vector<16x16xf32> to vector<16xf32>
    %114 = vector.shape_cast %113 : vector<16xf32> to vector<16x1xf32>
    %115 = tpu.reciprocal %114 {approx = true} : vector<16x1xf32> -> vector<16x1xf32>
    %116 = arith.truncf %112 : vector<16x16xf32> to vector<16x16xbf16>
    %cst_38 = arith.constant dense<0.000000e+00> : vector<16x32xf32>
    %117 = tpu.matmul %116, %106, %cst_38 {dimension_numbers = #tpu.dot_dimension_numbers<[1], [0], [0], [1], [0, 0, 1, 1], [], []>} : vector<16x16xbf16>, vector<16x32xbf16>, vector<16x32xf32> -> vector<16x32xf32>
    %118 = vector.broadcast %115 : vector<16x1xf32> to vector<16x32xf32>
    %119 = arith.mulf %117, %118 : vector<16x32xf32>
    %c0_39 = arith.constant 0 : index
    %c96 = arith.constant 96 : index
    %120 = vector.load %arg17[%c0_39, %c96] : memref<64x128xf32, #tpu.memory_space<vmem>>, vector<16x32xf32>
    tpu.vector_store %arg17[%c0_39, %c96], %119 {strides = array<i32>} : memref<64x128xf32, #tpu.memory_space<vmem>>, vector<16x32xf32>,
    %121 = vector.extract_strided_slice %38 {offsets = [16, 0], sizes = [16, 32], strides = [1, 1]} : vector<64x128xf32> to vector<16x32xf32>
    %122 = arith.truncf %121 : vector<16x32xf32> to vector<16x32xbf16>
    %123 = vector.extract_strided_slice %39 {offsets = [16, 0], sizes = [16, 32], strides = [1, 1]} : vector<64x128xf32> to vector<16x32xf32>
    %124 = arith.truncf %123 : vector<16x32xf32> to vector<16x32xbf16>
    %125 = vector.extract_strided_slice %40 {offsets = [16, 0], sizes = [16, 32], strides = [1, 1]} : vector<64x128xf32> to vector<16x32xf32>
    %126 = arith.truncf %125 : vector<16x32xf32> to vector<16x32xbf16>
    %cst_40 = arith.constant dense<0.000000e+00> : vector<16x16xf32>
    %127 = tpu.matmul %122, %124, %cst_40 {dimension_numbers = #tpu.dot_dimension_numbers<[1], [1], [0], [0], [0, 0, 1, 0], [], []>} : vector<16x32xbf16>, vector<16x32xbf16>, vector<16x16xf32> -> vector<16x16xf32>
    %cst_41 = arith.constant dense<0xFF800000> : vector<16xf32>
    %128 = vector.multi_reduction <maximumf>, %127, %cst_41 [1] : vector<16x16xf32> to vector<16xf32>
    %129 = vector.shape_cast %128 : vector<16xf32> to vector<16x1xf32>
    %130 = vector.broadcast %129 : vector<16x1xf32> to vector<16x16xf32>
    %131 = arith.subf %127, %130 : vector<16x16xf32>
    %132 = math.exp %131 : vector<16x16xf32>
    %cst_42 = arith.constant dense<0.000000e+00> : vector<16xf32>
    %133 = vector.multi_reduction <add>, %132, %cst_42 [1] : vector<16x16xf32> to vector<16xf32>
    %134 = vector.shape_cast %133 : vector<16xf32> to vector<16x1xf32>
    %135 = tpu.reciprocal %134 {approx = true} : vector<16x1xf32> -> vector<16x1xf32>
    %136 = arith.truncf %132 : vector<16x16xf32> to vector<16x16xbf16>
    %cst_43 = arith.constant dense<0.000000e+00> : vector<16x32xf32>
    %137 = tpu.matmul %136, %126, %cst_43 {dimension_numbers = #tpu.dot_dimension_numbers<[1], [0], [0], [1], [0, 0, 1, 1], [], []>} : vector<16x16xbf16>, vector<16x32xbf16>, vector<16x32xf32> -> vector<16x32xf32>
    %138 = vector.broadcast %135 : vector<16x1xf32> to vector<16x32xf32>
    %139 = arith.mulf %137, %138 : vector<16x32xf32>
    %c16 = arith.constant 16 : index
    %c0_44 = arith.constant 0 : index
    %140 = vector.load %arg17[%c16, %c0_44] : memref<64x128xf32, #tpu.memory_space<vmem>>, vector<16x32xf32>
    tpu.vector_store %arg17[%c16, %c0_44], %139 {strides = array<i32>} : memref<64x128xf32, #tpu.memory_space<vmem>>, vector<16x32xf32>,
    %141 = vector.extract_strided_slice %38 {offsets = [16, 32], sizes = [16, 32], strides = [1, 1]} : vector<64x128xf32> to vector<16x32xf32>
    %142 = arith.truncf %141 : vector<16x32xf32> to vector<16x32xbf16>
    %143 = vector.extract_strided_slice %39 {offsets = [16, 32], sizes = [16, 32], strides = [1, 1]} : vector<64x128xf32> to vector<16x32xf32>
    %144 = arith.truncf %143 : vector<16x32xf32> to vector<16x32xbf16>
    %145 = vector.extract_strided_slice %40 {offsets = [16, 32], sizes = [16, 32], strides = [1, 1]} : vector<64x128xf32> to vector<16x32xf32>
    %146 = arith.truncf %145 : vector<16x32xf32> to vector<16x32xbf16>
    %cst_45 = arith.constant dense<0.000000e+00> : vector<16x16xf32>
    %147 = tpu.matmul %142, %144, %cst_45 {dimension_numbers = #tpu.dot_dimension_numbers<[1], [1], [0], [0], [0, 0, 1, 0], [], []>} : vector<16x32xbf16>, vector<16x32xbf16>, vector<16x16xf32> -> vector<16x16xf32>
    %cst_46 = arith.constant dense<0xFF800000> : vector<16xf32>
    %148 = vector.multi_reduction <maximumf>, %147, %cst_46 [1] : vector<16x16xf32> to vector<16xf32>
    %149 = vector.shape_cast %148 : vector<16xf32> to vector<16x1xf32>
    %150 = vector.broadcast %149 : vector<16x1xf32> to vector<16x16xf32>
    %151 = arith.subf %147, %150 : vector<16x16xf32>
    %152 = math.exp %151 : vector<16x16xf32>
    %cst_47 = arith.constant dense<0.000000e+00> : vector<16xf32>
    %153 = vector.multi_reduction <add>, %152, %cst_47 [1] : vector<16x16xf32> to vector<16xf32>
    %154 = vector.shape_cast %153 : vector<16xf32> to vector<16x1xf32>
    %155 = tpu.reciprocal %154 {approx = true} : vector<16x1xf32> -> vector<16x1xf32>
    %156 = arith.truncf %152 : vector<16x16xf32> to vector<16x16xbf16>
    %cst_48 = arith.constant dense<0.000000e+00> : vector<16x32xf32>
    %157 = tpu.matmul %156, %146, %cst_48 {dimension_numbers = #tpu.dot_dimension_numbers<[1], [0], [0], [1], [0, 0, 1, 1], [], []>} : vector<16x16xbf16>, vector<16x32xbf16>, vector<16x32xf32> -> vector<16x32xf32>
    %158 = vector.broadcast %155 : vector<16x1xf32> to vector<16x32xf32>
    %159 = arith.mulf %157, %158 : vector<16x32xf32>
    %c16_49 = arith.constant 16 : index
    %c32_50 = arith.constant 32 : index
    %160 = vector.load %arg17[%c16_49, %c32_50] : memref<64x128xf32, #tpu.memory_space<vmem>>, vector<16x32xf32>
    tpu.vector_store %arg17[%c16_49, %c32_50], %159 {strides = array<i32>} : memref<64x128xf32, #tpu.memory_space<vmem>>, vector<16x32xf32>,
    %161 = vector.extract_strided_slice %38 {offsets = [16, 64], sizes = [16, 32], strides = [1, 1]} : vector<64x128xf32> to vector<16x32xf32>
    %162 = arith.truncf %161 : vector<16x32xf32> to vector<16x32xbf16>
    %163 = vector.extract_strided_slice %39 {offsets = [16, 64], sizes = [16, 32], strides = [1, 1]} : vector<64x128xf32> to vector<16x32xf32>
    %164 = arith.truncf %163 : vector<16x32xf32> to vector<16x32xbf16>
    %165 = vector.extract_strided_slice %40 {offsets = [16, 64], sizes = [16, 32], strides = [1, 1]} : vector<64x128xf32> to vector<16x32xf32>
    %166 = arith.truncf %165 : vector<16x32xf32> to vector<16x32xbf16>
    %cst_51 = arith.constant dense<0.000000e+00> : vector<16x16xf32>
    %167 = tpu.matmul %162, %164, %cst_51 {dimension_numbers = #tpu.dot_dimension_numbers<[1], [1], [0], [0], [0, 0, 1, 0], [], []>} : vector<16x32xbf16>, vector<16x32xbf16>, vector<16x16xf32> -> vector<16x16xf32>
    %cst_52 = arith.constant dense<0xFF800000> : vector<16xf32>
    %168 = vector.multi_reduction <maximumf>, %167, %cst_52 [1] : vector<16x16xf32> to vector<16xf32>
    %169 = vector.shape_cast %168 : vector<16xf32> to vector<16x1xf32>
    %170 = vector.broadcast %169 : vector<16x1xf32> to vector<16x16xf32>
    %171 = arith.subf %167, %170 : vector<16x16xf32>
    %172 = math.exp %171 : vector<16x16xf32>
    %cst_53 = arith.constant dense<0.000000e+00> : vector<16xf32>
    %173 = vector.multi_reduction <add>, %172, %cst_53 [1] : vector<16x16xf32> to vector<16xf32>
    %174 = vector.shape_cast %173 : vector<16xf32> to vector<16x1xf32>
    %175 = tpu.reciprocal %174 {approx = true} : vector<16x1xf32> -> vector<16x1xf32>
    %176 = arith.truncf %172 : vector<16x16xf32> to vector<16x16xbf16>
    %cst_54 = arith.constant dense<0.000000e+00> : vector<16x32xf32>
    %177 = tpu.matmul %176, %166, %cst_54 {dimension_numbers = #tpu.dot_dimension_numbers<[1], [0], [0], [1], [0, 0, 1, 1], [], []>} : vector<16x16xbf16>, vector<16x32xbf16>, vector<16x32xf32> -> vector<16x32xf32>
    %178 = vector.broadcast %175 : vector<16x1xf32> to vector<16x32xf32>
    %179 = arith.mulf %177, %178 : vector<16x32xf32>
    %c16_55 = arith.constant 16 : index
    %c64_56 = arith.constant 64 : index
    %180 = vector.load %arg17[%c16_55, %c64_56] : memref<64x128xf32, #tpu.memory_space<vmem>>, vector<16x32xf32>
    tpu.vector_store %arg17[%c16_55, %c64_56], %179 {strides = array<i32>} : memref<64x128xf32, #tpu.memory_space<vmem>>, vector<16x32xf32>,
    %181 = vector.extract_strided_slice %38 {offsets = [16, 96], sizes = [16, 32], strides = [1, 1]} : vector<64x128xf32> to vector<16x32xf32>
    %182 = arith.truncf %181 : vector<16x32xf32> to vector<16x32xbf16>
    %183 = vector.extract_strided_slice %39 {offsets = [16, 96], sizes = [16, 32], strides = [1, 1]} : vector<64x128xf32> to vector<16x32xf32>
    %184 = arith.truncf %183 : vector<16x32xf32> to vector<16x32xbf16>
    %185 = vector.extract_strided_slice %40 {offsets = [16, 96], sizes = [16, 32], strides = [1, 1]} : vector<64x128xf32> to vector<16x32xf32>
    %186 = arith.truncf %185 : vector<16x32xf32> to vector<16x32xbf16>
    %cst_57 = arith.constant dense<0.000000e+00> : vector<16x16xf32>
    %187 = tpu.matmul %182, %184, %cst_57 {dimension_numbers = #tpu.dot_dimension_numbers<[1], [1], [0], [0], [0, 0, 1, 0], [], []>} : vector<16x32xbf16>, vector<16x32xbf16>, vector<16x16xf32> -> vector<16x16xf32>
    %cst_58 = arith.constant dense<0xFF800000> : vector<16xf32>
    %188 = vector.multi_reduction <maximumf>, %187, %cst_58 [1] : vector<16x16xf32> to vector<16xf32>
    %189 = vector.shape_cast %188 : vector<16xf32> to vector<16x1xf32>
    %190 = vector.broadcast %189 : vector<16x1xf32> to vector<16x16xf32>
    %191 = arith.subf %187, %190 : vector<16x16xf32>
    %192 = math.exp %191 : vector<16x16xf32>
    %cst_59 = arith.constant dense<0.000000e+00> : vector<16xf32>
    %193 = vector.multi_reduction <add>, %192, %cst_59 [1] : vector<16x16xf32> to vector<16xf32>
    %194 = vector.shape_cast %193 : vector<16xf32> to vector<16x1xf32>
    %195 = tpu.reciprocal %194 {approx = true} : vector<16x1xf32> -> vector<16x1xf32>
    %196 = arith.truncf %192 : vector<16x16xf32> to vector<16x16xbf16>
    %cst_60 = arith.constant dense<0.000000e+00> : vector<16x32xf32>
    %197 = tpu.matmul %196, %186, %cst_60 {dimension_numbers = #tpu.dot_dimension_numbers<[1], [0], [0], [1], [0, 0, 1, 1], [], []>} : vector<16x16xbf16>, vector<16x32xbf16>, vector<16x32xf32> -> vector<16x32xf32>
    %198 = vector.broadcast %195 : vector<16x1xf32> to vector<16x32xf32>
    %199 = arith.mulf %197, %198 : vector<16x32xf32>
    %c16_61 = arith.constant 16 : index
    %c96_62 = arith.constant 96 : index
    %200 = vector.load %arg17[%c16_61, %c96_62] : memref<64x128xf32, #tpu.memory_space<vmem>>, vector<16x32xf32>
    tpu.vector_store %arg17[%c16_61, %c96_62], %199 {strides = array<i32>} : memref<64x128xf32, #tpu.memory_space<vmem>>, vector<16x32xf32>,
    %201 = vector.extract_strided_slice %38 {offsets = [32, 0], sizes = [16, 32], strides = [1, 1]} : vector<64x128xf32> to vector<16x32xf32>
    %202 = arith.truncf %201 : vector<16x32xf32> to vector<16x32xbf16>
    %203 = vector.extract_strided_slice %39 {offsets = [32, 0], sizes = [16, 32], strides = [1, 1]} : vector<64x128xf32> to vector<16x32xf32>
    %204 = arith.truncf %203 : vector<16x32xf32> to vector<16x32xbf16>
    %205 = vector.extract_strided_slice %40 {offsets = [32, 0], sizes = [16, 32], strides = [1, 1]} : vector<64x128xf32> to vector<16x32xf32>
    %206 = arith.truncf %205 : vector<16x32xf32> to vector<16x32xbf16>
    %cst_63 = arith.constant dense<0.000000e+00> : vector<16x16xf32>
    %207 = tpu.matmul %202, %204, %cst_63 {dimension_numbers = #tpu.dot_dimension_numbers<[1], [1], [0], [0], [0, 0, 1, 0], [], []>} : vector<16x32xbf16>, vector<16x32xbf16>, vector<16x16xf32> -> vector<16x16xf32>
    %cst_64 = arith.constant dense<0xFF800000> : vector<16xf32>
    %208 = vector.multi_reduction <maximumf>, %207, %cst_64 [1] : vector<16x16xf32> to vector<16xf32>
    %209 = vector.shape_cast %208 : vector<16xf32> to vector<16x1xf32>
    %210 = vector.broadcast %209 : vector<16x1xf32> to vector<16x16xf32>
    %211 = arith.subf %207, %210 : vector<16x16xf32>
    %212 = math.exp %211 : vector<16x16xf32>
    %cst_65 = arith.constant dense<0.000000e+00> : vector<16xf32>
    %213 = vector.multi_reduction <add>, %212, %cst_65 [1] : vector<16x16xf32> to vector<16xf32>
    %214 = vector.shape_cast %213 : vector<16xf32> to vector<16x1xf32>
    %215 = tpu.reciprocal %214 {approx = true} : vector<16x1xf32> -> vector<16x1xf32>
    %216 = arith.truncf %212 : vector<16x16xf32> to vector<16x16xbf16>
    %cst_66 = arith.constant dense<0.000000e+00> : vector<16x32xf32>
    %217 = tpu.matmul %216, %206, %cst_66 {dimension_numbers = #tpu.dot_dimension_numbers<[1], [0], [0], [1], [0, 0, 1, 1], [], []>} : vector<16x16xbf16>, vector<16x32xbf16>, vector<16x32xf32> -> vector<16x32xf32>
    %218 = vector.broadcast %215 : vector<16x1xf32> to vector<16x32xf32>
    %219 = arith.mulf %217, %218 : vector<16x32xf32>
    %c32_67 = arith.constant 32 : index
    %c0_68 = arith.constant 0 : index
    %220 = vector.load %arg17[%c32_67, %c0_68] : memref<64x128xf32, #tpu.memory_space<vmem>>, vector<16x32xf32>
    tpu.vector_store %arg17[%c32_67, %c0_68], %219 {strides = array<i32>} : memref<64x128xf32, #tpu.memory_space<vmem>>, vector<16x32xf32>,
    %221 = vector.extract_strided_slice %38 {offsets = [32, 32], sizes = [16, 32], strides = [1, 1]} : vector<64x128xf32> to vector<16x32xf32>
    %222 = arith.truncf %221 : vector<16x32xf32> to vector<16x32xbf16>
    %223 = vector.extract_strided_slice %39 {offsets = [32, 32], sizes = [16, 32], strides = [1, 1]} : vector<64x128xf32> to vector<16x32xf32>
    %224 = arith.truncf %223 : vector<16x32xf32> to vector<16x32xbf16>
    %225 = vector.extract_strided_slice %40 {offsets = [32, 32], sizes = [16, 32], strides = [1, 1]} : vector<64x128xf32> to vector<16x32xf32>
    %226 = arith.truncf %225 : vector<16x32xf32> to vector<16x32xbf16>
    %cst_69 = arith.constant dense<0.000000e+00> : vector<16x16xf32>
    %227 = tpu.matmul %222, %224, %cst_69 {dimension_numbers = #tpu.dot_dimension_numbers<[1], [1], [0], [0], [0, 0, 1, 0], [], []>} : vector<16x32xbf16>, vector<16x32xbf16>, vector<16x16xf32> -> vector<16x16xf32>
    %cst_70 = arith.constant dense<0xFF800000> : vector<16xf32>
    %228 = vector.multi_reduction <maximumf>, %227, %cst_70 [1] : vector<16x16xf32> to vector<16xf32>
    %229 = vector.shape_cast %228 : vector<16xf32> to vector<16x1xf32>
    %230 = vector.broadcast %229 : vector<16x1xf32> to vector<16x16xf32>
    %231 = arith.subf %227, %230 : vector<16x16xf32>
    %232 = math.exp %231 : vector<16x16xf32>
    %cst_71 = arith.constant dense<0.000000e+00> : vector<16xf32>
    %233 = vector.multi_reduction <add>, %232, %cst_71 [1] : vector<16x16xf32> to vector<16xf32>
    %234 = vector.shape_cast %233 : vector<16xf32> to vector<16x1xf32>
    %235 = tpu.reciprocal %234 {approx = true} : vector<16x1xf32> -> vector<16x1xf32>
    %236 = arith.truncf %232 : vector<16x16xf32> to vector<16x16xbf16>
    %cst_72 = arith.constant dense<0.000000e+00> : vector<16x32xf32>
    %237 = tpu.matmul %236, %226, %cst_72 {dimension_numbers = #tpu.dot_dimension_numbers<[1], [0], [0], [1], [0, 0, 1, 1], [], []>} : vector<16x16xbf16>, vector<16x32xbf16>, vector<16x32xf32> -> vector<16x32xf32>
    %238 = vector.broadcast %235 : vector<16x1xf32> to vector<16x32xf32>
    %239 = arith.mulf %237, %238 : vector<16x32xf32>
    %c32_73 = arith.constant 32 : index
    %c32_74 = arith.constant 32 : index
    %240 = vector.load %arg17[%c32_73, %c32_74] : memref<64x128xf32, #tpu.memory_space<vmem>>, vector<16x32xf32>
    tpu.vector_store %arg17[%c32_73, %c32_74], %239 {strides = array<i32>} : memref<64x128xf32, #tpu.memory_space<vmem>>, vector<16x32xf32>,
    %241 = vector.extract_strided_slice %38 {offsets = [32, 64], sizes = [16, 32], strides = [1, 1]} : vector<64x128xf32> to vector<16x32xf32>
    %242 = arith.truncf %241 : vector<16x32xf32> to vector<16x32xbf16>
    %243 = vector.extract_strided_slice %39 {offsets = [32, 64], sizes = [16, 32], strides = [1, 1]} : vector<64x128xf32> to vector<16x32xf32>
    %244 = arith.truncf %243 : vector<16x32xf32> to vector<16x32xbf16>
    %245 = vector.extract_strided_slice %40 {offsets = [32, 64], sizes = [16, 32], strides = [1, 1]} : vector<64x128xf32> to vector<16x32xf32>
    %246 = arith.truncf %245 : vector<16x32xf32> to vector<16x32xbf16>
    %cst_75 = arith.constant dense<0.000000e+00> : vector<16x16xf32>
    %247 = tpu.matmul %242, %244, %cst_75 {dimension_numbers = #tpu.dot_dimension_numbers<[1], [1], [0], [0], [0, 0, 1, 0], [], []>} : vector<16x32xbf16>, vector<16x32xbf16>, vector<16x16xf32> -> vector<16x16xf32>
    %cst_76 = arith.constant dense<0xFF800000> : vector<16xf32>
    %248 = vector.multi_reduction <maximumf>, %247, %cst_76 [1] : vector<16x16xf32> to vector<16xf32>
    %249 = vector.shape_cast %248 : vector<16xf32> to vector<16x1xf32>
    %250 = vector.broadcast %249 : vector<16x1xf32> to vector<16x16xf32>
    %251 = arith.subf %247, %250 : vector<16x16xf32>
    %252 = math.exp %251 : vector<16x16xf32>
    %cst_77 = arith.constant dense<0.000000e+00> : vector<16xf32>
    %253 = vector.multi_reduction <add>, %252, %cst_77 [1] : vector<16x16xf32> to vector<16xf32>
    %254 = vector.shape_cast %253 : vector<16xf32> to vector<16x1xf32>
    %255 = tpu.reciprocal %254 {approx = true} : vector<16x1xf32> -> vector<16x1xf32>
    %256 = arith.truncf %252 : vector<16x16xf32> to vector<16x16xbf16>
    %cst_78 = arith.constant dense<0.000000e+00> : vector<16x32xf32>
    %257 = tpu.matmul %256, %246, %cst_78 {dimension_numbers = #tpu.dot_dimension_numbers<[1], [0], [0], [1], [0, 0, 1, 1], [], []>} : vector<16x16xbf16>, vector<16x32xbf16>, vector<16x32xf32> -> vector<16x32xf32>
    %258 = vector.broadcast %255 : vector<16x1xf32> to vector<16x32xf32>
    %259 = arith.mulf %257, %258 : vector<16x32xf32>
    %c32_79 = arith.constant 32 : index
    %c64_80 = arith.constant 64 : index
    %260 = vector.load %arg17[%c32_79, %c64_80] : memref<64x128xf32, #tpu.memory_space<vmem>>, vector<16x32xf32>
    tpu.vector_store %arg17[%c32_79, %c64_80], %259 {strides = array<i32>} : memref<64x128xf32, #tpu.memory_space<vmem>>, vector<16x32xf32>,
    %261 = vector.extract_strided_slice %38 {offsets = [32, 96], sizes = [16, 32], strides = [1, 1]} : vector<64x128xf32> to vector<16x32xf32>
    %262 = arith.truncf %261 : vector<16x32xf32> to vector<16x32xbf16>
    %263 = vector.extract_strided_slice %39 {offsets = [32, 96], sizes = [16, 32], strides = [1, 1]} : vector<64x128xf32> to vector<16x32xf32>
    %264 = arith.truncf %263 : vector<16x32xf32> to vector<16x32xbf16>
    %265 = vector.extract_strided_slice %40 {offsets = [32, 96], sizes = [16, 32], strides = [1, 1]} : vector<64x128xf32> to vector<16x32xf32>
    %266 = arith.truncf %265 : vector<16x32xf32> to vector<16x32xbf16>
    %cst_81 = arith.constant dense<0.000000e+00> : vector<16x16xf32>
    %267 = tpu.matmul %262, %264, %cst_81 {dimension_numbers = #tpu.dot_dimension_numbers<[1], [1], [0], [0], [0, 0, 1, 0], [], []>} : vector<16x32xbf16>, vector<16x32xbf16>, vector<16x16xf32> -> vector<16x16xf32>
    %cst_82 = arith.constant dense<0xFF800000> : vector<16xf32>
    %268 = vector.multi_reduction <maximumf>, %267, %cst_82 [1] : vector<16x16xf32> to vector<16xf32>
    %269 = vector.shape_cast %268 : vector<16xf32> to vector<16x1xf32>
    %270 = vector.broadcast %269 : vector<16x1xf32> to vector<16x16xf32>
    %271 = arith.subf %267, %270 : vector<16x16xf32>
    %272 = math.exp %271 : vector<16x16xf32>
    %cst_83 = arith.constant dense<0.000000e+00> : vector<16xf32>
    %273 = vector.multi_reduction <add>, %272, %cst_83 [1] : vector<16x16xf32> to vector<16xf32>
    %274 = vector.shape_cast %273 : vector<16xf32> to vector<16x1xf32>
    %275 = tpu.reciprocal %274 {approx = true} : vector<16x1xf32> -> vector<16x1xf32>
    %276 = arith.truncf %272 : vector<16x16xf32> to vector<16x16xbf16>
    %cst_84 = arith.constant dense<0.000000e+00> : vector<16x32xf32>
    %277 = tpu.matmul %276, %266, %cst_84 {dimension_numbers = #tpu.dot_dimension_numbers<[1], [0], [0], [1], [0, 0, 1, 1], [], []>} : vector<16x16xbf16>, vector<16x32xbf16>, vector<16x32xf32> -> vector<16x32xf32>
    %278 = vector.broadcast %275 : vector<16x1xf32> to vector<16x32xf32>
    %279 = arith.mulf %277, %278 : vector<16x32xf32>
    %c32_85 = arith.constant 32 : index
    %c96_86 = arith.constant 96 : index
    %280 = vector.load %arg17[%c32_85, %c96_86] : memref<64x128xf32, #tpu.memory_space<vmem>>, vector<16x32xf32>
    tpu.vector_store %arg17[%c32_85, %c96_86], %279 {strides = array<i32>} : memref<64x128xf32, #tpu.memory_space<vmem>>, vector<16x32xf32>,
    %281 = vector.extract_strided_slice %38 {offsets = [48, 0], sizes = [16, 32], strides = [1, 1]} : vector<64x128xf32> to vector<16x32xf32>
    %282 = arith.truncf %281 : vector<16x32xf32> to vector<16x32xbf16>
    %283 = vector.extract_strided_slice %39 {offsets = [48, 0], sizes = [16, 32], strides = [1, 1]} : vector<64x128xf32> to vector<16x32xf32>
    %284 = arith.truncf %283 : vector<16x32xf32> to vector<16x32xbf16>
    %285 = vector.extract_strided_slice %40 {offsets = [48, 0], sizes = [16, 32], strides = [1, 1]} : vector<64x128xf32> to vector<16x32xf32>
    %286 = arith.truncf %285 : vector<16x32xf32> to vector<16x32xbf16>
    %cst_87 = arith.constant dense<0.000000e+00> : vector<16x16xf32>
    %287 = tpu.matmul %282, %284, %cst_87 {dimension_numbers = #tpu.dot_dimension_numbers<[1], [1], [0], [0], [0, 0, 1, 0], [], []>} : vector<16x32xbf16>, vector<16x32xbf16>, vector<16x16xf32> -> vector<16x16xf32>
    %cst_88 = arith.constant dense<0xFF800000> : vector<16xf32>
    %288 = vector.multi_reduction <maximumf>, %287, %cst_88 [1] : vector<16x16xf32> to vector<16xf32>
    %289 = vector.shape_cast %288 : vector<16xf32> to vector<16x1xf32>
    %290 = vector.broadcast %289 : vector<16x1xf32> to vector<16x16xf32>
    %291 = arith.subf %287, %290 : vector<16x16xf32>
    %292 = math.exp %291 : vector<16x16xf32>
    %cst_89 = arith.constant dense<0.000000e+00> : vector<16xf32>
    %293 = vector.multi_reduction <add>, %292, %cst_89 [1] : vector<16x16xf32> to vector<16xf32>
    %294 = vector.shape_cast %293 : vector<16xf32> to vector<16x1xf32>
    %295 = tpu.reciprocal %294 {approx = true} : vector<16x1xf32> -> vector<16x1xf32>
    %296 = arith.truncf %292 : vector<16x16xf32> to vector<16x16xbf16>
    %cst_90 = arith.constant dense<0.000000e+00> : vector<16x32xf32>
    %297 = tpu.matmul %296, %286, %cst_90 {dimension_numbers = #tpu.dot_dimension_numbers<[1], [0], [0], [1], [0, 0, 1, 1], [], []>} : vector<16x16xbf16>, vector<16x32xbf16>, vector<16x32xf32> -> vector<16x32xf32>
    %298 = vector.broadcast %295 : vector<16x1xf32> to vector<16x32xf32>
    %299 = arith.mulf %297, %298 : vector<16x32xf32>
    %c48 = arith.constant 48 : index
    %c0_91 = arith.constant 0 : index
    %300 = vector.load %arg17[%c48, %c0_91] : memref<64x128xf32, #tpu.memory_space<vmem>>, vector<16x32xf32>
    tpu.vector_store %arg17[%c48, %c0_91], %299 {strides = array<i32>} : memref<64x128xf32, #tpu.memory_space<vmem>>, vector<16x32xf32>,
    %301 = vector.extract_strided_slice %38 {offsets = [48, 32], sizes = [16, 32], strides = [1, 1]} : vector<64x128xf32> to vector<16x32xf32>
    %302 = arith.truncf %301 : vector<16x32xf32> to vector<16x32xbf16>
    %303 = vector.extract_strided_slice %39 {offsets = [48, 32], sizes = [16, 32], strides = [1, 1]} : vector<64x128xf32> to vector<16x32xf32>
    %304 = arith.truncf %303 : vector<16x32xf32> to vector<16x32xbf16>
    %305 = vector.extract_strided_slice %40 {offsets = [48, 32], sizes = [16, 32], strides = [1, 1]} : vector<64x128xf32> to vector<16x32xf32>
    %306 = arith.truncf %305 : vector<16x32xf32> to vector<16x32xbf16>
    %cst_92 = arith.constant dense<0.000000e+00> : vector<16x16xf32>
    %307 = tpu.matmul %302, %304, %cst_92 {dimension_numbers = #tpu.dot_dimension_numbers<[1], [1], [0], [0], [0, 0, 1, 0], [], []>} : vector<16x32xbf16>, vector<16x32xbf16>, vector<16x16xf32> -> vector<16x16xf32>
    %cst_93 = arith.constant dense<0xFF800000> : vector<16xf32>
    %308 = vector.multi_reduction <maximumf>, %307, %cst_93 [1] : vector<16x16xf32> to vector<16xf32>
    %309 = vector.shape_cast %308 : vector<16xf32> to vector<16x1xf32>
    %310 = vector.broadcast %309 : vector<16x1xf32> to vector<16x16xf32>
    %311 = arith.subf %307, %310 : vector<16x16xf32>
    %312 = math.exp %311 : vector<16x16xf32>
    %cst_94 = arith.constant dense<0.000000e+00> : vector<16xf32>
    %313 = vector.multi_reduction <add>, %312, %cst_94 [1] : vector<16x16xf32> to vector<16xf32>
    %314 = vector.shape_cast %313 : vector<16xf32> to vector<16x1xf32>
    %315 = tpu.reciprocal %314 {approx = true} : vector<16x1xf32> -> vector<16x1xf32>
    %316 = arith.truncf %312 : vector<16x16xf32> to vector<16x16xbf16>
    %cst_95 = arith.constant dense<0.000000e+00> : vector<16x32xf32>
    %317 = tpu.matmul %316, %306, %cst_95 {dimension_numbers = #tpu.dot_dimension_numbers<[1], [0], [0], [1], [0, 0, 1, 1], [], []>} : vector<16x16xbf16>, vector<16x32xbf16>, vector<16x32xf32> -> vector<16x32xf32>
    %318 = vector.broadcast %315 : vector<16x1xf32> to vector<16x32xf32>
    %319 = arith.mulf %317, %318 : vector<16x32xf32>
    %c48_96 = arith.constant 48 : index
    %c32_97 = arith.constant 32 : index
    %320 = vector.load %arg17[%c48_96, %c32_97] : memref<64x128xf32, #tpu.memory_space<vmem>>, vector<16x32xf32>
    tpu.vector_store %arg17[%c48_96, %c32_97], %319 {strides = array<i32>} : memref<64x128xf32, #tpu.memory_space<vmem>>, vector<16x32xf32>,
    %321 = vector.extract_strided_slice %38 {offsets = [48, 64], sizes = [16, 32], strides = [1, 1]} : vector<64x128xf32> to vector<16x32xf32>
    %322 = arith.truncf %321 : vector<16x32xf32> to vector<16x32xbf16>
    %323 = vector.extract_strided_slice %39 {offsets = [48, 64], sizes = [16, 32], strides = [1, 1]} : vector<64x128xf32> to vector<16x32xf32>
    %324 = arith.truncf %323 : vector<16x32xf32> to vector<16x32xbf16>
    %325 = vector.extract_strided_slice %40 {offsets = [48, 64], sizes = [16, 32], strides = [1, 1]} : vector<64x128xf32> to vector<16x32xf32>
    %326 = arith.truncf %325 : vector<16x32xf32> to vector<16x32xbf16>
    %cst_98 = arith.constant dense<0.000000e+00> : vector<16x16xf32>
    %327 = tpu.matmul %322, %324, %cst_98 {dimension_numbers = #tpu.dot_dimension_numbers<[1], [1], [0], [0], [0, 0, 1, 0], [], []>} : vector<16x32xbf16>, vector<16x32xbf16>, vector<16x16xf32> -> vector<16x16xf32>
    %cst_99 = arith.constant dense<0xFF800000> : vector<16xf32>
    %328 = vector.multi_reduction <maximumf>, %327, %cst_99 [1] : vector<16x16xf32> to vector<16xf32>
    %329 = vector.shape_cast %328 : vector<16xf32> to vector<16x1xf32>
    %330 = vector.broadcast %329 : vector<16x1xf32> to vector<16x16xf32>
    %331 = arith.subf %327, %330 : vector<16x16xf32>
    %332 = math.exp %331 : vector<16x16xf32>
    %cst_100 = arith.constant dense<0.000000e+00> : vector<16xf32>
    %333 = vector.multi_reduction <add>, %332, %cst_100 [1] : vector<16x16xf32> to vector<16xf32>
    %334 = vector.shape_cast %333 : vector<16xf32> to vector<16x1xf32>
    %335 = tpu.reciprocal %334 {approx = true} : vector<16x1xf32> -> vector<16x1xf32>
    %336 = arith.truncf %332 : vector<16x16xf32> to vector<16x16xbf16>
    %cst_101 = arith.constant dense<0.000000e+00> : vector<16x32xf32>
    %337 = tpu.matmul %336, %326, %cst_101 {dimension_numbers = #tpu.dot_dimension_numbers<[1], [0], [0], [1], [0, 0, 1, 1], [], []>} : vector<16x16xbf16>, vector<16x32xbf16>, vector<16x32xf32> -> vector<16x32xf32>
    %338 = vector.broadcast %335 : vector<16x1xf32> to vector<16x32xf32>
    %339 = arith.mulf %337, %338 : vector<16x32xf32>
    %c48_102 = arith.constant 48 : index
    %c64_103 = arith.constant 64 : index
    %340 = vector.load %arg17[%c48_102, %c64_103] : memref<64x128xf32, #tpu.memory_space<vmem>>, vector<16x32xf32>
    tpu.vector_store %arg17[%c48_102, %c64_103], %339 {strides = array<i32>} : memref<64x128xf32, #tpu.memory_space<vmem>>, vector<16x32xf32>,
    %341 = vector.extract_strided_slice %38 {offsets = [48, 96], sizes = [16, 32], strides = [1, 1]} : vector<64x128xf32> to vector<16x32xf32>
    %342 = arith.truncf %341 : vector<16x32xf32> to vector<16x32xbf16>
    %343 = vector.extract_strided_slice %39 {offsets = [48, 96], sizes = [16, 32], strides = [1, 1]} : vector<64x128xf32> to vector<16x32xf32>
    %344 = arith.truncf %343 : vector<16x32xf32> to vector<16x32xbf16>
    %345 = vector.extract_strided_slice %40 {offsets = [48, 96], sizes = [16, 32], strides = [1, 1]} : vector<64x128xf32> to vector<16x32xf32>
    %346 = arith.truncf %345 : vector<16x32xf32> to vector<16x32xbf16>
    %cst_104 = arith.constant dense<0.000000e+00> : vector<16x16xf32>
    %347 = tpu.matmul %342, %344, %cst_104 {dimension_numbers = #tpu.dot_dimension_numbers<[1], [1], [0], [0], [0, 0, 1, 0], [], []>} : vector<16x32xbf16>, vector<16x32xbf16>, vector<16x16xf32> -> vector<16x16xf32>
    %cst_105 = arith.constant dense<0xFF800000> : vector<16xf32>
    %348 = vector.multi_reduction <maximumf>, %347, %cst_105 [1] : vector<16x16xf32> to vector<16xf32>
    %349 = vector.shape_cast %348 : vector<16xf32> to vector<16x1xf32>
    %350 = vector.broadcast %349 : vector<16x1xf32> to vector<16x16xf32>
    %351 = arith.subf %347, %350 : vector<16x16xf32>
    %352 = math.exp %351 : vector<16x16xf32>
    %cst_106 = arith.constant dense<0.000000e+00> : vector<16xf32>
    %353 = vector.multi_reduction <add>, %352, %cst_106 [1] : vector<16x16xf32> to vector<16xf32>
    %354 = vector.shape_cast %353 : vector<16xf32> to vector<16x1xf32>
    %355 = tpu.reciprocal %354 {approx = true} : vector<16x1xf32> -> vector<16x1xf32>
    %356 = arith.truncf %352 : vector<16x16xf32> to vector<16x16xbf16>
    %cst_107 = arith.constant dense<0.000000e+00> : vector<16x32xf32>
    %357 = tpu.matmul %356, %346, %cst_107 {dimension_numbers = #tpu.dot_dimension_numbers<[1], [0], [0], [1], [0, 0, 1, 1], [], []>} : vector<16x16xbf16>, vector<16x32xbf16>, vector<16x32xf32> -> vector<16x32xf32>
    %358 = vector.broadcast %355 : vector<16x1xf32> to vector<16x32xf32>
    %359 = arith.mulf %357, %358 : vector<16x32xf32>
    %c48_108 = arith.constant 48 : index
    %c96_109 = arith.constant 96 : index
    %360 = vector.load %arg17[%c48_108, %c96_109] : memref<64x128xf32, #tpu.memory_space<vmem>>, vector<16x32xf32>
    tpu.vector_store %arg17[%c48_108, %c96_109], %359 {strides = array<i32>} : memref<64x128xf32, #tpu.memory_space<vmem>>, vector<16x32xf32>,
    %c0_110 = arith.constant 0 : index
    %c0_111 = arith.constant 0 : index
    %361 = vector.load %arg17[%c0_110, %c0_111] : memref<64x128xf32, #tpu.memory_space<vmem>>, vector<64x128xf32>
    %362 = arith.truncf %361 : vector<64x128xf32> to vector<64x128xbf16>
    %c0_112 = arith.constant 0 : index
    %c0_113 = arith.constant 0 : index
    %c0_114 = arith.constant 0 : index
    %363 = vector.load %arg7[%c0_112, %c0_113, %c0_114] : memref<1x128x128xbf16, #tpu.memory_space<vmem>>, vector<1x128x128xbf16>
    %364 = vector.shape_cast %363 : vector<1x128x128xbf16> to vector<128x128xbf16>
    %cst_115 = arith.constant dense<0.000000e+00> : vector<64x128xf32>
    %365 = tpu.matmul %362, %364, %cst_115 {dimension_numbers = #tpu.dot_dimension_numbers<[1], [0], [0], [1], [0, 0, 1, 1], [], []>} : vector<64x128xbf16>, vector<128x128xbf16>, vector<64x128xf32> -> vector<64x128xf32>
    %c0_116 = arith.constant 0 : index
    %c0_117 = arith.constant 0 : index
    %c0_118 = arith.constant 0 : index
    %366 = vector.load %arg8[%c0_116, %c0_117, %c0_118] : memref<1x1x128xf32, #tpu.memory_space<vmem>>, vector<1x1x128xf32>
    %367 = vector.shape_cast %366 : vector<1x1x128xf32> to vector<1x128xf32>
    %368 = vector.broadcast %367 : vector<1x128xf32> to vector<64x128xf32>
    %369 = arith.addf %365, %368 : vector<64x128xf32>
    %370 = arith.addf %3, %369 : vector<64x128xf32>
    %c0_119 = arith.constant 0 : index
    %c0_120 = arith.constant 0 : index
    %c0_121 = arith.constant 0 : index
    %371 = vector.load %arg9[%c0_119, %c0_120, %c0_121] : memref<1x1x128xf32, #tpu.memory_space<vmem>>, vector<1x1x128xf32>
    %372 = vector.shape_cast %371 : vector<1x1x128xf32> to vector<1x128xf32>
    %c0_122 = arith.constant 0 : index
    %c0_123 = arith.constant 0 : index
    %c0_124 = arith.constant 0 : index
    %373 = vector.load %arg10[%c0_122, %c0_123, %c0_124] : memref<1x1x128xf32, #tpu.memory_space<vmem>>, vector<1x1x128xf32>
    %374 = vector.shape_cast %373 : vector<1x1x128xf32> to vector<1x128xf32>
    %cst_125 = arith.constant dense<0.000000e+00> : vector<64xf32>
    %375 = vector.multi_reduction <add>, %370, %cst_125 [1] : vector<64x128xf32> to vector<64xf32>
    %376 = vector.shape_cast %375 : vector<64xf32> to vector<64x1xf32>
    %cst_126 = arith.constant 1.280000e+02 : f32
    %377 = vector.broadcast %cst_126 : f32 to vector<64x1xf32>
    %378 = arith.divf %376, %377 : vector<64x1xf32>
    %379 = vector.broadcast %378 : vector<64x1xf32> to vector<64x128xf32>
    %380 = arith.subf %370, %379 : vector<64x128xf32>
    %381 = arith.mulf %380, %380 : vector<64x128xf32>
    %cst_127 = arith.constant dense<0.000000e+00> : vector<64xf32>
    %382 = vector.multi_reduction <add>, %381, %cst_127 [1] : vector<64x128xf32> to vector<64xf32>
    %383 = vector.shape_cast %382 : vector<64xf32> to vector<64x1xf32>
    %cst_128 = arith.constant 1.280000e+02 : f32
    %384 = vector.broadcast %cst_128 : f32 to vector<64x1xf32>
    %385 = arith.divf %383, %384 : vector<64x1xf32>
    %386 = vector.broadcast %378 : vector<64x1xf32> to vector<64x128xf32>
    %387 = arith.subf %370, %386 : vector<64x128xf32>
    %cst_129 = arith.constant 9.99999974E-6 : f32
    %388 = vector.broadcast %cst_129 : f32 to vector<64x1xf32>
    %389 = arith.addf %385, %388 : vector<64x1xf32>
    %390 = math.rsqrt %389 : vector<64x1xf32>
    %391 = vector.broadcast %390 : vector<64x1xf32> to vector<64x128xf32>
    %392 = arith.mulf %387, %391 : vector<64x128xf32>
    %393 = vector.broadcast %372 : vector<1x128xf32> to vector<64x128xf32>
    %394 = arith.mulf %392, %393 : vector<64x128xf32>
    %395 = vector.broadcast %374 : vector<1x128xf32> to vector<64x128xf32>
    %396 = arith.addf %394, %395 : vector<64x128xf32>
    %397 = arith.truncf %396 : vector<64x128xf32> to vector<64x128xbf16>
    %c0_130 = arith.constant 0 : index
    %c0_131 = arith.constant 0 : index
    %c0_132 = arith.constant 0 : index
    %398 = vector.load %arg11[%c0_130, %c0_131, %c0_132] : memref<1x128x512xbf16, #tpu.memory_space<vmem>>, vector<1x128x512xbf16>
    %399 = vector.shape_cast %398 : vector<1x128x512xbf16> to vector<128x512xbf16>
    %cst_133 = arith.constant dense<0.000000e+00> : vector<64x512xf32>
    %400 = tpu.matmul %397, %399, %cst_133 {dimension_numbers = #tpu.dot_dimension_numbers<[1], [0], [0], [1], [0, 0, 1, 1], [], []>} : vector<64x128xbf16>, vector<128x512xbf16>, vector<64x512xf32> -> vector<64x512xf32>
    %c0_134 = arith.constant 0 : index
    %c0_135 = arith.constant 0 : index
    %c0_136 = arith.constant 0 : index
    %401 = vector.load %arg12[%c0_134, %c0_135, %c0_136] : memref<1x1x512xf32, #tpu.memory_space<vmem>>, vector<1x1x512xf32>
    %402 = vector.shape_cast %401 : vector<1x1x512xf32> to vector<1x512xf32>
    %403 = vector.broadcast %402 : vector<1x512xf32> to vector<64x512xf32>
    %404 = arith.addf %400, %403 : vector<64x512xf32>
    %cst_137 = arith.constant 1.702000e+00 : f32
    %405 = vector.broadcast %cst_137 : f32 to vector<64x512xf32>
    %406 = arith.mulf %405, %404 : vector<64x512xf32>
    %407 = arith.negf %406 : vector<64x512xf32>
    %408 = math.exp %407 : vector<64x512xf32>
    %cst_138 = arith.constant 1.000000e+00 : f32
    %409 = vector.broadcast %cst_138 : f32 to vector<64x512xf32>
    %410 = arith.addf %409, %408 : vector<64x512xf32>
    %411 = arith.divf %409, %410 : vector<64x512xf32>
    %412 = arith.mulf %404, %411 : vector<64x512xf32>
    %413 = arith.truncf %412 : vector<64x512xf32> to vector<64x512xbf16>
    %c0_139 = arith.constant 0 : index
    %c0_140 = arith.constant 0 : index
    %c0_141 = arith.constant 0 : index
    %414 = vector.load %arg13[%c0_139, %c0_140, %c0_141] : memref<1x512x128xbf16, #tpu.memory_space<vmem>>, vector<1x512x128xbf16>
    %415 = vector.shape_cast %414 : vector<1x512x128xbf16> to vector<512x128xbf16>
    %cst_142 = arith.constant dense<0.000000e+00> : vector<64x128xf32>
    %416 = tpu.matmul %413, %415, %cst_142 {dimension_numbers = #tpu.dot_dimension_numbers<[1], [0], [0], [1], [0, 0, 1, 1], [], []>} : vector<64x512xbf16>, vector<512x128xbf16>, vector<64x128xf32> -> vector<64x128xf32>
    %c0_143 = arith.constant 0 : index
    %c0_144 = arith.constant 0 : index
    %c0_145 = arith.constant 0 : index
    %417 = vector.load %arg14[%c0_143, %c0_144, %c0_145] : memref<1x1x128xf32, #tpu.memory_space<vmem>>, vector<1x1x128xf32>
    %418 = vector.shape_cast %417 : vector<1x1x128xf32> to vector<1x128xf32>
    %419 = vector.broadcast %418 : vector<1x128xf32> to vector<64x128xf32>
    %420 = arith.addf %416, %419 : vector<64x128xf32>
    %421 = arith.addf %370, %420 : vector<64x128xf32>
    %c0_146 = arith.constant 0 : index
    %c0_147 = arith.constant 0 : index
    %422 = vector.load %arg16[%c0_146, %c0_147] : memref<64x128xf32, #tpu.memory_space<vmem>>, vector<64x128xf32>
    tpu.vector_store %arg16[%c0_146, %c0_147], %421 {strides = array<i32>} : memref<64x128xf32, #tpu.memory_space<vmem>>, vector<64x128xf32>,
    %c1_i32 = arith.constant 1 : i32
    %423 = arith.cmpi eq, %arg1, %c1_i32 : i32
    %424 = arith.extui %423 : i1 to i32
    %c0_i32_148 = arith.constant 0 : i32
    %425 = arith.cmpi ne, %424, %c0_i32_148 : i32
    scf.if %425 {
      %426 = vector.shape_cast %421 : vector<64x128xf32> to vector<4x16x128xf32>
      %c0_149 = arith.constant 0 : index
      %c0_150 = arith.constant 0 : index
      %c0_151 = arith.constant 0 : index
      %427 = vector.load %arg15[%c0_149, %c0_150, %c0_151] : memref<4x16x128xf32, #tpu.memory_space<vmem>>, vector<4x16x128xf32>
      tpu.vector_store %arg15[%c0_149, %c0_150, %c0_151], %426 {strides = array<i32>} : memref<4x16x128xf32, #tpu.memory_space<vmem>>, vector<4x16x128xf32>,
    } else {
    }
    return
  }
  func.func @transform_0(%arg0: i32, %arg1: i32) -> (i32, i32, i32) {
    %c0_i32 = arith.constant 0 : i32
    %c0_i32_0 = arith.constant 0 : i32
    %c0_i32_1 = arith.constant 0 : i32
    return %arg0, %c0_i32, %c0_i32_0 : i32, i32, i32
  }
  func.func @transform_1(%arg0: i32, %arg1: i32) -> (i32, i32, i32) {
    %c0_i32 = arith.constant 0 : i32
    %c0_i32_0 = arith.constant 0 : i32
    %c0_i32_1 = arith.constant 0 : i32
    return %arg1, %c0_i32, %c0_i32_0 : i32, i32, i32
  }
  func.func @transform_2(%arg0: i32, %arg1: i32) -> (i32, i32, i32) {
    %c0_i32 = arith.constant 0 : i32
    %c0_i32_0 = arith.constant 0 : i32
    %c0_i32_1 = arith.constant 0 : i32
    return %arg1, %c0_i32, %c0_i32_0 : i32, i32, i32
  }
  func.func @transform_3(%arg0: i32, %arg1: i32) -> (i32, i32, i32) {
    %c0_i32 = arith.constant 0 : i32
    %c0_i32_0 = arith.constant 0 : i32
    %c0_i32_1 = arith.constant 0 : i32
    return %arg1, %c0_i32, %c0_i32_0 : i32, i32, i32
  }
  func.func @transform_4(%arg0: i32, %arg1: i32) -> (i32, i32, i32) {
    %c0_i32 = arith.constant 0 : i32
    %c0_i32_0 = arith.constant 0 : i32
    %c0_i32_1 = arith.constant 0 : i32
    return %arg1, %c0_i32, %c0_i32_0 : i32, i32, i32
  }
  func.func @transform_5(%arg0: i32, %arg1: i32) -> (i32, i32, i32) {
    %c0_i32 = arith.constant 0 : i32
    %c0_i32_0 = arith.constant 0 : i32
    %c0_i32_1 = arith.constant 0 : i32
    return %arg1, %c0_i32, %c0_i32_0 : i32, i32, i32
  }
  func.func @transform_6(%arg0: i32, %arg1: i32) -> (i32, i32, i32) {
    %c0_i32 = arith.constant 0 : i32
    %c0_i32_0 = arith.constant 0 : i32
    %c0_i32_1 = arith.constant 0 : i32
    return %arg1, %c0_i32, %c0_i32_0 : i32, i32, i32
  }
  func.func @transform_7(%arg0: i32, %arg1: i32) -> (i32, i32, i32) {
    %c0_i32 = arith.constant 0 : i32
    %c0_i32_0 = arith.constant 0 : i32
    %c0_i32_1 = arith.constant 0 : i32
    return %arg1, %c0_i32, %c0_i32_0 : i32, i32, i32
  }
  func.func @transform_8(%arg0: i32, %arg1: i32) -> (i32, i32, i32) {
    %c0_i32 = arith.constant 0 : i32
    %c0_i32_0 = arith.constant 0 : i32
    %c0_i32_1 = arith.constant 0 : i32
    return %arg1, %c0_i32, %c0_i32_0 : i32, i32, i32
  }
  func.func @transform_9(%arg0: i32, %arg1: i32) -> (i32, i32, i32) {
    %c0_i32 = arith.constant 0 : i32
    %c0_i32_0 = arith.constant 0 : i32
    %c0_i32_1 = arith.constant 0 : i32
    return %arg1, %c0_i32, %c0_i32_0 : i32, i32, i32
  }
  func.func @transform_10(%arg0: i32, %arg1: i32) -> (i32, i32, i32) {
    %c0_i32 = arith.constant 0 : i32
    %c0_i32_0 = arith.constant 0 : i32
    %c0_i32_1 = arith.constant 0 : i32
    return %arg1, %c0_i32, %c0_i32_0 : i32, i32, i32
  }
  func.func @transform_11(%arg0: i32, %arg1: i32) -> (i32, i32, i32) {
    %c0_i32 = arith.constant 0 : i32
    %c0_i32_0 = arith.constant 0 : i32
    %c0_i32_1 = arith.constant 0 : i32
    return %arg1, %c0_i32, %c0_i32_0 : i32, i32, i32
  }
  func.func @transform_12(%arg0: i32, %arg1: i32) -> (i32, i32, i32) {
    %c0_i32 = arith.constant 0 : i32
    %c0_i32_0 = arith.constant 0 : i32
    %c0_i32_1 = arith.constant 0 : i32
    return %arg1, %c0_i32, %c0_i32_0 : i32, i32, i32
  }
  func.func @transform_13(%arg0: i32, %arg1: i32) -> (i32, i32, i32) {
    %c0_i32 = arith.constant 0 : i32
    %c0_i32_0 = arith.constant 0 : i32
    %c0_i32_1 = arith.constant 0 : i32
    return %arg0, %c0_i32, %c0_i32_0 : i32, i32, i32
  }
}

</mosaic_0001>

<bundles_post_ra>
// kernel: transformer_forward.1
= control target key start
LH: loop header
LB: loop body
LE: loop exit
PB: predicated region body
PF: predicated region fallthrough
CT: control target
= control target key end

     0   :  { %s7601_s0 = inlined_call_operand.vmem [shape: f32[8,16,128], index: 0, kind: input, shape index: {}, may-alias: {0,13}]   ;;  %s7602_s1 = inlined_call_operand.vmem [shape: f32[2,1,128], index: 1, kind: input, shape index: {}]   ;;  %s7603_s2 = inlined_call_operand.vmem [shape: f32[2,1,128], index: 2, kind: input, shape index: {}]   ;;  %s7604_s3 = inlined_call_operand.hbm [shape: bf16[2,128,384], index: 3, kind: input, shape index: {}]   ;;  %s7605_s4 = inlined_call_operand.vmem [shape: f32[2,1,384], index: 4, kind: input, shape index: {}]   ;;  %s7606_s5 = inlined_call_operand.vmem [shape: bf16[2,128,128], index: 5, kind: input, shape index: {}]   ;;  %s7607_s6 = inlined_call_operand.vmem [shape: f32[2,1,128], index: 6, kind: input, shape index: {}]   ;;  %s7608_s7 = inlined_call_operand.vmem [shape: f32[2,1,128], index: 7, kind: input, shape index: {}]   ;;  %s7609_s8 = inlined_call_operand.vmem [shape: f32[2,1,128], index: 8, kind: input, shape index: {}]   ;;  %s7610_s9 = inlined_call_operand.hbm [shape: bf16[2,128,512], index: 9, kind: input, shape index: {}]   ;;  %s7611_s10 = inlined_call_operand.vmem [shape: f32[2,1,512], index: 10, kind: input, shape index: {}]   ;;  %s7612_s11 = inlined_call_operand.hbm [shape: bf16[2,512,128], index: 11, kind: input, shape index: {}]   ;;  %s7613_s12 = inlined_call_operand.vmem [shape: f32[2,1,128], index: 12, kind: input, shape index: {}]   ;;  %s7614_s13 = inlined_call_operand.vmem [shape: f32[8,16,128], index: 13, kind: output, shape index: {}, may-alias: {0,13}]  }
   0x1   :  { %7623 = sst [smem:[#allocation20_spill]] %s7601_s0 }
   0x2   :  { %7624 = sst [smem:[#allocation21_spill]] %s7604_s3 }
   0x3   :  { %7625 = sst [smem:[#allocation22_spill]] %s7605_s4 }
   0x4   :  { %7626 = sst [smem:[#allocation23_spill]] %s7606_s5 }
   0x5   :  { %7627 = sst [smem:[#allocation24_spill]] %s7607_s6 }
   0x6   :  { %7628 = sst [smem:[#allocation25_spill]] %s7608_s7 }
   0x7   :  { %7629 = sst [smem:[#allocation26_spill]] %s7609_s8 }
   0x8   :  { %7630 = sst [smem:[#allocation27_spill]] %s7610_s9 }
   0x9   :  { %7631 = sst [smem:[#allocation28_spill]] %s7611_s10 }
   0xa   :  { %7632 = sst [smem:[#allocation29_spill]] %s7612_s11 }
   0xb   :  { %7633 = sst [smem:[#allocation30_spill]] %s7613_s12 }
   0xc   :  { %7634 = sst [smem:[#allocation31_spill]] %s7614_s13 }
   0xd   :  { %18 = vsyncpa [#allocation5], 0 }
   0xe   :  { %20 = vsyncpa [#allocation5 + $0x1], 0 }
   0xf   :  { %21 = vsyncpa [#allocation7], 0 }
  0x10   :  { %23 = vsyncpa [#allocation7 + $0x1], 0  ;;  %s6181_s25 = smov 0   ;;  %s6183_s26 = smov 0  }
  0x11   :  { %s6185_s27 = smov 0   ;;  %s6187_s28 = smov 0  }
  0x12   :  { %s6189_s29 = smov 0   ;;  %s6191_s30 = smov 0  }
  0x13   :  { %s6193_s14 = smov 0   ;;  %s6195_s15 = smov 0  }
  0x14 LB: > { %7635 = sst [smem:[#allocation11_spill]] %s6070_s26  ;;  %s7616_s16 = sadd.s32 4294967295, %s6094_s15   ;;  %s6094_s15 = sphi %s6195_s15, %s29_s15   ;;  %s6090_s14 = sphi %s6193_s14, %s7675_s14   ;;  %s6086_s30 = sphi %s6191_s30, %s7674_s30   ;;  %s6082_s29 = sphi %s6189_s29, %s7673_s29   ;;  %s6078_s28 = sphi %s6187_s28, %s7672_s28   ;;  %s6074_s27 = sphi %s6185_s27, %s7671_s27   ;;  %s6070_s26 = sphi %s6183_s26, %s7670_s26   ;;  %s6066_s25 = sphi %s6181_s25, %s7669_s25  }
  0x15   : > { %7636 = sst [smem:[#allocation12_spill]] %s6074_s27  ;;  %s38_s17 = sadd.s32 1, %s6086_s30 }
  0x16   : > { %7637 = sst [smem:[#allocation13_spill]] %s6086_s30  ;;  %p39_p0 = scmp.ge.s32.totalorder %s38_s17, 2 }
  0x17   : > { %7638 = sst [smem:[#allocation14_spill]] %s6090_s14  ;;  %s41_s18 = sadd.s32 1, %s6090_s14 }
  0x18   : > { %7639 = sst [smem:[#allocation15_spill]] %s6094_s15  ;;  %s126_s19 = sadd.s32 1, %s6074_s27 }
  0x19   : > { %p133_p1 = scmp.ne.s32.totalorder %s6074_s27, %s6070_s26  ;;  %s7677_s17 = smov (%p39_p0, %s38_s17), 0 }
  0x1a   : > { %7640 = sst [smem:[#allocation16_spill]] %s7677_s17  ;;  %s7679_s18 = smov (!%p39_p0, %s41_s18), %s6090_s14 }
  0x1b   : > { %s123_s20 = ssub.s32 %s6086_s30, %s7677_s17  ;;  %p134_p2 = scmp.eq.s32.totalorder %s6094_s15, 0 }
  0x1c   : > { %p43_p3 = scmp.ge.s32.totalorder %s7679_s18, 2  ;;  %p124_p4 = scmp.eq.s32.totalorder %s123_s20, 0 }
  0x1d   : > { %p135_p5 = por %p134_p2, %p133_p1  ;;  %p139_p6 = scmp.ne.s32.totalorder %s6070_s26, %s6066_s25 }
  0x1e   : > { %s7681_s18 = smov (%p43_p3, %s7679_s18), 0  ;;  %p140_p7 = scmp.eq.s32.totalorder %s7616_s16, 0 }
  0x1f   : > { %7641 = sst [smem:[#allocation17_spill]] %s7681_s18  ;;  %p5447_p8 = scmp.lt.s32.totalorder %s6094_s15, 4 }
  0x20   : > { %s6235_s21 = scalar_select %p124_p4, %s6074_s27, %s126_s19  }
  0x21   : > { %s6241_s22 = sand.u32 1, %s6074_s27   ;;  %p6243_p9 = por %p140_p7, %p139_p6 }
  0x22   : > { %7642 = sst [smem:[#allocation18_spill]] %s6235_s21  ;;  %s499_s24 = sand.u32 1, %s6094_s15  }
  0x23   : > { %p6248_p10 = pnand %p5447_p8, %p135_p5  ;;  %s4810_s25 = sshll.u32 %s6241_s22, 8 }
  0x24   : > { %s4998_s19 = sshll.u32 %s6086_s30, 12  ;;  %s7645_s9 = sld [smem:[#allocation27_spill]] }
  0x25   : > { %s503_s14 = scalar_lea.vmem [#allocation6], %s4810_s25  ;;  %s6257_s27 = scalar_lea.sflag [#allocation7], %s499_s24 }
  0x26   : > { %s510_s21 = sshll.u32 %s503_s14, 4  ;;  %p5942_p11 = pneg %p6248_p10  ;;  %s511_s21 = int_to_ptr.vmem [resolvable:$true] %s510_s21 }
  0x27   : > { %s5953_s13 = scalar_lea.vmem %s511_s21, 4096  ;;  %s6096_s10 = smov [#allocation6]  }
  0x28   : > { %p5954_p12 = scmp.ne.s32.totalorder %s511_s21, %s5953_s13  ;;  %s5958_s12 = sshll.u32 %s6096_s10, 4  ;;  %s5959_s12 = int_to_ptr.vmem [resolvable:$false] %s5958_s12 }
  0x29   : > { %s5960_s8 = scalar_lea.vmem %s5959_s12, 8192  ;;  %p5961_p1 = scmp.lt.s32.totalorder %s511_s21, %s5959_s12 }
  0x2a   : > { %s509_s16 = scalar_lea.hbm %s7645_s9, %s4998_s19  ;;  %p5956_p13 = pnand %p5954_p12, %p5942_p11 }
  0x2b   : > { %p5962_p2 = scmp.lt.s32.totalorder %s5960_s8, %s5953_s13 }
  0x2c   : > { %p5957_p0 = pneg %p5956_p13 }
  0x2d   : > { %p5963_p3 = por %p5962_p2, %p5961_p1 }
  0x2f   : > { %p5964_p4 = pnand %p5963_p3, %p5957_p0 }
  0x31   : > { %5967 = shalt.err (!%p5964_p4)
}
  0x32   : > { %s6097_s14 = smov 256   ;;  %s6098_s18 = smov 16  }
  0x33   : > { %5443 = dma.hbm_to_vmem [thread:$0]  (!%p6248_p10), %s509_s16, 4096, %s511_s21, %s6257_s27, %s6097_s14, %s6097_s14, %s6098_s18  }
  0x34   : > { %s7646_s11 = sld [smem:[#allocation29_spill]]  ;;  %s531_s8 = scalar_lea.vmem [#allocation8], %s4810_s25 }
  0x35   : > { %s538_s12 = sshll.u32 %s531_s8, 4  ;;  %p4816_p5 = scmp.ge.s32.totalorder %s6094_s15, 1  ;;  %s6272_s12 = int_to_ptr.vmem [resolvable:$true] %s538_s12 }
  0x36   : > { %p552_p6 = scmp.lt.s32.totalorder %s6094_s15, 5  ;;  %s5427_s9 = smul.u32 192, %s6241_s22 }
  0x37   : > { %s5428_s7 = smul.u32 3072, %s6086_s30  ;;  %s7648_s3 = sld [smem:[#allocation21_spill]] }
  0x38   : > { %p6276_p7 = pnand %p4816_p5, %p552_p6  ;;  %s449_s14 = scalar_lea.vmem [#allocation4], %s5427_s9 }
  0x39   : > { %s446_s18 = scalar_lea.sflag [#allocation5], %s6241_s22  ;;  %s6099_s24 = smov [#allocation4]  }
  0x3a   : > { %s6270_s20 = scalar_lea.hbm %s7646_s11, %s4998_s19  ;;  %s456_s19 = sshll.u32 %s449_s14, 4  ;;  %s457_s19 = int_to_ptr.vmem [resolvable:$true] %s456_s19 }
  0x3b   : > { %s5981_s25 = scalar_lea.vmem %s457_s19, 3072  ;;  %s5986_s10 = sshll.u32 %s6099_s24, 4  ;;  %s5987_s10 = int_to_ptr.vmem [resolvable:$false] %s5986_s10 }
  0x3c   : > { %p5982_p8 = scmp.ne.s32.totalorder %s457_s19, %s5981_s25  ;;  %s5988_s8 = scalar_lea.vmem %s5987_s10, 6144 }
  0x3d   : > { %s455_s21 = scalar_lea.hbm %s7648_s3, %s5428_s7  ;;  %p5989_p0 = scmp.lt.s32.totalorder %s457_s19, %s5987_s10 }
  0x3e   : > { %p5984_p12 = pnand %p5982_p8, %p5942_p11  ;;  %p5990_p1 = scmp.lt.s32.totalorder %s5988_s8, %s5981_s25 }
  0x40   : > { %p5985_p13 = pneg %p5984_p12  ;;  %p5991_p2 = por %p5990_p1, %p5989_p0 }
  0x42   : > { %p5992_p3 = pnand %p5991_p2, %p5985_p13 }
  0x44   : > { %5995 = shalt.err (!%p5992_p3)
}
  0x45   : > { %s6100_s5 = smov 192   ;;  %s6101_s7 = smov 12  }
  0x46   : > { %5440 = dma.hbm_to_vmem [thread:$0]  (!%p6248_p10), %s455_s21, 3072, %s457_s19, %s446_s18, %s6100_s5, %s6100_s5, %s6101_s7  }
  0x47   : > { %s6009_s9 = scalar_lea.vmem %s6272_s12, 4096  ;;  %s6102_s22 = smov [#allocation8]  }
  0x48   : > { %p6010_p4 = scmp.ne.s32.totalorder %s6272_s12, %s6009_s9  ;;  %s6014_s16 = sshll.u32 %s6102_s22, 4  ;;  %s6015_s16 = int_to_ptr.vmem [resolvable:$false] %s6014_s16 }
  0x49   : > { %s6016_s14 = scalar_lea.vmem %s6015_s16, 8192  ;;  %p6017_p8 = scmp.lt.s32.totalorder %s6272_s12, %s6015_s16 }
  0x4a   : > { %p6012_p5 = pnand %p6010_p4, %p5942_p11  ;;  %p6018_p12 = scmp.lt.s32.totalorder %s6016_s14, %s6009_s9 }
  0x4c   : > { %p6013_p6 = pneg %p6012_p5  ;;  %p6019_p13 = por %p6018_p12, %p6017_p8 }
  0x4e   : > { %p6020_p0 = pnand %p6019_p13, %p6013_p6 }
  0x50   : > { %6023 = shalt.err (!%p6020_p0)
}
  0x51   : > { %s6103_s25 = smov 64   ;;  %s6104_s21 = smov 4  }
  0x52   : > { %5446 = dma.hbm_to_vmem [thread:$0]  (!%p6248_p10), %s6270_s20, 4096, %s6272_s12, %s6257_s27, %s6103_s25, %s6103_s25, %s6104_s21  }
  0x53   : > { %556 = sbr.rel (%p6276_p7) target bundleno = 2636 (0xa4c), region = 72 }
  0x58   : > { %s6305_s19 = sand.u32 1, %s6070_s26  }
  0x59   : > { %s5429_s18 = smul.u32 192, %s6305_s19  ;;  %s559_s24 = scalar_lea.sflag [#allocation5], %s6305_s19 }
  0x5b   : > { %s6309_s10 = scalar_lea.vmem [#allocation4], %s5429_s18 }
  0x5c   : > { %6057 = dma.done.wait (%p6243_p9), %s559_s24, 3072  }
  0x5d   : > { %6059 = vsyncadd (%p6243_p9), %s559_s24, 4294964224  ;;  %s7649_s27 = sadd.s32 4294967295, %s6094_s15   ;;  %s4817_s20 = sshll.u32 %s6305_s19, 8 }
  0x5e   : > { %s567_s17 = sand.u32 1, %s7649_s27   ;;  %s6318_s13 = scalar_lea.vmem [#allocation6], %s4817_s20 }
  0x5f   : > { %s568_s12 = scalar_lea.sflag [#allocation7], %s567_s17  ;;  %7650 = sst [smem:[#allocation19_spill]] %s6318_s13 }
  0x60   : > { %6061 = dma.done.wait (%p6243_p9), %s568_s12, 8192  }
  0x61   : > { %6063 = vsyncadd (%p6243_p9), %s568_s12, 4294959104  ;;  %s4819_s8 = sshll.u32 %s6082_s29, 2  ;;  %p678_p11 = scmp.lt.s32.totalorder %s6078_s28, 1 }
  0x62   : > { %p672_p10 = scmp.lt.s32.totalorder %s4819_s8, 7  ;;  %s7651_s0 = sld [smem:[#allocation20_spill]] }
  0x63   : > { %s6327_s5 = scalar_select %p678_p11, %s6078_s28, 1 }
  0x64   : > { %s7683_s8 = smov (!%p672_p10, %s4819_s8), 7  ;;  %s7653_s4 = sld [smem:[#allocation22_spill]] }
  0x65   : > { %s5000_s23 = sshll.u32 %s7683_s8, 4  ;;  %s5430_s18 = smul.u32 3, %s6327_s5 }
  0x66   : > { %s5001_s24 = sshll.u32 %s6327_s5, 6  ;;  %s7655_s25 = sld [smem:[#allocation25_spill]] }
  0x67   : > { %s7656_s26 = sld [smem:[#allocation26_spill]]  ;;  %s4824_s27 = sshll.u32 %s6327_s5, 2 }
  0x68   : > { %s676_s22 = scalar_lea.vmem %s7651_s0, %s5000_s23  ;;  %s7654_s0 = sld [smem:[#allocation23_spill]] }
  0x69   : > { %s7657_s13 = sld [smem:[#allocation30_spill]]  ;;  %s6379_s14 = scalar_lea.vmem [#allocation8], %s4817_s20 }
  0x6a   : > { %s6349_s11 = scalar_lea.vmem %s7653_s4, %s5430_s18  ;;  %s7658_s4 = sld [smem:[#allocation28_spill]] }
  0x6b   : > { %s7659_s7 = sld [smem:[#allocation31_spill]]  ;;  %p4828_p9 = scmp.ne.s32.totalorder %s6078_s28, 0 }
  0x6c   : > { %s698_s21 = scalar_lea.vmem %s7655_s25, %s6327_s5 }
  0x6d   : > { %s701_s15 = scalar_lea.vmem %s7656_s26, %s6327_s5  ;;  %720 = sbr.rel (%p4828_p9) target bundleno = 119 (0x77), region = 88 }
  0x6e   : > { %s6354_s29 = scalar_lea.vmem %s7654_s0, %s5001_s24 }
  0x6f   : > { %s708_s3 = scalar_lea.vmem %s7657_s13, %s6327_s5 }
  0x70   : > { %s6372_s6 = scalar_lea.vmem %s7658_s4, %s4824_s27 }
  0x71   : > { %s6377_s9 = scalar_lea.vmem %s7659_s7, %s5000_s23 }
  0x72   : > { %v721_v0 = vld [vmem:[%s676_s22] sm:$0xff]  ;;  %v722_v1 = vld [vmem:[%s676_s22 + $0x8] sm:$0xff]  ;;  %v723_v2 = vld [vmem:[%s676_s22 + $0x10] sm:$0xff] }
  0x73   : > { %729 = vst [vmem:[#allocation2 + $0x30] sm:$0xff] %v721_v0  ;;  %730 = vst [vmem:[#allocation2] sm:$0xff] %v722_v1  ;;  %v724_v3 = vld [vmem:[%s676_s22 + $0x18] sm:$0xff]  ;;  %v725_v4 = vld [vmem:[%s676_s22 + $0x20] sm:$0xff] }
  0x74   : > { %731 = vst [vmem:[#allocation2 + $0x18] sm:$0xff] %v723_v2  ;;  %v726_v5 = vld [vmem:[%s676_s22 + $0x28] sm:$0xff]  ;;  %732 = vst [vmem:[#allocation2 + $0x10] sm:$0xff] %v724_v3  ;;  %v727_v6 = vld [vmem:[%s676_s22 + $0x30] sm:$0xff] }
  0x75   : > { %733 = vst [vmem:[#allocation2 + $0x8] sm:$0xff] %v725_v4  ;;  %734 = vst [vmem:[#allocation2 + $0x20] sm:$0xff] %v726_v5  ;;  %v728_v7 = vld [vmem:[%s676_s22 + $0x38] sm:$0xff] }
  0x76   : > { %735 = vst [vmem:[#allocation2 + $0x28] sm:$0xff] %v727_v6  ;;  %736 = vst [vmem:[#allocation2 + $0x38] sm:$0xff] %v728_v7 }
  0x77 PF: > { %v5524_v14 = vld [vmem:[%s6309_s10 + $0xac] ss:$12 sps:$4 sm:$0xff]   ;;  %v5526_v15 = vld [vmem:[%s6309_s10 + $0xa8] ss:$12 sps:$4 sm:$0xff]   ;;  %v5529_v42 = vld [vmem:[%s6309_s10 + $0x90] ss:$12 sps:$4 sm:$0xff]   ;;  %s7660_s30 = scalar_lea.vmem %s7602_s1, %s6327_s5  ;;  %s7661_s13 = scalar_lea.vmem %s7603_s2, %s6327_s5 }
  0x78   : > { %1045 = vmatprep.subr.bf16.mxu0 %v5524_v14  ;;  %v5527_v41 = vld [vmem:[%s6309_s10 + $0x94] ss:$12 sps:$4 sm:$0xff]   ;;  %v5530_v44 = vld [vmem:[%s6309_s10 + $0x7c] ss:$12 sps:$4 sm:$0xff]   ;;  %v5533_v46 = vld [vmem:[%s6309_s10 + $0x78] ss:$12 sps:$4 sm:$0xff]  }
  0x79   : > { %1046 = vmatpush1.bf16.msra.mxu0 %v5526_v15  ;;  %v5532_v45 = vld [vmem:[%s6309_s10 + $0xb0] ss:$12 sps:$4 sm:$0xff]   ;;  %v5536_v48 = vld [vmem:[%s6309_s10 + $0x98] ss:$12 sps:$4 sm:$0xff]   ;;  %v5537_v49 = vld [vmem:[%s6309_s10 + $0x60] ss:$12 sps:$4 sm:$0xff]  }
  0x7a   : > { %v737_v8 = vld [vmem:[#allocation2 + $0x30] sm:$0xff]  ;;  %v738_v10 = vld [vmem:[#allocation2] sm:$0xff]  ;;  %1047 = vmatprep.subr.bf16.mxu0 %v5527_v41  ;;  %5171 = vmatprep.subr.bf16.mxu1 %v5532_v45  ;;  %v5538_v50 = vld [vmem:[%s6309_s10 + $0x4c] ss:$12 sps:$4 sm:$0xff]   ;;  %v6105_v61 = vmov 0   ;;  %vm6107_vm0 = vmmov 0  }
  0x7b   : > { %v739_v9 = vld [vmem:[#allocation2 + $0x18] sm:$0xff]  ;;  %747 = vadd.xlane.f32.xlu0 %v737_v8  ;;  %v740_v11 = vld [vmem:[#allocation2 + $0x10] sm:$0xff]  ;;  %5172 = vmatpush3.bf16.msra.mxu1 %v5532_v45  ;;  %v5540_v51 = vld [vmem:[%s6309_s10 + $0x80] ss:$12 sps:$4 sm:$0xff]   ;;  %vm1186_vm1 = vcmask 261120   ;;  %s6109_s23 = smov 64  }
  0x7c   : > { %751 = vadd.xlane.f32.xlu1 %v739_v9  ;;  %v741_v12 = vld [vmem:[#allocation2 + $0x8] sm:$0xff]  ;;  %v742_v13 = vld [vmem:[#allocation2 + $0x20] sm:$0xff]  ;;  %5173 = vmatprep.subr.bf16.mxu1 %v5536_v48  ;;  %v5545_v55 = vld [vmem:[%s6309_s10 + $0x30] ss:$12 sps:$4 sm:$0xff]   ;;  %s6110_s22 = smov 32   ;;  %vm1234_vm2 = vcmask 130048  }
  0x7d   : > { %v6392_v28 = vld [vmem:[#allocation2 + $0x28] sm:$0xff]  ;;  %v6403_v37 = vld [vmem:[#allocation2 + $0x38] sm:$0xff]  ;;  %1048 = vmatpush1.bf16.msra.mxu0 %v5529_v42  ;;  %v5534_v47 = vld [vmem:[%s6309_s10 + $0x64] ss:$12 sps:$4 sm:$0xff]   ;;  %1077 = vmatprep.mubr.bf16.mxu0 %v6105_v61  ;;  %vm1436_vm3 = vcmask 523520   ;;  %vm1568_vm4 = vcmask 785920  }
  0x7e   : > { %1049 = vmatprep.subr.bf16.mxu0 %v5530_v44  ;;  %v5541_v52 = vld [vmem:[%s6309_s10 + $0x48] ss:$12 sps:$4 sm:$0xff]   ;;  %v5548_v57 = vld [vmem:[%s6309_s10 + $0x50] ss:$12 sps:$4 sm:$0xff]   ;;  %v5549_v58 = vld [vmem:[%s6309_s10 + $0x18] ss:$12 sps:$4 sm:$0xff]  }
  0x7f   : > { %749 = vadd.xlane.f32.xlu0 %v738_v10  ;;  %5174 = vmatpush3.bf16.msra.mxu1 %v5536_v48  ;;  %v5542_v53 = vld [vmem:[%s6309_s10 + $0x34] ss:$12 sps:$4 sm:$0xff]   ;;  %v5546_v56 = vld [vmem:[%s6309_s10 + $0x1c] ss:$12 sps:$4 sm:$0xff]   ;;  %v5550_v59 = vld [vmem:[%s6309_s10 + $0x4] ss:$12 sps:$4 sm:$0xff]  }
  0x80   : > { %753 = vadd.xlane.f32.xlu1 %v740_v11  ;;  %5175 = vmatprep.subr.bf16.mxu1 %v5540_v51  ;;  %v5544_v54 = vld [vmem:[%s6309_s10 + $0x68] ss:$12 sps:$4 sm:$0xff]   ;;  %v5552_v60 = vld [vmem:[%s6309_s10 + $0x38] ss:$12 sps:$4 sm:$0xff]   ;;  %v5553_v62 = vld [vmem:[%s6309_s10] ss:$12 sps:$4 sm:$0xff]  }
  0x81   : > { %1050 = vmatpush1.bf16.msra.mxu0 %v5533_v46  ;;  %v5554_v63 = vld [vmem:[%s6309_s10 + $0x20] ss:$12 sps:$4 sm:$0xff]   ;;  %v5555_v0 = vld [vmem:[%s6309_s10 + $0x8] ss:$12 sps:$4 sm:$0xff]   ;;  %vm1700_vm5 = vcmask 1048320   ;;  %s7664_s25 = sld [smem:[#allocation19_spill]] }
  0x82   : > { %1051 = vmatprep.subr.bf16.mxu0 %v5534_v47  ;;  %p4995_p7 = scmp.ne.s32.totalorder %s6078_s28, 1 }
  0x83   : > { %755 = vadd.xlane.f32.xlu0 %v741_v12  ;;  %5176 = vmatpush3.bf16.msra.mxu1 %v5540_v51 }
  0x84   : > { %757 = vadd.xlane.f32.xlu1 %v742_v13  ;;  %5177 = vmatprep.subr.bf16.mxu1 %v5544_v54 }
  0x85   : > { %1052 = vmatpush1.bf16.msra.mxu0 %v5537_v49 }
  0x86   : > { %1053 = vmatprep.subr.bf16.mxu0 %v5538_v50 }
  0x87   : > { %5178 = vmatpush3.bf16.msra.mxu1 %v5544_v54 }
  0x88   : > { %5179 = vmatprep.subr.bf16.mxu1 %v5548_v57 }
  0x89   : > { %1054 = vmatpush1.bf16.msra.mxu0 %v5541_v52 }
  0x8a   : > { %1055 = vmatprep.subr.bf16.mxu0 %v5542_v53 }
  0x8b   : > { %5180 = vmatpush3.bf16.msra.mxu1 %v5548_v57 }
  0x8c   : > { %5181 = vmatprep.subr.bf16.mxu1 %v5552_v60 }
  0x8d   : > { %1056 = vmatpush1.bf16.msra.mxu0 %v5545_v55 }
  0x8e   : > { %1057 = vmatprep.subr.bf16.mxu0 %v5546_v56 }
  0x8f   : > { %5182 = vmatpush3.bf16.msra.mxu1 %v5552_v60 }
  0x90   : > { %5183 = vmatprep.subr.bf16.mxu1 %v5554_v63 }
  0x91   : > { %1058 = vmatpush1.bf16.msra.mxu0 %v5549_v58 }
  0x92   : > { %1059 = vmatprep.subr.bf16.mxu0 %v5550_v59 }
  0x93   : > { %5184 = vmatpush3.bf16.msra.mxu1 %v5554_v63 }
  0x94   : > { %5185 = vmatprep.subr.bf16.mxu1 %v5555_v0 }
  0x95   : > { %1060 = vmatpush1.bf16.msra.mxu0 %v5553_v62 }
  0x97   : > { %5186 = vmatpush3.bf16.msra.mxu1 %v5555_v0 }
 0x104   : > { %v748_v16 = vpop.xlane.xlu0 %747 }
 0x105   : > { %v752_v17 = vpop.xlane.xlu1 %751  ;;  %v764_v18 = vmul.f32 0.0078125, %v748_v16 }
 0x106   : > { %v766_v20 = vmul.f32 0.0078125, %v752_v17 }
 0x107   : > { %v6384_v19 = vsub.f32 %v737_v8, %v764_v18 }
 0x108   : > { %v750_v21 = vpop.xlane.xlu0 %749  ;;  %v6390_v27 = vsub.f32 %v739_v9, %v766_v20 }
 0x109   : > { %v754_v22 = vpop.xlane.xlu1 %753  ;;  %v765_v23 = vmul.f32 0.0078125, %v750_v21  ;;  %v780_v24 = vmul.f32 %v6384_v19, %v6384_v19 }
 0x10a   : > { %v767_v26 = vmul.f32 0.0078125, %v754_v22  ;;  %v782_v33 = vmul.f32 %v6390_v27, %v6390_v27 }
 0x10b   : > { %788 = vadd.xlane.f32.xlu0 %v780_v24  ;;  %v6388_v25 = vsub.f32 %v738_v10, %v765_v23 }
 0x10c   : > { %v756_v29 = vpop.xlane.xlu0 %755  ;;  %v6399_v35 = vsub.f32 %v740_v11, %v767_v26 }
 0x10d   : > { %v758_v30 = vpop.xlane.xlu1 %757  ;;  %v781_v31 = vmul.f32 %v6388_v25, %v6388_v25  ;;  %v768_v32 = vmul.f32 0.0078125, %v756_v29 }
 0x10e   : > { %v769_v34 = vmul.f32 0.0078125, %v758_v30  ;;  %v783_v38 = vmul.f32 %v6399_v35, %v6399_v35 }
 0x10f   : > { %759 = vadd.xlane.f32.xlu0 %v6392_v28  ;;  %790 = vadd.xlane.f32.xlu1 %v781_v31  ;;  %v6401_v36 = vsub.f32 %v741_v12, %v768_v32  ;;  %v4829_v32 = vld [vmem:[%s7660_s30] ss:$0 sm:$0xff] }
 0x110   : > { %v6410_v40 = vsub.f32 %v742_v13, %v769_v34 }
 0x111   : > { %v784_v39 = vmul.f32 %v6401_v36, %v6401_v36 }
 0x112   : > { %v785_v43 = vmul.f32 %v6410_v40, %v6410_v40 }
 0x113   : > { %792 = vadd.xlane.f32.xlu0 %v782_v33  ;;  %761 = vadd.xlane.f32.xlu1 %v6403_v37 }
 0x117   : > { %794 = vadd.xlane.f32.xlu1 %v783_v38  ;;  %796 = vadd.xlane.f32.xlu0 %v784_v39  ;;  %v4830_v38 = vld [vmem:[%s7661_s13] ss:$0 sm:$0xff] }
 0x11b   : > { %798 = vadd.xlane.f32.xlu1 %v785_v43 }
 0x194   : > { %v789_v1 = vpop.xlane.xlu0 %788 }
 0x195   : > { %v804_v2 = vmul.f32 0.0078125, %v789_v1 }
 0x197   : > { %v812_v3 = vadd.f32 1e-05, %v804_v2 }
 0x198   : > { %v791_v4 = vpop.xlane.xlu1 %790  ;;  %v760_v5 = vpop.xlane.xlu0 %759 }
 0x199   : > { %5644 = vrsqrt.f32 %v812_v3  ;;  %v805_v6 = vmul.f32 0.0078125, %v791_v4  ;;  %v770_v7 = vmul.f32 0.0078125, %v760_v5 }
 0x19b   : > { %v813_v8 = vadd.f32 1e-05, %v805_v6  ;;  %v6438_v9 = vsub.f32 %v6392_v28, %v770_v7 }
 0x19c   : > { %v762_v10 = vpop.xlane.xlu1 %761  ;;  %v793_v11 = vpop.xlane.xlu0 %792 }
 0x19d   : > { %5646 = vrsqrt.f32 %v813_v8  ;;  %v771_v12 = vmul.f32 0.0078125, %v762_v10  ;;  %v806_v13 = vmul.f32 0.0078125, %v793_v11  ;;  %v786_v14 = vmul.f32 %v6438_v9, %v6438_v9 }
 0x19e   : > { %v902_v10 = vlaneseq }
 0x19f   : > { %v814_v15 = vadd.f32 1e-05, %v806_v13  ;;  %800 = vadd.xlane.f32.xlu0 %v786_v14  ;;  %v6443_v16 = vsub.f32 %v6403_v37, %v771_v12  ;;  %v900_v12 = vld [vmem:[%s6349_s11] sm:$0x7]  ;;  %s6108_s11 = smov 96  }
 0x1a0   : > { %v795_v17 = vpop.xlane.xlu1 %794  ;;  %v797_v18 = vpop.xlane.xlu0 %796 }
 0x1a1   : > { %5648 = vrsqrt.f32 %v814_v15  ;;  %v807_v20 = vmul.f32 0.0078125, %v795_v17  ;;  %v808_v21 = vmul.f32 0.0078125, %v797_v18  ;;  %v787_v22 = vmul.f32 %v6443_v16, %v6443_v16 }
 0x1a3   : > { %v815_v23 = vadd.f32 1e-05, %v807_v20  ;;  %v816_v24 = vadd.f32 1e-05, %v808_v21  ;;  %802 = vadd.xlane.f32.xlu1 %v787_v22 }
 0x1a4   : > { %v799_v26 = vpop.xlane.xlu1 %798 }
 0x1a5   : > { %5650 = vrsqrt.f32 %v815_v23  ;;  %v809_v28 = vmul.f32 0.0078125, %v799_v26 }
 0x1a6   : > { %v5645_v29 = vpop.eup %5644  ;;  %5652 = vrsqrt.f32 %v816_v24 }
 0x1a7   : > { %v817_v30 = vadd.f32 1e-05, %v809_v28  ;;  %v828_v31 = vmul.f32 %v5645_v29, %v6384_v19 }
 0x1a9   : > { %5654 = vrsqrt.f32 %v817_v30  ;;  %v842_v37 = vmul.f32 %v4829_v32, %v828_v31 }
 0x1aa   : > { %v5647_v33 = vpop.eup %5646 }
 0x1ab   : > { %v829_v34 = vmul.f32 %v5647_v33, %v6388_v25  ;;  %v856_v42 = vadd.f32 %v4830_v38, %v842_v37 }
 0x1ad   : > { %v843_v39 = vmul.f32 %v4829_v32, %v829_v34 }
 0x1ae   : > { %v5649_v41 = vpop.eup %5648 }
 0x1af   : > { %v857_v43 = vadd.f32 %v4830_v38, %v843_v39  ;;  %v830_v19 = vmul.f32 %v5649_v41, %v6390_v27 }
 0x1b1   : > { %v864_v44 = vpack.c.bf16 %v857_v43, %v856_v42  ;;  %v844_v25 = vmul.f32 %v4829_v32, %v830_v19 }
 0x1b2   : > { %v5651_v45 = vpop.eup %5650 }
 0x1b3   : > { %v5653_v46 = vpop.eup %5652  ;;  %1078 = vmatmul.mubr.bf16.vlgmr.msra.gmra.mxu0 %v864_v44  ;;  %5187 = vmatprep.mubr.bf16.mxu1 %v864_v44  ;;  %v831_v47 = vmul.f32 %v5651_v45, %v6399_v35  ;;  %v858_v51 = vadd.f32 %v4830_v38, %v844_v25 }
 0x1b4   : > { %1087 = vmatprep.mubr.bf16.mxu0 %v6105_v61  ;;  %v832_v48 = vmul.f32 %v5653_v46, %v6401_v36  ;;  %v6106_v36 = vmov 0.0  }
 0x1b5   : > { %v845_v49 = vmul.f32 %v4829_v32, %v831_v47  ;;  %5195 = vmatprep.subr.bf16.mxu1 %v6106_v36  ;;  %5207 = vmatprep.subr.bf16.mxu0 %v6106_v36 }
 0x1b6   : > { %v5655_v50 = vpop.eup %5654  ;;  %v846_v54 = vmul.f32 %v4829_v32, %v832_v48 }
 0x1b7   : > { %v859_v52 = vadd.f32 %v4830_v38, %v845_v49  ;;  %v833_v53 = vmul.f32 %v5655_v50, %v6410_v40 }
 0x1b8   : > { %v860_v56 = vadd.f32 %v4830_v38, %v846_v54 }
 0x1b9   : > { %v865_v27 = vpack.c.bf16 %v859_v52, %v858_v51  ;;  %v847_v55 = vmul.f32 %v4829_v32, %v833_v53 }
 0x1bb   : > { %1088 = vmatmul.mubr.bf16.gmra.mxu0 %v865_v27  ;;  %5188 = vmatmul.mubr.bf16.vlgmr.msra.gmra.mxu1 %v865_v27  ;;  %v861_v57 = vadd.f32 %v4830_v38, %v847_v55 }
 0x1bc   : > { %1097 = vmatprep.mubr.bf16.mxu0 %v6105_v61 }
 0x1bd   : > { %v866_v35 = vpack.c.bf16 %v861_v57, %v860_v56 }
 0x1bf   : > { %5191 = vmatprep.mubr.bf16.mxu1 %v866_v35 }
 0x1c3   : > { %1098 = vmatmul.mubr.bf16.gmra.mxu0 %v866_v35 }
 0x1c4   : > { %1107 = vmatprep.mubr.bf16.mxu0 %v6105_v61 }
 0x228   : > { %v801_v40 = vpop.xlane.xlu0 %800 }
 0x229   : > { %v810_v58 = vmul.f32 0.0078125, %v801_v40 }
 0x22b   : > { %v818_v59 = vadd.f32 1e-05, %v810_v58 }
 0x22c   : > { %v803_v60 = vpop.xlane.xlu1 %802 }
 0x22d   : > { %5656 = vrsqrt.f32 %v818_v59  ;;  %v811_v62 = vmul.f32 0.0078125, %v803_v60 }
 0x22f   : > { %v819_v63 = vadd.f32 1e-05, %v811_v62 }
 0x231   : > { %5658 = vrsqrt.f32 %v819_v63 }
 0x23a   : > { %v5657_v0 = vpop.eup %5656 }
 0x23b   : > { %v834_v1 = vmul.f32 %v5657_v0, %v6438_v9  ;;  %v6474_v9 = vshrl.u32 %v902_v10, 7 }
 0x23d   : > { %v848_v4 = vmul.f32 %v4829_v32, %v834_v1  ;;  %v904_v11 = vsub.s32 0, %v6474_v9  ;;  %v908_v13 = vsub.s32 1, %v6474_v9  ;;  %v912_v22 = vsub.s32 2, %v6474_v9 }
 0x23e   : > { %v5659_v2 = vpop.eup %5658 }
 0x23f   : > { %v835_v3 = vmul.f32 %v5659_v2, %v6443_v16  ;;  %v862_v6 = vadd.f32 %v4830_v38, %v848_v4  ;;  %v6481_v15 = vrot.slane %v900_v12, %v904_v11  ;;  %v6485_v17 = vrot.slane %v900_v12, %v908_v13 }
 0x241   : > { %v849_v5 = vmul.f32 %v4829_v32, %v835_v3  ;;  %v6494_v32 = vrot.slane %v900_v12, %v912_v22 }
 0x243   : > { %v863_v7 = vadd.f32 %v4830_v38, %v849_v5 }
 0x245   : > { %v867_v8 = vpack.c.bf16 %v863_v7, %v862_v6 }
 0x247   : > { %1108 = vmatmul.mubr.bf16.gmra.mxu0 %v867_v8  ;;  %5192 = vmatmul.mubr.bf16.gmra.mxu1 %v867_v8 }
 0x248   : > { %5197 = vmatprep.mubr.msk.bf16.mxu1 %vm6107_vm0, %v6106_v36  ;;  %5209 = vmatprep.mubr.msk.bf16.mxu0 %vm6107_vm0, %v6106_v36 }
 0x273   : > { %v1079_v14 = vpop.f32.mrf.mxu0 }
 0x274   : > { %v1080_v20 = vadd.f32 %v1079_v14, %v6481_v15 }
 0x275   : > { %v1081_v16 = vpop.f32.mrf.mxu0 }
 0x276   : > { %v1082_v24 = vadd.f32 %v1081_v16, %v6485_v17 }
 0x277   : > { %v1083_v18 = vpop.f32.mrf.mxu0 }
 0x278   : > { %v1084_v21 = vadd.f32 %v1083_v18, %v6481_v15 }
 0x279   : > { %v1085_v23 = vpop.f32.mrf.mxu0 }
 0x27a   : > { %v1183_v26 = vpack.c.bf16 %v1084_v21, %v1080_v20  ;;  %v1086_v28 = vadd.f32 %v1085_v23, %v6485_v17 }
 0x27b   : > { %v1089_v29 = vpop.f32.mrf.mxu0  ;;  %v5189_v30 = vpop.f32.mrf.mxu1 }
 0x27c   : > { %v1184_v31 = vpack.c.bf16 %v1086_v28, %v1082_v24  ;;  %1305 = vrot.lane.b32.xlu1 %v1183_v26, %s6108_s11  ;;  %v1161_v41 = vadd.f32 %v5189_v30, %v6494_v32  ;;  %v1090_v54 = vadd.f32 %v1089_v29, %v6481_v15 }
 0x27d   : > { %v1091_v33 = vpop.f32.mrf.mxu0  ;;  %v1152_v34 = vpop.f32.mrf.mxu1 }
 0x27e   : > { %1308 = vrot.lane.b32.xlu0 %v1184_v31, %s6108_s11  ;;  %v1191_v37 = vsel %vm1186_vm1, %v1184_v31, 0  ;;  %v1092_v43 = vadd.f32 %v1091_v33, %v6485_v17  ;;  %v1153_v45 = vadd.f32 %v1152_v34, %v6494_v32 }
 0x27f   : > { %v1093_v38 = vpop.f32.mrf.mxu0  ;;  %v5190_v39 = vpop.f32.mrf.mxu1  ;;  %5196 = vmatpush3.bf16.xpose.msra.mxu1 %v1191_v37 }
 0x280   : > { %v1164_v42 = vadd.f32 %v5190_v39, %v6494_v32  ;;  %1441 = vrot.lane.b32.xlu1 %v1184_v31, %s6109_s23  ;;  %5201 = vmatprep.subr.bf16.mxu1 %v6106_v36  ;;  %v1094_v52 = vadd.f32 %v1093_v38, %v6481_v15 }
 0x281   : > { %v1095_v19 = vpop.f32.mrf.mxu0  ;;  %v1155_v44 = vpop.f32.mrf.mxu1 }
 0x282   : > { %v6505_v46 = vpack.c.bf16 %v1164_v42, %v1161_v41  ;;  %v1096_v47 = vadd.f32 %v1095_v19, %v6485_v17  ;;  %v1156_v25 = vadd.f32 %v1155_v44, %v6494_v32  ;;  %1573 = vrot.lane.b32.xlu0 %v1184_v31, %s6110_s22  ;;  %v1703_v55 = vpack.c.bf16 %v1094_v52, %v1090_v54 }
 0x283   : > { %v1099_v48 = vpop.f32.mrf.mxu0 }
 0x284   : > { %v1704_v49 = vpack.c.bf16 %v1096_v47, %v1092_v43  ;;  %v6510_v50 = vpack.c.bf16 %v1156_v25, %v1153_v45  ;;  %1439 = vrot.lane.b32.xlu1 %v1183_v26, %s6109_s23  ;;  %v1100_v58 = vadd.f32 %v1099_v48, %v6481_v15 }
 0x285   : > { %v1101_v51 = vpop.f32.mrf.mxu0 }
 0x286   : > { %1826 = vrot.lane.b32.xlu0 %v1704_v49, %s6108_s11  ;;  %5198 = vmatmul.mubr.msk.bf16.vlgmr.msra.gmra.mxu1 %vm1186_vm1, %v1183_v26  ;;  %v1102_v57 = vadd.f32 %v1101_v51, %v6485_v17  ;;  %v1710_v12 = vsel %vm1186_vm1, %v1704_v49, 0 }
 0x287   : > { %v1103_v53 = vpop.f32.mrf.mxu0  ;;  %5202 = vmatpush3.bf16.msra.mxu1 %v6510_v50  ;;  %5203 = vmatprep.mubr.msk.bf16.mxu1 %vm6107_vm0, %v6106_v36 }
 0x288   : > { %1571 = vrot.lane.b32.xlu1 %v1183_v26, %s6110_s22  ;;  %5213 = vmatprep.subr.bf16.mxu1 %v6106_v36  ;;  %v1104_v40 = vadd.f32 %v1103_v53, %v6481_v15 }
 0x289   : > { %v1105_v27 = vpop.f32.mrf.mxu0 }
 0x28a   : > { %1958 = vrot.lane.b32.xlu0 %v1704_v49, %s6109_s23  ;;  %v1106_v56 = vadd.f32 %v1105_v27, %v6485_v17  ;;  %v6535_v59 = vpack.c.bf16 %v1104_v40, %v1100_v58 }
 0x28c   : > { %1823 = vrot.lane.b32.xlu1 %v1703_v55, %s6108_s11  ;;  %v6527_v35 = vpack.c.bf16 %v1106_v56, %v1102_v57 }
 0x28e   : > { %2089 = vrot.lane.b32.xlu0 %v1704_v49, %s6110_s22  ;;  %v2225_v45 = vsel %vm1186_vm1, %v6527_v35, 0 }
 0x290   : > { %1956 = vrot.lane.b32.xlu1 %v1703_v55, %s6109_s23 }
 0x292   : > { %2341 = vrot.lane.b32.xlu0 %v6527_v35, %s6108_s11 }
 0x294   : > { %2087 = vrot.lane.b32.xlu1 %v1703_v55, %s6110_s22 }
 0x296   : > { %2473 = vrot.lane.b32.xlu0 %v6527_v35, %s6109_s23 }
 0x298   : > { %2338 = vrot.lane.b32.xlu1 %v6535_v59, %s6108_s11 }
 0x29a   : > { %2604 = vrot.lane.b32.xlu0 %v6527_v35, %s6110_s22 }
 0x29c   : > { %2471 = vrot.lane.b32.xlu1 %v6535_v59, %s6109_s23 }
 0x2a0   : > { %2602 = vrot.lane.b32.xlu1 %v6535_v59, %s6110_s22 }
 0x2ee   : > { %v1306_v60 = vpop.permute.xlu1 %1305 }
 0x2f0   : > { %v1309_v62 = vpop.permute.xlu0 %1308 }
 0x2f1   : > { %v1314_v63 = vsel %vm1186_vm1, %v1309_v62, 0 }
 0x2f2   : > { %5208 = vmatpush3.bf16.xpose.msra.mxu0 %v1314_v63  ;;  %v1442_v0 = vpop.permute.xlu1 %1441 }
 0x2f3   : > { %5219 = vmatprep.subr.bf16.mxu0 %v6106_v36  ;;  %v1447_v1 = vsel %vm1186_vm1, %v1442_v0, 0 }
 0x2f4   : > { %v1574_v2 = vpop.permute.xlu0 %1573 }
 0x2f5   : > { %v1579_v4 = vsel %vm1186_vm1, %v1574_v2, 0 }
 0x2f6   : > { %v1440_v3 = vpop.permute.xlu1 %1439 }
 0x2f8   : > { %v1827_v26 = vpop.permute.xlu0 %1826 }
 0x2f9   : > { %5210 = vmatmul.mubr.msk.bf16.vlgmr.msra.gmra.mxu0 %vm1186_vm1, %v1306_v60  ;;  %v1832_v34 = vsel %vm1186_vm1, %v1827_v26, 0 }
 0x2fa   : > { %5220 = vmatpush3.bf16.xpose.msra.mxu0 %v1447_v1  ;;  %5221 = vmatprep.mubr.msk.bf16.mxu0 %vm6107_vm0, %v6106_v36  ;;  %v1572_v7 = vpop.permute.xlu1 %1571 }
 0x2fb   : > { %5231 = vmatprep.subr.bf16.mxu0 %v6106_v36 }
 0x301   : > { %5222 = vmatmul.mubr.msk.bf16.vlgmr.msra.gmra.mxu0 %vm1186_vm1, %v1440_v3 }
 0x302   : > { %5232 = vmatpush3.bf16.xpose.msra.mxu0 %v1579_v4  ;;  %5233 = vmatprep.mubr.msk.bf16.mxu0 %vm6107_vm0, %v6106_v36 }
 0x303   : > { %5243 = vmatprep.subr.bf16.mxu0 %v6106_v36 }
 0x307   : > { %v1109_v5 = vpop.f32.mrf.mxu0  ;;  %v5193_v6 = vpop.f32.mrf.mxu1 }
 0x308   : > { %v1110_v18 = vadd.f32 %v1109_v5, %v6481_v15  ;;  %v1177_v20 = vadd.f32 %v5193_v6, %v6494_v32 }
 0x309   : > { %v1111_v8 = vpop.f32.mrf.mxu0  ;;  %v1168_v10 = vpop.f32.mrf.mxu1  ;;  %5234 = vmatmul.mubr.msk.bf16.vlgmr.msra.gmra.mxu0 %vm1186_vm1, %v1572_v7 }
 0x30a   : > { %5244 = vmatpush3.bf16.xpose.msra.mxu0 %v1710_v12  ;;  %5245 = vmatprep.mubr.msk.bf16.mxu0 %vm6107_vm0, %v6106_v36  ;;  %v1112_v28 = vadd.f32 %v1111_v8, %v6485_v17  ;;  %v1169_v43 = vadd.f32 %v1168_v10, %v6494_v32 }
 0x30b   : > { %v1113_v14 = vpop.f32.mrf.mxu0  ;;  %v5194_v16 = vpop.f32.mrf.mxu1  ;;  %5255 = vmatprep.subr.bf16.mxu0 %v6106_v36 }
 0x30c   : > { %v1114_v21 = vadd.f32 %v1113_v14, %v6481_v15  ;;  %v1180_v23 = vadd.f32 %v5194_v16, %v6494_v32  ;;  %v1959_v15 = vpop.permute.xlu0 %1958 }
 0x30d   : > { %v1115_v24 = vpop.f32.mrf.mxu0  ;;  %v1964_v37 = vsel %vm1186_vm1, %v1959_v15, 0  ;;  %v1171_v38 = vpop.f32.mrf.mxu1 }
 0x30e   : > { %v6569_v29 = vpack.c.bf16 %v1114_v21, %v1110_v18  ;;  %v6571_v30 = vpack.c.bf16 %v1180_v23, %v1177_v20  ;;  %v1116_v31 = vadd.f32 %v1115_v24, %v6485_v17  ;;  %v1824_v17 = vpop.permute.xlu1 %1823  ;;  %v1172_v41 = vadd.f32 %v1171_v38, %v6494_v32 }
 0x310   : > { %v6574_v33 = vpack.c.bf16 %v1116_v31, %v1112_v28  ;;  %2853 = vrot.lane.b32.xlu1 %v6569_v29, %s6108_s11  ;;  %v2090_v39 = vpop.permute.xlu0 %2089  ;;  %v6608_v44 = vpack.c.bf16 %v1172_v41, %v1169_v43 }
 0x311   : > { %5246 = vmatmul.mubr.msk.bf16.vlgmr.msra.gmra.mxu0 %vm1186_vm1, %v1703_v55  ;;  %v2095_v19 = vsel %vm1186_vm1, %v2090_v39, 0 }
 0x312   : > { %2856 = vrot.lane.b32.xlu0 %v6574_v33, %s6108_s11  ;;  %5256 = vmatpush3.bf16.xpose.msra.mxu0 %v1832_v34  ;;  %v1957_v42 = vpop.permute.xlu1 %1956  ;;  %v2740_v57 = vsel %vm1186_vm1, %v6574_v33, 0 }
 0x313   : > { %5257 = vmatprep.mubr.msk.bf16.mxu0 %vm6107_vm0, %v6106_v36  ;;  %5267 = vmatprep.subr.bf16.mxu0 %v6106_v36 }
 0x314   : > { %2986 = vrot.lane.b32.xlu1 %v6569_v29, %s6109_s23  ;;  %v2342_v47 = vpop.permute.xlu0 %2341 }
 0x315   : > { %v2347_v25 = vsel %vm1186_vm1, %v2342_v47, 0 }
 0x316   : > { %2988 = vrot.lane.b32.xlu0 %v6574_v33, %s6109_s23  ;;  %v2088_v32 = vpop.permute.xlu1 %2087 }
 0x318   : > { %3117 = vrot.lane.b32.xlu1 %v6569_v29, %s6110_s22  ;;  %v2474_v48 = vpop.permute.xlu0 %2473 }
 0x319   : > { %5258 = vmatmul.mubr.msk.bf16.vlgmr.msra.gmra.mxu0 %vm1186_vm1, %v1824_v17 }
 0x31a   : > { %3119 = vrot.lane.b32.xlu0 %v6574_v33, %s6110_s22  ;;  %5268 = vmatpush3.bf16.xpose.msra.mxu0 %v1964_v37  ;;  %v2339_v49 = vpop.permute.xlu1 %2338 }
 0x31b   : > { %5269 = vmatprep.mubr.msk.bf16.mxu0 %vm6107_vm0, %v6106_v36  ;;  %5279 = vmatprep.subr.bf16.mxu0 %v6106_v36 }
 0x31c   : > { %1511 = vrot.lane.b32.xlu1 %v6510_v50, %s6109_s23  ;;  %v2605_v51 = vpop.permute.xlu0 %2604 }
 0x31d   : > { %v2610_v53 = vsel %vm1186_vm1, %v2605_v51, 0 }
 0x31e   : > { %1379 = vrot.lane.b32.xlu0 %v6510_v50, %s6108_s11  ;;  %v2472_v52 = vpop.permute.xlu1 %2471 }
 0x320   : > { %2028 = vrot.lane.b32.xlu1 %v6505_v46, %s6109_s23 }
 0x321   : > { %5270 = vmatmul.mubr.msk.bf16.vlgmr.msra.gmra.mxu0 %vm1186_vm1, %v1957_v42 }
 0x322   : > { %1643 = vrot.lane.b32.xlu0 %v6510_v50, %s6110_s22  ;;  %5280 = vmatpush3.bf16.xpose.msra.mxu0 %v2095_v19  ;;  %v2479_v50 = vsel %vm1186_vm1, %v2474_v48, 0  ;;  %v2603_v55 = vpop.permute.xlu1 %2602 }
 0x323   : > { %5281 = vmatprep.mubr.msk.bf16.mxu0 %vm6107_vm0, %v6106_v36  ;;  %5291 = vmatprep.subr.bf16.mxu0 %v6106_v36 }
 0x324   : > { %2412 = vrot.lane.b32.xlu1 %v6608_v44, %s6108_s11 }
 0x326   : > { %1897 = vrot.lane.b32.xlu0 %v6505_v46, %s6108_s11 }
 0x329   : > { %5282 = vmatmul.mubr.msk.bf16.vlgmr.msra.gmra.mxu0 %vm1186_vm1, %v2088_v32 }
 0x32a   : > { %2159 = vrot.lane.b32.xlu0 %v6505_v46, %s6110_s22  ;;  %5292 = vmatpush3.bf16.xpose.msra.mxu0 %v2225_v45 }
 0x32b   : > { %5293 = vmatprep.mubr.msk.bf16.mxu0 %vm6107_vm0, %v6106_v36  ;;  %5303 = vmatprep.subr.bf16.mxu0 %v6106_v36 }
 0x331   : > { %5294 = vmatmul.mubr.msk.bf16.vlgmr.msra.gmra.mxu0 %vm1186_vm1, %v6535_v59 }
 0x332   : > { %5304 = vmatpush3.bf16.xpose.msra.mxu0 %v2347_v25  ;;  %5305 = vmatprep.mubr.msk.bf16.mxu0 %vm6107_vm0, %v6106_v36 }
 0x333   : > { %5315 = vmatprep.subr.bf16.mxu0 %v6106_v36 }
 0x339   : > { %5306 = vmatmul.mubr.msk.bf16.vlgmr.msra.gmra.mxu0 %vm1186_vm1, %v2339_v49 }
 0x33a   : > { %5316 = vmatpush3.bf16.xpose.msra.mxu0 %v2479_v50  ;;  %5317 = vmatprep.mubr.msk.bf16.mxu0 %vm6107_vm0, %v6106_v36 }
 0x33b   : > { %5327 = vmatprep.subr.bf16.mxu0 %v6106_v36 }
 0x341   : > { %5318 = vmatmul.mubr.msk.bf16.vlgmr.msra.gmra.mxu0 %vm1186_vm1, %v2472_v52 }
 0x342   : > { %5328 = vmatpush3.bf16.xpose.msra.mxu0 %v2610_v53  ;;  %5329 = vmatprep.mubr.msk.bf16.mxu0 %vm6107_vm0, %v6106_v36 }
 0x343   : > { %5339 = vmatprep.subr.bf16.mxu0 %v6106_v36 }
 0x346   : > { %v6643_v54 = vpop.f32.mrf.mxu1 }
 0x347   : > { %v1235_v27 = vsel %vm1234_vm2, %v6643_v54, -inf }
 0x348   : > { %v5199_v56 = vpop.f32.mrf.mxu1 }
 0x349   : > { %1236 = vmax.xlane.f32.xlu0 %v1235_v27  ;;  %5330 = vmatmul.mubr.msk.bf16.vlgmr.msra.gmra.mxu0 %vm1186_vm1, %v2603_v55 }
 0x34a   : > { %v6650_v35 = vpop.f32.mrf.mxu1  ;;  %5340 = vmatpush3.bf16.xpose.msra.mxu0 %v2740_v57  ;;  %5341 = vmatprep.mubr.msk.bf16.mxu0 %vm6107_vm0, %v6106_v36 }
 0x34b   : > { %v1238_v40 = vsel %vm1234_vm2, %v6650_v35, -inf  ;;  %5351 = vmatprep.subr.bf16.mxu0 %v6106_v36 }
 0x34c   : > { %v5200_v58 = vpop.f32.mrf.mxu1  ;;  %1239 = vmax.xlane.f32.xlu1 %v1238_v40 }
 0x351   : > { %5342 = vmatmul.mubr.msk.bf16.vlgmr.msra.gmra.mxu0 %vm1186_vm1, %v6569_v29 }
 0x352   : > { %5353 = vmatprep.mubr.msk.bf16.mxu0 %vm6107_vm0, %v6106_v36 }
 0x382   : > { %v2854_v63 = vpop.permute.xlu1 %2853 }
 0x384   : > { %v2857_v59 = vpop.permute.xlu0 %2856 }
 0x385   : > { %v2862_v60 = vsel %vm1186_vm1, %v2857_v59, 0 }
 0x386   : > { %5352 = vmatpush3.bf16.xpose.msra.mxu0 %v2862_v60  ;;  %v2987_v2 = vpop.permute.xlu1 %2986 }
 0x387   : > { %5363 = vmatprep.subr.bf16.mxu0 %v6106_v36 }
 0x388   : > { %v2989_v62 = vpop.permute.xlu0 %2988 }
 0x389   : > { %v2994_v0 = vsel %vm1186_vm1, %v2989_v62, 0 }
 0x38a   : > { %v3118_v4 = vpop.permute.xlu1 %3117 }
 0x38c   : > { %v3120_v1 = vpop.permute.xlu0 %3119 }
 0x38d   : > { %5354 = vmatmul.mubr.msk.bf16.vlgmr.msra.gmra.mxu0 %vm1186_vm1, %v2854_v63  ;;  %v3125_v3 = vsel %vm1186_vm1, %v3120_v1, 0 }
 0x38e   : > { %5364 = vmatpush3.bf16.xpose.msra.mxu0 %v2994_v0  ;;  %5365 = vmatprep.mubr.msk.bf16.mxu0 %vm6107_vm0, %v6106_v36  ;;  %v6689_v23 = vpop.permute.xlu1 %1511 }
 0x38f   : > { %5375 = vmatprep.subr.bf16.mxu0 %v6106_v36 }
 0x390   : > { %v6677_v8 = vpop.permute.xlu0 %1379 }
 0x392   : > { %v6701_v34 = vpop.permute.xlu1 %2028 }
 0x394   : > { %v6685_v18 = vpop.permute.xlu0 %1643 }
 0x395   : > { %5366 = vmatmul.mubr.msk.bf16.vlgmr.msra.gmra.mxu0 %vm1186_vm1, %v2987_v2 }
 0x396   : > { %5376 = vmatpush3.bf16.xpose.msra.mxu0 %v3125_v3  ;;  %5377 = vmatprep.mubr.msk.bf16.mxu0 %vm6107_vm0, %v6106_v36  ;;  %v6709_v41 = vpop.permute.xlu1 %2412 }
 0x398   : > { %v6695_v29 = vpop.permute.xlu0 %1897 }
 0x39c   : > { %v6705_v37 = vpop.permute.xlu0 %2159 }
 0x39d   : > { %5378 = vmatmul.mubr.msk.bf16.vlgmr.msra.gmra.mxu0 %vm1186_vm1, %v3118_v4 }
 0x3b9   : > { %v6673_v5 = vpop.f32.mrf.mxu0 }
 0x3ba   : > { %v1357_v6 = vsel %vm1234_vm2, %v6673_v5, -inf }
 0x3bb   : > { %1358 = vmax.xlane.f32.xlu0 %v1357_v6  ;;  %v5211_v7 = vpop.f32.mrf.mxu0 }
 0x3bd   : > { %v6679_v10 = vpop.f32.mrf.mxu0 }
 0x3be   : > { %v1360_v12 = vsel %vm1234_vm2, %v6679_v10, -inf }
 0x3bf   : > { %1361 = vmax.xlane.f32.xlu0 %v1360_v12  ;;  %v5212_v14 = vpop.f32.mrf.mxu0 }
 0x3c1   : > { %v6683_v16 = vpop.f32.mrf.mxu0 }
 0x3c2   : > { %v1490_v20 = vsel %vm1234_vm2, %v6683_v16, -inf }
 0x3c3   : > { %1491 = vmax.xlane.f32.xlu0 %v1490_v20  ;;  %v5223_v21 = vpop.f32.mrf.mxu0 }
 0x3c5   : > { %v6691_v24 = vpop.f32.mrf.mxu0 }
 0x3c6   : > { %v1493_v26 = vsel %vm1234_vm2, %v6691_v24, -inf }
 0x3c7   : > { %1494 = vmax.xlane.f32.xlu1 %v1493_v26  ;;  %v5224_v28 = vpop.f32.mrf.mxu0 }
 0x3c9   : > { %v6697_v31 = vpop.f32.mrf.mxu0 }
 0x3ca   : > { %v1622_v33 = vsel %vm1234_vm2, %v6697_v31, -inf }
 0x3cb   : > { %1623 = vmax.xlane.f32.xlu0 %v1622_v33  ;;  %v5235_v15 = vpop.f32.mrf.mxu0 }
 0x3cd   : > { %v6703_v17 = vpop.f32.mrf.mxu0 }
 0x3ce   : > { %v1625_v38 = vsel %vm1234_vm2, %v6703_v17, -inf }
 0x3cf   : > { %1626 = vmax.xlane.f32.xlu1 %v1625_v38  ;;  %v5236_v39 = vpop.f32.mrf.mxu0 }
 0x3d1   : > { %v6711_v42 = vpop.f32.mrf.mxu0 }
 0x3d2   : > { %v1237_v43 = vpop.xlane.xlu0 %1236  ;;  %v1753_v19 = vsel %vm1234_vm2, %v6711_v42, -inf }
 0x3d3   : > { %v1241_v32 = vsub.f32 %v6643_v54, %v1237_v43  ;;  %1754 = vmax.xlane.f32.xlu0 %v1753_v19  ;;  %v5247_v45 = vpop.f32.mrf.mxu0 }
 0x3d5   : > { %v1243_v47 = vmul.f32 1.442695, %v1241_v32  ;;  %v1240_v25 = vpop.xlane.xlu1 %1239  ;;  %v6716_v48 = vpop.f32.mrf.mxu0 }
 0x3d6   : > { %v1242_v49 = vsub.f32 %v6650_v35, %v1240_v25  ;;  %v1756_v50 = vsel %vm1234_vm2, %v6716_v48, -inf }
 0x3d7   : > { %1757 = vmax.xlane.f32.xlu1 %v1756_v50  ;;  %v5248_v51 = vpop.f32.mrf.mxu0  ;;  %5660 = vpow2.f32 %v1243_v47 }
 0x3d8   : > { %v1245_v52 = vmul.f32 1.442695, %v1242_v49 }
 0x3d9   : > { %v6721_v53 = vpop.f32.mrf.mxu0 }
 0x3da   : > { %5662 = vpow2.f32 %v1245_v52  ;;  %v1875_v54 = vsel %vm1234_vm2, %v6721_v53, -inf }
 0x3db   : > { %1876 = vmax.xlane.f32.xlu1 %v1875_v54  ;;  %v5259_v27 = vpop.f32.mrf.mxu0 }
 0x3dd   : > { %v6725_v55 = vpop.f32.mrf.mxu0 }
 0x3de   : > { %v1878_v56 = vsel %vm1234_vm2, %v6725_v55, -inf }
 0x3df   : > { %1879 = vmax.xlane.f32.xlu1 %v1878_v56  ;;  %v5260_v57 = vpop.f32.mrf.mxu0 }
 0x3e1   : > { %v6729_v35 = vpop.f32.mrf.mxu0 }
 0x3e2   : > { %v2007_v25 = vsel %vm1234_vm2, %v6729_v35, -inf }
 0x3e3   : > { %v5271_v40 = vpop.f32.mrf.mxu0 }
 0x3e4   : > { %v6733_v59 = vpop.eup %5660 }
 0x3e5   : > { %v6731_v58 = vpop.f32.mrf.mxu0 }
 0x3e6   : > { %v2010_v60 = vsel %vm1234_vm2, %v6731_v58, -inf }
 0x3e7   : > { %v6737_v62 = vpop.eup %5662  ;;  %2011 = vmax.xlane.f32.xlu1 %v2010_v60  ;;  %v5272_v63 = vpop.f32.mrf.mxu0 }
 0x3e8   : > { %v1255_v0 = vpack.c.bf16 %v6737_v62, %v6733_v59 }
 0x3e9   : > { %2543 = vrot.lane.b32.xlu0 %v6608_v44, %s6109_s23  ;;  %v6743_v1 = vpop.f32.mrf.mxu0 }
 0x3ea   : > { %5204 = vmatmul.mubr.msk.bf16.vlgmr.msra.gmra.mxu1 %vm1234_vm2, %v1255_v0  ;;  %v2138_v2 = vsel %vm1234_vm2, %v6743_v1, -inf }
 0x3eb   : > { %5214 = vmatpush3.bf16.msra.mxu1 %v6677_v8  ;;  %2139 = vmax.xlane.f32.xlu1 %v2138_v2  ;;  %v5283_v3 = vpop.f32.mrf.mxu0 }
 0x3ec   : > { %5215 = vmatprep.mubr.msk.bf16.mxu1 %vm6107_vm0, %v6106_v36  ;;  %5225 = vmatprep.subr.bf16.mxu1 %v6106_v36 }
 0x3ed   : > { %v6752_v4 = vpop.f32.mrf.mxu0 }
 0x3ee   : > { %v2141_v6 = vsel %vm1234_vm2, %v6752_v4, -inf }
 0x3ef   : > { %2142 = vmax.xlane.f32.xlu1 %v2141_v6  ;;  %v5284_v7 = vpop.f32.mrf.mxu0 }
 0x3f1   : > { %v6756_v12 = vpop.f32.mrf.mxu0 }
 0x3f2   : > { %v2268_v14 = vsel %vm1234_vm2, %v6756_v12, -inf }
 0x3f3   : > { %2269 = vmax.xlane.f32.xlu1 %v2268_v14  ;;  %v5295_v8 = vpop.f32.mrf.mxu0 }
 0x3f5   : > { %v6760_v20 = vpop.f32.mrf.mxu0 }
 0x3f6   : > { %v2271_v21 = vsel %vm1234_vm2, %v6760_v20, -inf }
 0x3f7   : > { %2272 = vmax.xlane.f32.xlu1 %v2271_v21  ;;  %v5296_v26 = vpop.f32.mrf.mxu0 }
 0x3f9   : > { %v6764_v28 = vpop.f32.mrf.mxu0 }
 0x3fa   : > { %v2390_v33 = vsel %vm1234_vm2, %v6764_v28, -inf }
 0x3fb   : > { %2391 = vmax.xlane.f32.xlu1 %v2390_v33  ;;  %v5307_v15 = vpop.f32.mrf.mxu0 }
 0x3fd   : > { %v6768_v38 = vpop.f32.mrf.mxu0 }
 0x3fe   : > { %v2393_v52 = vsel %vm1234_vm2, %v6768_v38, -inf }
 0x3ff   : > { %v5308_v39 = vpop.f32.mrf.mxu0 }
 0x401   : > { %v6770_v43 = vpop.f32.mrf.mxu0 }
 0x402   : > { %v2522_v19 = vsel %vm1234_vm2, %v6770_v43, -inf }
 0x403   : > { %2523 = vmax.xlane.f32.xlu1 %v2522_v19  ;;  %v5319_v32 = vpop.f32.mrf.mxu0 }
 0x405   : > { %v6774_v45 = vpop.f32.mrf.mxu0 }
 0x406   : > { %v2525_v56 = vsel %vm1234_vm2, %v6774_v45, -inf }
 0x407   : > { %v5320_v47 = vpop.f32.mrf.mxu0 }
 0x408   : > { %2008 = vmax.xlane.f32.xlu0 %v2007_v25 }
 0x409   : > { %v6778_v49 = vpop.f32.mrf.mxu0 }
 0x40a   : > { %v2653_v50 = vsel %vm1234_vm2, %v6778_v49, -inf }
 0x40b   : > { %2654 = vmax.xlane.f32.xlu1 %v2653_v50  ;;  %v5331_v51 = vpop.f32.mrf.mxu0 }
 0x40c   : > { %2394 = vmax.xlane.f32.xlu0 %v2393_v52 }
 0x40d   : > { %v6784_v54 = vpop.f32.mrf.mxu0 }
 0x40e   : > { %v2656_v63 = vsel %vm1234_vm2, %v6784_v54, -inf }
 0x40f   : > { %v5332_v27 = vpop.f32.mrf.mxu0 }
 0x410   : > { %2526 = vmax.xlane.f32.xlu0 %v2525_v56 }
 0x411   : > { %v6788_v57 = vpop.f32.mrf.mxu0 }
 0x412   : > { %v2783_v40 = vsel %vm1234_vm2, %v6788_v57, -inf }
 0x413   : > { %2784 = vmax.xlane.f32.xlu1 %v2783_v40  ;;  %v5343_v60 = vpop.f32.mrf.mxu0 }
 0x414   : > { %2657 = vmax.xlane.f32.xlu0 %v2656_v63 }
 0x415   : > { %v6794_v0 = vpop.f32.mrf.mxu0 }
 0x416   : > { %v2786_v2 = vsel %vm1234_vm2, %v6794_v0, -inf }
 0x417   : > { %2787 = vmax.xlane.f32.xlu1 %v2786_v2  ;;  %v5344_v3 = vpop.f32.mrf.mxu0 }
 0x444   : > { %v1359_v6 = vpop.xlane.xlu0 %1358 }
 0x445   : > { %v1363_v7 = vsub.f32 %v6673_v5, %v1359_v6 }
 0x447   : > { %v1365_v14 = vmul.f32 1.442695, %v1363_v7 }
 0x448   : > { %v1362_v8 = vpop.xlane.xlu0 %1361 }
 0x449   : > { %v1364_v21 = vsub.f32 %v6679_v10, %v1362_v8  ;;  %5664 = vpow2.f32 %v1365_v14 }
 0x44b   : > { %v1367_v26 = vmul.f32 1.442695, %v1364_v21 }
 0x44c   : > { %v1492_v33 = vpop.xlane.xlu0 %1491 }
 0x44d   : > { %5666 = vpow2.f32 %v1367_v26  ;;  %v1496_v15 = vsub.f32 %v6683_v16, %v1492_v33  ;;  %v6801_v39 = vpop.f32.mrf.mxu0 }
 0x44e   : > { %v2905_v19 = vsel %vm1234_vm2, %v6801_v39, -inf }
 0x44f   : > { %2906 = vmax.xlane.f32.xlu1 %v2905_v19  ;;  %v5355_v32 = vpop.f32.mrf.mxu0  ;;  %v1498_v47 = vmul.f32 1.442695, %v1496_v15 }
 0x450   : > { %v1495_v25 = vpop.xlane.xlu1 %1494 }
 0x451   : > { %v1497_v5 = vsub.f32 %v6691_v24, %v1495_v25  ;;  %v6806_v50 = vpop.f32.mrf.mxu0  ;;  %5668 = vpow2.f32 %v1498_v47 }
 0x452   : > { %v2908_v10 = vsel %vm1234_vm2, %v6806_v50, -inf }
 0x453   : > { %v1500_v51 = vmul.f32 1.442695, %v1497_v5  ;;  %2909 = vmax.xlane.f32.xlu0 %v2908_v10  ;;  %v5356_v52 = vpop.f32.mrf.mxu0 }
 0x454   : > { %v1624_v16 = vpop.xlane.xlu0 %1623 }
 0x455   : > { %5670 = vpow2.f32 %v1500_v51  ;;  %v1628_v27 = vsub.f32 %v6697_v31, %v1624_v16  ;;  %v6811_v56 = vpop.f32.mrf.mxu0 }
 0x456   : > { %v3037_v40 = vsel %vm1234_vm2, %v6811_v56, -inf  ;;  %v6815_v2 = vpop.eup %5664 }
 0x457   : > { %3038 = vmax.xlane.f32.xlu0 %v3037_v40  ;;  %v5367_v24 = vpop.f32.mrf.mxu0  ;;  %v1630_v60 = vmul.f32 1.442695, %v1628_v27 }
 0x458   : > { %v1627_v63 = vpop.xlane.xlu1 %1626 }
 0x459   : > { %v1629_v3 = vsub.f32 %v6703_v17, %v1627_v63  ;;  %v6818_v6 = vpop.f32.mrf.mxu0  ;;  %5672 = vpow2.f32 %v1630_v60 }
 0x45a   : > { %v6820_v7 = vpop.eup %5666  ;;  %v3040_v31 = vsel %vm1234_vm2, %v6818_v6, -inf }
 0x45b   : > { %v1632_v14 = vmul.f32 1.442695, %v1629_v3  ;;  %3041 = vmax.xlane.f32.xlu1 %v3040_v31  ;;  %v5368_v8 = vpop.f32.mrf.mxu0  ;;  %v1377_v21 = vpack.c.bf16 %v6820_v7, %v6815_v2 }
 0x45c   : > { %v1755_v26 = vpop.xlane.xlu0 %1754 }
 0x45d   : > { %5674 = vpow2.f32 %v1632_v14  ;;  %v1759_v33 = vsub.f32 %v6711_v42, %v1755_v26  ;;  %5216 = vmatmul.mubr.msk.bf16.vlgmr.msra.gmra.mxu1 %vm1234_vm2, %v1377_v21  ;;  %v6828_v17 = vpop.f32.mrf.mxu0 }
 0x45e   : > { %5226 = vmatpush3.bf16.msra.mxu1 %v6689_v23  ;;  %5227 = vmatprep.mubr.msk.bf16.mxu1 %vm6107_vm0, %v6106_v36  ;;  %v6834_v47 = vpop.eup %5668 }
 0x45f   : > { %v5379_v15 = vpop.f32.mrf.mxu0  ;;  %5237 = vmatprep.subr.bf16.mxu1 %v6106_v36  ;;  %v1761_v19 = vmul.f32 1.442695, %v1759_v33 }
 0x460   : > { %v1758_v32 = vpop.xlane.xlu1 %1757  ;;  %v6889_v21 = vpop.permute.xlu0 %2543  ;;  %v3168_v15 = vsel %vm1234_vm2, %v6828_v17, -inf }
 0x461   : > { %v1760_v25 = vsub.f32 %v6716_v48, %v1758_v32  ;;  %v6837_v5 = vpop.f32.mrf.mxu0  ;;  %5676 = vpow2.f32 %v1761_v19 }
 0x462   : > { %v6839_v42 = vpop.eup %5670  ;;  %v3171_v19 = vsel %vm1234_vm2, %v6837_v5, -inf }
 0x463   : > { %v1763_v10 = vmul.f32 1.442695, %v1760_v25  ;;  %v5380_v51 = vpop.f32.mrf.mxu0  ;;  %v1510_v23 = vpack.c.bf16 %v6839_v42, %v6834_v47 }
 0x464   : > { %v1877_v52 = vpop.xlane.xlu1 %1876  ;;  %v1250_v51 = vsel %vm1234_vm2, %v6737_v62, 0.0 }
 0x465   : > { %5678 = vpow2.f32 %v1763_v10  ;;  %v1881_v16 = vsub.f32 %v6721_v53, %v1877_v52  ;;  %5228 = vmatmul.mubr.msk.bf16.vlgmr.msra.gmra.mxu1 %vm1234_vm2, %v1510_v23 }
 0x466   : > { %5238 = vmatpush3.bf16.msra.mxu1 %v6685_v18  ;;  %5239 = vmatprep.mubr.msk.bf16.mxu1 %vm6107_vm0, %v6106_v36  ;;  %v6849_v40 = vpop.eup %5672 }
 0x467   : > { %5249 = vmatprep.subr.bf16.mxu1 %v6106_v36  ;;  %v1883_v48 = vmul.f32 1.442695, %v1881_v16  ;;  %v1369_v16 = vsel %vm1234_vm2, %v6815_v2, 0.0 }
 0x468   : > { %v1880_v27 = vpop.xlane.xlu1 %1879 }
 0x469   : > { %v1882_v24 = vsub.f32 %v6725_v55, %v1880_v27  ;;  %5680 = vpow2.f32 %v1883_v48 }
 0x46a   : > { %v6852_v60 = vpop.eup %5674 }
 0x46b   : > { %v1885_v63 = vmul.f32 1.442695, %v1882_v24  ;;  %v1642_v53 = vpack.c.bf16 %v6852_v60, %v6849_v40 }
 0x46c   : > { %2674 = vrot.lane.b32.xlu1 %v6608_v44, %s6110_s22 }
 0x46d   : > { %5682 = vpow2.f32 %v1885_v63  ;;  %2927 = vrot.lane.b32.xlu0 %v6571_v30, %s6108_s11  ;;  %5240 = vmatmul.mubr.msk.bf16.vlgmr.msra.gmra.mxu1 %vm1234_vm2, %v1642_v53 }
 0x46e   : > { %5250 = vmatpush3.bf16.msra.mxu1 %v6505_v46  ;;  %5251 = vmatprep.mubr.msk.bf16.mxu1 %vm6107_vm0, %v6106_v36  ;;  %v6865_v18 = vpop.eup %5676 }
 0x46f   : > { %5261 = vmatprep.subr.bf16.mxu1 %v6106_v36 }
 0x471   : > { %3058 = vrot.lane.b32.xlu0 %v6571_v30, %s6109_s23 }
 0x472   : > { %v6869_v55 = vpop.eup %5678 }
 0x473   : > { %v1773_v3 = vpack.c.bf16 %v6869_v55, %v6865_v18 }
 0x475   : > { %5252 = vmatmul.mubr.msk.bf16.vlgmr.msra.gmra.mxu1 %vm1234_vm2, %v1773_v3 }
 0x476   : > { %5262 = vmatpush3.bf16.msra.mxu1 %v6695_v29  ;;  %5263 = vmatprep.mubr.msk.bf16.mxu1 %vm6107_vm0, %v6106_v36  ;;  %v6878_v46 = vpop.eup %5680  ;;  %v2012_v29 = vpop.xlane.xlu1 %2011 }
 0x477   : > { %5273 = vmatprep.subr.bf16.mxu1 %v6106_v36  ;;  %v2014_v26 = vsub.f32 %v6731_v58, %v2012_v29 }
 0x47a   : > { %v6880_v31 = vpop.eup %5682  ;;  %v2140_v8 = vpop.xlane.xlu1 %2139 }
 0x47b   : > { %v1895_v14 = vpack.c.bf16 %v6880_v31, %v6878_v46  ;;  %v2144_v52 = vsub.f32 %v6743_v1, %v2140_v8  ;;  %v1505_v1 = vsel %vm1234_vm2, %v6839_v42, 0.0  ;;  %v1637_v42 = vsel %vm1234_vm2, %v6852_v60, 0.0 }
 0x47d   : > { %5264 = vmatmul.mubr.msk.bf16.vlgmr.msra.gmra.mxu1 %vm1234_vm2, %v1895_v14  ;;  %v2146_v24 = vmul.f32 1.442695, %v2144_v52 }
 0x47e   : > { %5274 = vmatpush3.bf16.msra.mxu1 %v6701_v34  ;;  %5275 = vmatprep.mubr.msk.bf16.mxu1 %vm6107_vm0, %v6106_v36  ;;  %v2143_v33 = vpop.xlane.xlu1 %2142  ;;  %v2017_v34 = vmul.f32 1.442695, %v2014_v26 }
 0x47f   : > { %5285 = vmatprep.subr.bf16.mxu1 %v6106_v36  ;;  %v2145_v23 = vsub.f32 %v6752_v4, %v2143_v33 }
 0x480   : > { %5684 = vpow2.f32 %v2017_v34 }
 0x481   : > { %v2148_v48 = vmul.f32 1.442695, %v2145_v23 }
 0x482   : > { %v2270_v10 = vpop.xlane.xlu1 %2269 }
 0x483   : > { %v2274_v4 = vsub.f32 %v6756_v12, %v2270_v10 }
 0x485   : > { %v2276_v3 = vmul.f32 1.442695, %v2274_v4 }
 0x486   : > { %v2273_v27 = vpop.xlane.xlu1 %2272 }
 0x487   : > { %v2275_v62 = vsub.f32 %v6760_v20, %v2273_v27 }
 0x489   : > { %v2278_v63 = vmul.f32 1.442695, %v2275_v62 }
 0x48a   : > { %v2392_v29 = vpop.xlane.xlu1 %2391 }
 0x48b   : > { %v2396_v12 = vsub.f32 %v6764_v28, %v2392_v29 }
 0x48d   : > { %v5685_v2 = vpop.eup %5684  ;;  %v2398_v28 = vmul.f32 1.442695, %v2396_v12 }
 0x490   : > { %3169 = vmax.xlane.f32.xlu1 %v3168_v15  ;;  %3172 = vmax.xlane.f32.xlu0 %v3171_v19  ;;  %v2524_v19 = vpop.xlane.xlu1 %2523 }
 0x491   : > { %v2009_v32 = vpop.xlane.xlu0 %2008  ;;  %v2528_v10 = vsub.f32 %v6770_v43, %v2524_v19 }
 0x492   : > { %v2013_v25 = vsub.f32 %v6729_v35, %v2009_v32  ;;  %v1502_v35 = vsel %vm1234_vm2, %v6834_v47, 0.0  ;;  %v1634_v47 = vsel %vm1234_vm2, %v6849_v40, 0.0 }
 0x493   : > { %v2530_v52 = vmul.f32 1.442695, %v2528_v10 }
 0x494   : > { %v2015_v58 = vmul.f32 1.442695, %v2013_v25  ;;  %1251 = vadd.xlane.f32.xlu1 %v1250_v51  ;;  %v2655_v4 = vpop.xlane.xlu1 %2654 }
 0x495   : > { %v2395_v53 = vpop.xlane.xlu0 %2394 }
 0x496   : > { %5686 = vpow2.f32 %v2015_v58  ;;  %v2397_v20 = vsub.f32 %v6768_v38, %v2395_v53 }
 0x497   : > { %5688 = vpow2.f32 %v2148_v48 }
 0x498   : > { %1370 = vadd.xlane.f32.xlu1 %v1369_v16  ;;  %5690 = vpow2.f32 %v2146_v24  ;;  %v2400_v38 = vmul.f32 1.442695, %v2397_v20 }
 0x499   : > { %5692 = vpow2.f32 %v2278_v63  ;;  %v2527_v26 = vpop.xlane.xlu0 %2526  ;;  %v2659_v63 = vsub.f32 %v6778_v49, %v2655_v4  ;;  %v1372_v49 = vsel %vm1234_vm2, %v6820_v7, 0.0  ;;  %v1768_v4 = vsel %vm1234_vm2, %v6869_v55, 0.0 }
 0x49a   : > { %5694 = vpow2.f32 %v2276_v3  ;;  %v2529_v34 = vsub.f32 %v6774_v45, %v2527_v26  ;;  %v1890_v45 = vsel %vm1234_vm2, %v6880_v31, 0.0  ;;  %v2022_v31 = vsel %vm1234_vm2, %v5685_v2, 0.0 }
 0x49b   : > { %5696 = vpow2.f32 %v2400_v38 }
 0x49c   : > { %1503 = vadd.xlane.f32.xlu1 %v1502_v35  ;;  %5698 = vpow2.f32 %v2398_v28  ;;  %v2532_v23 = vmul.f32 1.442695, %v2529_v34 }
 0x49d   : > { %v2658_v60 = vpop.xlane.xlu0 %2657 }
 0x49e   : > { %v2660_v58 = vsub.f32 %v6784_v54, %v2658_v60  ;;  %5700 = vpow2.f32 %v2532_v23 }
 0x49f   : > { %5702 = vpow2.f32 %v2530_v52 }
 0x4a0   : > { %1506 = vadd.xlane.f32.xlu1 %v1505_v1  ;;  %v2663_v48 = vmul.f32 1.442695, %v2660_v58 }
 0x4a2   : > { %5704 = vpow2.f32 %v2663_v48 }
 0x4a3   : > { %v5687_v14 = vpop.eup %5686 }
 0x4a4   : > { %1635 = vadd.xlane.f32.xlu1 %v1634_v47  ;;  %v2027_v8 = vpack.c.bf16 %v5685_v2, %v5687_v14  ;;  %v5689_v40 = vpop.eup %5688  ;;  %v2019_v54 = vsel %vm1234_vm2, %v5687_v14, 0.0  ;;  %v2661_v14 = vmul.f32 1.442695, %v2659_v63 }
 0x4a5   : > { %v6924_v15 = vpop.eup %5690  ;;  %v2153_v35 = vsel %vm1234_vm2, %v5689_v40, 0.0 }
 0x4a6   : > { %3189 = vrot.lane.b32.xlu0 %v6571_v30, %s6110_s22  ;;  %5276 = vmatmul.mubr.msk.bf16.vlgmr.msra.gmra.mxu1 %vm1234_vm2, %v2027_v8  ;;  %v2158_v25 = vpack.c.bf16 %v5689_v40, %v6924_v15  ;;  %v6941_v43 = vpop.eup %5692  ;;  %5706 = vpow2.f32 %v2661_v14  ;;  %v2150_v20 = vsel %vm1234_vm2, %v6924_v15, 0.0 }
 0x4a7   : > { %5286 = vmatpush3.bf16.msra.mxu1 %v6705_v37  ;;  %5287 = vmatprep.mubr.msk.bf16.mxu1 %vm6107_vm0, %v6106_v36  ;;  %v1887_v37 = vsel %vm1234_vm2, %v6878_v46, 0.0  ;;  %v6943_v16 = vpop.eup %5694 }
 0x4a8   : > { %1638 = vadd.xlane.f32.xlu1 %v1637_v42  ;;  %5297 = vmatprep.subr.bf16.mxu1 %v6106_v36  ;;  %v5697_v27 = vpop.eup %5696 }
 0x4a9   : > { %v5699_v24 = vpop.eup %5698 }
 0x4aa   : > { %v6922_v33 = vpop.f32.mrf.mxu1  ;;  %v2410_v62 = vpack.c.bf16 %v5697_v27, %v5699_v24  ;;  %v2402_v8 = vsel %vm1234_vm2, %v5699_v24, 0.0 }
 0x4ab   : > { %v5701_v1 = vpop.eup %5700 }
 0x4ac   : > { %v5205_v32 = vpop.f32.mrf.mxu1  ;;  %1888 = vadd.xlane.f32.xlu1 %v1887_v37  ;;  %v5703_v53 = vpop.eup %5702  ;;  %v2537_v2 = vsel %vm1234_vm2, %v5701_v1, 0.0 }
 0x4ad   : > { %v2542_v29 = vpack.c.bf16 %v5701_v1, %v5703_v53  ;;  %v2534_v26 = vsel %vm1234_vm2, %v5703_v53, 0.0 }
 0x4ae   : > { %v6931_v51 = vpop.f32.mrf.mxu1  ;;  %5288 = vmatmul.mubr.msk.bf16.vlgmr.msra.gmra.mxu1 %vm1234_vm2, %v2158_v25 }
 0x4af   : > { %5298 = vmatpush3.bf16.msra.mxu1 %v6608_v44  ;;  %5299 = vmatprep.mubr.msk.bf16.mxu1 %vm6107_vm0, %v6106_v36  ;;  %v2288_v44 = vpack.c.bf16 %v6941_v43, %v6943_v16  ;;  %v5705_v3 = vpop.eup %5704 }
 0x4b0   : > { %v5206_v46 = vpop.f32.mrf.mxu1  ;;  %1891 = vadd.xlane.f32.xlu1 %v1890_v45  ;;  %5309 = vmatprep.subr.bf16.mxu1 %v6106_v36  ;;  %v2668_v47 = vsel %vm1234_vm2, %v5705_v3, 0.0 }
 0x4b3   : > { %v5707_v42 = vpop.eup %5706 }
 0x4b4   : > { %2020 = vadd.xlane.f32.xlu1 %v2019_v54  ;;  %v2665_v40 = vsel %vm1234_vm2, %v5707_v42, 0.0 }
 0x4b6   : > { %5300 = vmatmul.mubr.msk.bf16.vlgmr.msra.gmra.mxu1 %vm1234_vm2, %v2288_v44 }
 0x4b7   : > { %5310 = vmatpush3.bf16.msra.mxu1 %v6709_v41  ;;  %5311 = vmatprep.mubr.msk.bf16.mxu1 %vm6107_vm0, %v6106_v36  ;;  %v2405_v41 = vsel %vm1234_vm2, %v5697_v27, 0.0 }
 0x4b8   : > { %2023 = vadd.xlane.f32.xlu1 %v2022_v31  ;;  %5321 = vmatprep.subr.bf16.mxu1 %v6106_v36 }
 0x4bc   : > { %2154 = vadd.xlane.f32.xlu1 %v2153_v35 }
 0x4be   : > { %5312 = vmatmul.mubr.msk.bf16.vlgmr.msra.gmra.mxu1 %vm1234_vm2, %v2410_v62 }
 0x4bf   : > { %5322 = vmatpush3.bf16.msra.mxu1 %v6889_v21  ;;  %5323 = vmatprep.mubr.msk.bf16.mxu1 %vm6107_vm0, %v6106_v36  ;;  %v1247_v21 = vsel %vm1234_vm2, %v6733_v59, 0.0  ;;  %v2785_v59 = vpop.xlane.xlu1 %2784 }
 0x4c0   : > { %2406 = vadd.xlane.f32.xlu1 %v2405_v41  ;;  %5333 = vmatprep.subr.bf16.mxu1 %v6106_v36  ;;  %v2789_v15 = vsub.f32 %v6788_v57, %v2785_v59 }
 0x4c2   : > { %v2791_v25 = vmul.f32 1.442695, %v2789_v15 }
 0x4c3   : > { %v2788_v12 = vpop.xlane.xlu1 %2787 }
 0x4c4   : > { %2538 = vadd.xlane.f32.xlu1 %v2537_v2  ;;  %v2790_v7 = vsub.f32 %v6794_v0, %v2788_v12 }
 0x4c5   : > { %1248 = vadd.xlane.f32.xlu0 %v1247_v21 }
 0x4c6   : > { %5324 = vmatmul.mubr.msk.bf16.vlgmr.msra.gmra.mxu1 %vm1234_vm2, %v2542_v29  ;;  %v2793_v60 = vmul.f32 1.442695, %v2790_v7 }
 0x4c7   : > { %5335 = vmatprep.mubr.msk.bf16.mxu1 %vm6107_vm0, %v6106_v36 }
 0x4c8   : > { %2669 = vadd.xlane.f32.xlu1 %v2668_v47 }
 0x4c9   : > { %1373 = vadd.xlane.f32.xlu0 %v1372_v49 }
 0x4cd   : > { %2151 = vadd.xlane.f32.xlu0 %v2150_v20 }
 0x4d1   : > { %2403 = vadd.xlane.f32.xlu0 %v2402_v8 }
 0x4d5   : > { %2535 = vadd.xlane.f32.xlu0 %v2534_v26 }
 0x4d8   : > { %v2907_v38 = vpop.xlane.xlu1 %2906 }
 0x4d9   : > { %v2911_v28 = vsub.f32 %v6801_v39, %v2907_v38  ;;  %2666 = vadd.xlane.f32.xlu0 %v2665_v40 }
 0x4db   : > { %v2913_v19 = vmul.f32 1.442695, %v2911_v28 }
 0x4dc   : > { %v2910_v34 = vpop.xlane.xlu0 %2909 }
 0x4dd   : > { %5708 = vpow2.f32 %v2913_v19  ;;  %v2912_v37 = vsub.f32 %v6806_v50, %v2910_v34  ;;  %v2673_v50 = vpack.c.bf16 %v5705_v3, %v5707_v42 }
 0x4df   : > { %v2915_v32 = vmul.f32 1.442695, %v2912_v37 }
 0x4e0   : > { %v3039_v10 = vpop.xlane.xlu0 %3038 }
 0x4e1   : > { %5710 = vpow2.f32 %v2915_v32  ;;  %v3043_v23 = vsub.f32 %v6811_v56, %v3039_v10  ;;  %v1765_v32 = vsel %vm1234_vm2, %v6865_v18, 0.0  ;;  %v2283_v10 = vsel %vm1234_vm2, %v6941_v43, 0.0 }
 0x4e2   : > { %5712 = vpow2.f32 %v2793_v60 }
 0x4e3   : > { %v3045_v58 = vmul.f32 1.442695, %v3043_v23  ;;  %5714 = vpow2.f32 %v2791_v25 }
 0x4e4   : > { %v3042_v39 = vpop.xlane.xlu1 %3041 }
 0x4e5   : > { %5716 = vpow2.f32 %v3045_v58  ;;  %v3044_v0 = vsub.f32 %v6818_v6, %v3042_v39 }
 0x4e7   : > { %v3047_v45 = vmul.f32 1.442695, %v3044_v0 }
 0x4e8   : > { %v2675_v57 = vpop.permute.xlu1 %2674 }
 0x4e9   : > { %5718 = vpow2.f32 %v3047_v45  ;;  %5334 = vmatpush3.bf16.msra.mxu1 %v2675_v57 }
 0x4ea   : > { %v5709_v46 = vpop.eup %5708  ;;  %5345 = vmatprep.subr.bf16.mxu1 %v6106_v36 }
 0x4eb   : > { %v2917_v52 = vsel %vm1234_vm2, %v5709_v46, 0.0 }
 0x4ec   : > { %2918 = vadd.xlane.f32.xlu0 %v2917_v52  ;;  %5336 = vmatmul.mubr.msk.bf16.vlgmr.msra.gmra.mxu1 %vm1234_vm2, %v2673_v50 }
 0x4ed   : > { %5346 = vmatpush3.bf16.msra.mxu1 %v6571_v30  ;;  %5347 = vmatprep.mubr.msk.bf16.mxu1 %vm6107_vm0, %v6106_v36  ;;  %v2928_v30 = vpop.permute.xlu0 %2927 }
 0x4ee   : > { %v5711_v56 = vpop.eup %5710  ;;  %5357 = vmatprep.subr.bf16.mxu1 %v6106_v36 }
 0x4ef   : > { %v6989_v6 = vpop.eup %5712  ;;  %v2920_v48 = vsel %vm1234_vm2, %v5711_v56, 0.0  ;;  %v2925_v62 = vpack.c.bf16 %v5711_v56, %v5709_v46 }
 0x4f0   : > { %2921 = vadd.xlane.f32.xlu1 %v2920_v48  ;;  %v6992_v54 = vpop.eup %5714  ;;  %v2798_v18 = vsel %vm1234_vm2, %v6989_v6, 0.0 }
 0x4f1   : > { %v2803_v31 = vpack.c.bf16 %v6989_v6, %v6992_v54  ;;  %v3059_v41 = vpop.permute.xlu0 %3058  ;;  %v2795_v45 = vsel %vm1234_vm2, %v6992_v54, 0.0 }
 0x4f2   : > { %v5717_v44 = vpop.eup %5716 }
 0x4f3   : > { %v3049_v27 = vsel %vm1234_vm2, %v5717_v44, 0.0 }
 0x4f4   : > { %5348 = vmatmul.mubr.msk.bf16.vlgmr.msra.gmra.mxu1 %vm1234_vm2, %v2803_v31  ;;  %3050 = vadd.xlane.f32.xlu0 %v3049_v27 }
 0x4f5   : > { %5358 = vmatpush3.bf16.msra.mxu1 %v2928_v30  ;;  %5359 = vmatprep.mubr.msk.bf16.mxu1 %vm6107_vm0, %v6106_v36 }
 0x4f6   : > { %v5719_v24 = vpop.eup %5718  ;;  %5369 = vmatprep.subr.bf16.mxu1 %v6106_v36 }
 0x4f7   : > { %v3052_v35 = vsel %vm1234_vm2, %v5719_v24, 0.0  ;;  %v3057_v1 = vpack.c.bf16 %v5719_v24, %v5717_v44 }
 0x4f8   : > { %3053 = vadd.xlane.f32.xlu1 %v3052_v35 }
 0x4fc   : > { %1769 = vadd.xlane.f32.xlu1 %v1768_v4  ;;  %5360 = vmatmul.mubr.msk.bf16.vlgmr.msra.gmra.mxu1 %vm1234_vm2, %v2925_v62  ;;  %v5556_v62 = vld [vmem:[%s6354_s29 + $0x38] sm:$0xff]  }
 0x4fd   : > { %5370 = vmatpush3.bf16.msra.mxu1 %v3059_v41  ;;  %5371 = vmatprep.mubr.msk.bf16.mxu1 %vm6107_vm0, %v6106_v36 }
 0x4fe   : > { %5381 = vmatprep.subr.bf16.mxu1 %v6106_v36  ;;  %5387 = vmatprep.subr.bf16.mxu0 %v5556_v62 }
 0x4ff   : > { %5388 = vmatpush3.bf16.msra.mxu0 %v5556_v62 }
 0x504   : > { %5372 = vmatmul.mubr.msk.bf16.vlgmr.msra.gmra.mxu1 %vm1234_vm2, %v3057_v1 }
 0x505   : > { %5383 = vmatprep.mubr.msk.bf16.mxu1 %vm6107_vm0, %v6106_v36 }
 0x519   : > { %v3170_v63 = vpop.xlane.xlu1 %3169  ;;  %v3173_v53 = vpop.xlane.xlu0 %3172 }
 0x51a   : > { %v3174_v55 = vsub.f32 %v6828_v17, %v3170_v63  ;;  %v3175_v2 = vsub.f32 %v6837_v5, %v3173_v53  ;;  %v5557_v63 = vld [vmem:[%s6354_s29 + $0x30] sm:$0xff]  }
 0x51b   : > { %5389 = vmatprep.subr.bf16.mxu0 %v5557_v63 }
 0x51c   : > { %v3176_v3 = vmul.f32 1.442695, %v3174_v55  ;;  %v3178_v14 = vmul.f32 1.442695, %v3175_v2  ;;  %v5558_v2 = vld [vmem:[%s6354_s29 + $0x28] sm:$0xff]   ;;  %5390 = vmatpush3.bf16.msra.mxu0 %v5557_v63 }
 0x51d   : > { %v1252_v21 = vpop.xlane.xlu1 %1251  ;;  %v1419_v29 = vpop.f32.mrf.mxu1  ;;  %5391 = vmatprep.subr.bf16.mxu0 %v5558_v2 }
 0x51e   : > { %5720 = vpow2.f32 %v3176_v3  ;;  %v3190_v47 = vpop.permute.xlu0 %3189 }
 0x51f   : > { %5722 = vpow2.f32 %v3178_v14  ;;  %5382 = vmatpush3.bf16.msra.mxu1 %v3190_v47  ;;  %v5217_v49 = vpop.f32.mrf.mxu1 }
 0x520   : > { %5724 = vrcp.f32 %v1252_v21  ;;  %5392 = vmatpush3.bf16.msra.mxu0 %v5558_v2 }
 0x521   : > { %v7013_v20 = vpop.f32.mrf.mxu1  ;;  %v1371_v59 = vpop.xlane.xlu1 %1370 }
 0x522   : > { %5726 = vrcp.f32 %v1371_v59 }
 0x523   : > { %v5218_v36 = vpop.f32.mrf.mxu1 }
 0x524   : > { %v5560_v36 = vld [vmem:[%s6354_s29 + $0x18] sm:$0xff]  }
 0x525   : > { %v7015_v8 = vpop.f32.mrf.mxu1  ;;  %v1504_v17 = vpop.xlane.xlu1 %1503 }
 0x527   : > { %v5229_v12 = vpop.f32.mrf.mxu1 }
 0x529   : > { %v1554_v26 = vpop.f32.mrf.mxu1  ;;  %v1507_v34 = vpop.xlane.xlu1 %1506 }
 0x52a   : > { %5728 = vrcp.f32 %v1507_v34 }
 0x52b   : > { %v5721_v5 = vpop.eup %5720  ;;  %v5230_v42 = vpop.f32.mrf.mxu1 }
 0x52c   : > { %v5723_v38 = vpop.eup %5722  ;;  %v3180_v40 = vsel %vm1234_vm2, %v5721_v5, 0.0 }
 0x52d   : > { %v5725_v28 = vpop.eup %5724  ;;  %v7018_v7 = vpop.f32.mrf.mxu1  ;;  %3181 = vadd.xlane.f32.xlu0 %v3180_v40  ;;  %v3183_v19 = vsel %vm1234_vm2, %v5723_v38, 0.0  ;;  %v3188_v15 = vpack.c.bf16 %v5723_v38, %v5721_v5  ;;  %v5561_v5 = vld [vmem:[%s6354_s29 + $0x10] sm:$0xff]  }
 0x52e   : > { %3184 = vadd.xlane.f32.xlu1 %v3183_v19  ;;  %v1301_v37 = vmul.f32 %v5725_v28, %v6931_v51  ;;  %v1636_v58 = vpop.xlane.xlu1 %1635  ;;  %v2280_v51 = vsel %vm1234_vm2, %v6943_v16, 0.0  ;;  %v5562_v19 = vld [vmem:[%s6354_s29 + $0x8] sm:$0xff]  }
 0x52f   : > { %5384 = vmatmul.mubr.msk.bf16.vlgmr.msra.gmra.mxu1 %vm1234_vm2, %v3188_v15  ;;  %v5241_v60 = vpop.f32.mrf.mxu1  ;;  %v5727_v44 = vpop.eup %5726 }
 0x530   : > { %1303 = vst.msk [vmem:[#allocation3 + $0x8] sm:$0xff] %vm1186_vm1, %v1301_v37  ;;  %3772 = vmatprep.mubr.bf16.mxu1 %v6105_v61  ;;  %v1426_v31 = vmul.f32 %v5727_v44, %v1419_v29  ;;  %v5559_v29 = vld [vmem:[%s6354_s29 + $0x20] sm:$0xff]  }
 0x531   : > { %v1686_v25 = vpop.f32.mrf.mxu1  ;;  %1766 = vadd.xlane.f32.xlu0 %v1765_v32  ;;  %5393 = vmatprep.subr.bf16.mxu0 %v5559_v29 }
 0x532   : > { %2284 = vadd.xlane.f32.xlu1 %v2283_v10  ;;  %v1639_v43 = vpop.xlane.xlu1 %1638  ;;  %5394 = vmatpush3.bf16.msra.mxu0 %v5559_v29  ;;  %v5563_v10 = vld [vmem:[%s6354_s29] sm:$0xff]   ;;  %s7662_s29 = sld [smem:[#allocation24_spill]] }
 0x533   : > { %v5242_v23 = vpop.f32.mrf.mxu1  ;;  %5730 = vrcp.f32 %v1639_v43  ;;  %5395 = vmatprep.subr.bf16.mxu0 %v5560_v36 }
 0x535   : > { %v7031_v39 = vpop.f32.mrf.mxu1  ;;  %2281 = vadd.xlane.f32.xlu0 %v2280_v51 }
 0x536   : > { %2799 = vadd.xlane.f32.xlu1 %v2798_v18  ;;  %v1889_v52 = vpop.xlane.xlu1 %1888  ;;  %5396 = vmatpush3.bf16.msra.mxu0 %v5560_v36 }
 0x537   : > { %v5253_v0 = vpop.f32.mrf.mxu1  ;;  %v5729_v54 = vpop.eup %5728  ;;  %5397 = vmatprep.subr.bf16.mxu0 %v5561_v5 }
 0x538   : > { %v1559_v30 = vmul.f32 %v5729_v54, %v1554_v26  ;;  %s7663_s16 = scalar_lea.vmem %s7662_s29, %s6327_s5 }
 0x539   : > { %v7037_v57 = vpop.f32.mrf.mxu1  ;;  %2796 = vadd.xlane.f32.xlu0 %v2795_v45 }
 0x53a   : > { %v1892_v6 = vpop.xlane.xlu1 %1891  ;;  %5398 = vmatpush3.bf16.msra.mxu0 %v5561_v5 }
 0x53b   : > { %v5254_v46 = vpop.f32.mrf.mxu1  ;;  %5732 = vrcp.f32 %v1892_v6  ;;  %5399 = vmatprep.subr.bf16.mxu0 %v5562_v19 }
 0x53d   : > { %v7039_v50 = vpop.f32.mrf.mxu1 }
 0x53e   : > { %v2021_v4 = vpop.xlane.xlu1 %2020  ;;  %5400 = vmatpush3.bf16.msra.mxu0 %v5562_v19 }
 0x53f   : > { %v5265_v16 = vpop.f32.mrf.mxu1  ;;  %5401 = vmatprep.subr.bf16.mxu0 %v5563_v10 }
 0x540   : > { %v5731_v24 = vpop.eup %5730 }
 0x541   : > { %v1940_v56 = vpop.f32.mrf.mxu1  ;;  %v1691_v41 = vmul.f32 %v5731_v24, %v1686_v25 }
 0x542   : > { %v2024_v55 = vpop.xlane.xlu1 %2023  ;;  %5402 = vmatpush3.bf16.msra.mxu0 %v5563_v10 }
 0x543   : > { %v5266_v48 = vpop.f32.mrf.mxu1 }
 0x546   : > { %v2155_v59 = vpop.xlane.xlu1 %2154 }
 0x548   : > { %v5733_v1 = vpop.eup %5732 }
 0x549   : > { %v1945_v53 = vmul.f32 %v5733_v1, %v1940_v56 }
 0x54a   : > { %v2407_v37 = vpop.xlane.xlu1 %2406 }
 0x54e   : > { %v1249_v27 = vpop.xlane.xlu0 %1248  ;;  %v2539_v18 = vpop.xlane.xlu1 %2538 }
 0x54f   : > { %5734 = vrcp.f32 %v1249_v27  ;;  %1430 = vrot.lane.b32.xlu0 %v1426_v31, %s6110_s22 }
 0x552   : > { %v1374_v35 = vpop.xlane.xlu0 %1373  ;;  %v2670_v56 = vpop.xlane.xlu1 %2669 }
 0x553   : > { %5736 = vrcp.f32 %v1374_v35  ;;  %1564 = vrot.lane.b32.xlu0 %v1559_v30, %s6109_s23 }
 0x554   : > { %5738 = vrcp.f32 %v1504_v17 }
 0x555   : > { %5740 = vrcp.f32 %v1636_v58 }
 0x556   : > { %5742 = vrcp.f32 %v1889_v52  ;;  %v2152_v12 = vpop.xlane.xlu0 %2151 }
 0x557   : > { %1696 = vrot.lane.b32.xlu0 %v1691_v41, %s6108_s11  ;;  %5744 = vrcp.f32 %v2024_v55 }
 0x558   : > { %5746 = vrcp.f32 %v2021_v4 }
 0x559   : > { %5748 = vrcp.f32 %v2155_v59 }
 0x55a   : > { %5750 = vrcp.f32 %v2152_v12  ;;  %v2404_v60 = vpop.xlane.xlu0 %2403 }
 0x55b   : > { %1950 = vrot.lane.b32.xlu0 %v1945_v53, %s6110_s22  ;;  %5752 = vrcp.f32 %v2404_v60 }
 0x55c   : > { %v5735_v3 = vpop.eup %5734  ;;  %5754 = vrcp.f32 %v2407_v37 }
 0x55d   : > { %v1300_v14 = vmul.f32 %v5735_v3, %v6922_v33 }
 0x55f   : > { %1302 = vst.msk [vmem:[#allocation3] sm:$0xff] %vm1186_vm1, %v1300_v14 }
 0x560   : > { %v5737_v21 = vpop.eup %5736 }
 0x561   : > { %v1427_v47 = vmul.f32 %v5737_v21, %v7013_v20  ;;  %v5739_v49 = vpop.eup %5738 }
 0x562   : > { %v1558_v33 = vmul.f32 %v5739_v49, %v7015_v8  ;;  %v5741_v17 = vpop.eup %5740 }
 0x563   : > { %1432 = vrot.lane.b32.xlu1 %v1427_v47, %s6110_s22  ;;  %v5743_v42 = vpop.eup %5742  ;;  %v1690_v38 = vmul.f32 %v5741_v17, %v7018_v7 }
 0x564   : > { %v5745_v40 = vpop.eup %5744  ;;  %v1944_v34 = vmul.f32 %v5743_v42, %v7039_v50  ;;  %v2536_v50 = vpop.xlane.xlu0 %2535 }
 0x565   : > { %v5747_v7 = vpop.eup %5746  ;;  %5756 = vrcp.f32 %v2536_v50 }
 0x566   : > { %v2068_v26 = vpop.f32.mrf.mxu1  ;;  %v5749_v58 = vpop.eup %5748  ;;  %5758 = vrcp.f32 %v2539_v18 }
 0x567   : > { %1562 = vrot.lane.b32.xlu1 %v1558_v33, %s6109_s23  ;;  %v2075_v23 = vmul.f32 %v5747_v7, %v2068_v26  ;;  %v5751_v45 = vpop.eup %5750 }
 0x568   : > { %v5277_v20 = vpop.f32.mrf.mxu1  ;;  %v5753_v31 = vpop.eup %5752 }
 0x569   : > { %v5755_v35 = vpop.eup %5754  ;;  %v2667_v59 = vpop.xlane.xlu0 %2666 }
 0x56a   : > { %v2071_v28 = vpop.f32.mrf.mxu1 }
 0x56b   : > { %v2076_v15 = vmul.f32 %v5745_v40, %v2071_v28  ;;  %1694 = vrot.lane.b32.xlu1 %v1690_v38, %s6108_s11 }
 0x56c   : > { %v5278_v8 = vpop.f32.mrf.mxu1 }
 0x56d   : > { %2081 = vrot.lane.b32.xlu0 %v2076_v15, %s6109_s23 }
 0x56e   : > { %v2199_v32 = vpop.f32.mrf.mxu1 }
 0x56f   : > { %1948 = vrot.lane.b32.xlu1 %v1944_v34, %s6110_s22  ;;  %v2206_v46 = vmul.f32 %v5751_v45, %v2199_v32 }
 0x570   : > { %v5289_v25 = vpop.f32.mrf.mxu1 }
 0x572   : > { %v2202_v51 = vpop.f32.mrf.mxu1  ;;  %v5757_v63 = vpop.eup %5756 }
 0x573   : > { %v2207_v0 = vmul.f32 %v5749_v58, %v2202_v51  ;;  %2079 = vrot.lane.b32.xlu1 %v2075_v23, %s6109_s23  ;;  %v5759_v3 = vpop.eup %5758 }
 0x574   : > { %v5290_v43 = vpop.f32.mrf.mxu1 }
 0x575   : > { %2212 = vrot.lane.b32.xlu0 %v2207_v0, %s6108_s11  ;;  %v2919_v12 = vpop.xlane.xlu0 %2918 }
 0x576   : > { %v7066_v16 = vpop.f32.mrf.mxu1 }
 0x577   : > { %2210 = vrot.lane.b32.xlu1 %v2206_v46, %s6108_s11 }
 0x578   : > { %v5301_v52 = vpop.f32.mrf.mxu1 }
 0x579   : > { %v2922_v44 = vpop.xlane.xlu1 %2921 }
 0x57a   : > { %v7069_v48 = vpop.f32.mrf.mxu1 }
 0x57c   : > { %v5302_v6 = vpop.f32.mrf.mxu1 }
 0x57d   : > { %v3051_v38 = vpop.xlane.xlu0 %3050 }
 0x57e   : > { %v2452_v54 = vpop.f32.mrf.mxu1 }
 0x57f   : > { %v2459_v27 = vmul.f32 %v5753_v31, %v2452_v54 }
 0x580   : > { %v5313_v30 = vpop.f32.mrf.mxu1 }
 0x581   : > { %v3054_v24 = vpop.xlane.xlu1 %3053  ;;  %2463 = vrot.lane.b32.xlu1 %v2459_v27, %s6110_s22 }
 0x582   : > { %v2455_v62 = vpop.f32.mrf.mxu1 }
 0x583   : > { %v2460_v4 = vmul.f32 %v5755_v35, %v2455_v62 }
 0x584   : > { %v5314_v41 = vpop.f32.mrf.mxu1 }
 0x585   : > { %v1770_v1 = vpop.xlane.xlu1 %1769  ;;  %2465 = vrot.lane.b32.xlu0 %v2460_v4, %s6110_s22 }
 0x586   : > { %5760 = vrcp.f32 %v1770_v1  ;;  %v2583_v53 = vpop.f32.mrf.mxu1 }
 0x587   : > { %v2590_v55 = vmul.f32 %v5757_v63, %v2583_v53  ;;  %5762 = vrcp.f32 %v2667_v59 }
 0x588   : > { %v5325_v2 = vpop.f32.mrf.mxu1  ;;  %5764 = vrcp.f32 %v2670_v56 }
 0x589   : > { %2594 = vrot.lane.b32.xlu1 %v2590_v55, %s6109_s23  ;;  %5766 = vrcp.f32 %v2919_v12 }
 0x58a   : > { %v2586_v14 = vpop.f32.mrf.mxu1  ;;  %5768 = vrcp.f32 %v2922_v44 }
 0x58b   : > { %v2591_v21 = vmul.f32 %v5759_v3, %v2586_v14  ;;  %5770 = vrcp.f32 %v3051_v38 }
 0x58c   : > { %v5326_v29 = vpop.f32.mrf.mxu1  ;;  %5772 = vrcp.f32 %v3054_v24 }
 0x58d   : > { %2596 = vrot.lane.b32.xlu0 %v2591_v21, %s6109_s23 }
 0x593   : > { %v5761_v47 = vpop.eup %5760 }
 0x594   : > { %v1819_v49 = vmul.f32 %v5761_v47, %v7037_v57  ;;  %v5763_v36 = vpop.eup %5762 }
 0x595   : > { %v5765_v20 = vpop.eup %5764 }
 0x596   : > { %1821 = vst.msk [vmem:[#allocation3 + $0x18] sm:$0xff] %vm1186_vm1, %v1819_v49  ;;  %v5767_v32 = vpop.eup %5766 }
 0x597   : > { %v5769_v51 = vpop.eup %5768 }
 0x598   : > { %v5771_v46 = vpop.eup %5770 }
 0x599   : > { %v5773_v44 = vpop.eup %5772 }
 0x5ac   : > { %v2714_v33 = vpop.f32.mrf.mxu1 }
 0x5ad   : > { %v2721_v17 = vmul.f32 %v5763_v36, %v2714_v33 }
 0x5ae   : > { %v5337_v26 = vpop.f32.mrf.mxu1 }
 0x5af   : > { %2725 = vrot.lane.b32.xlu1 %v2721_v17, %s6108_s11 }
 0x5b0   : > { %v2717_v5 = vpop.f32.mrf.mxu1 }
 0x5b1   : > { %v2722_v42 = vmul.f32 %v5765_v20, %v2717_v5 }
 0x5b2   : > { %v5338_v40 = vpop.f32.mrf.mxu1 }
 0x5b3   : > { %2727 = vrot.lane.b32.xlu0 %v2722_v42, %s6108_s11 }
 0x5b4   : > { %v2841_v57 = vpop.f32.mrf.mxu1 }
 0x5b6   : > { %v5349_v28 = vpop.f32.mrf.mxu1  ;;  %v7079_v19 = vpop.xlane.xlu0 %3181 }
 0x5b7   : > { %v7081_v15 = vpop.xlane.xlu1 %3184 }
 0x5b8   : > { %v2844_v8 = vpop.f32.mrf.mxu1 }
 0x5ba   : > { %v5350_v34 = vpop.f32.mrf.mxu1  ;;  %v1767_v37 = vpop.xlane.xlu0 %1766 }
 0x5bb   : > { %v2285_v60 = vpop.xlane.xlu1 %2284  ;;  %5774 = vrcp.f32 %v1767_v37 }
 0x5bc   : > { %5776 = vrcp.f32 %v2285_v60  ;;  %v2967_v7 = vpop.f32.mrf.mxu1 }
 0x5bd   : > { %v2974_v25 = vmul.f32 %v5767_v32, %v2967_v7 }
 0x5be   : > { %v5361_v10 = vpop.f32.mrf.mxu1  ;;  %v2282_v23 = vpop.xlane.xlu0 %2281 }
 0x5bf   : > { %v2800_v58 = vpop.xlane.xlu1 %2799  ;;  %5778 = vrcp.f32 %v2282_v23  ;;  %2978 = vrot.lane.b32.xlu1 %v2974_v25, %s6110_s22 }
 0x5c0   : > { %5780 = vrcp.f32 %v2800_v58  ;;  %v2970_v18 = vpop.f32.mrf.mxu1 }
 0x5c1   : > { %v2975_v0 = vmul.f32 %v5769_v51, %v2970_v18 }
 0x5c2   : > { %v5362_v45 = vpop.f32.mrf.mxu1  ;;  %v2797_v43 = vpop.xlane.xlu0 %2796 }
 0x5c3   : > { %5782 = vrcp.f32 %v2797_v43  ;;  %2980 = vrot.lane.b32.xlu0 %v2975_v0, %s6110_s22 }
 0x5c4   : > { %v3098_v50 = vpop.f32.mrf.mxu1  ;;  %5784 = vrcp.f32 %v7079_v19 }
 0x5c5   : > { %v3105_v52 = vmul.f32 %v5771_v46, %v3098_v50  ;;  %5786 = vrcp.f32 %v7081_v15 }
 0x5c6   : > { %v5373_v56 = vpop.f32.mrf.mxu1  ;;  %v1431_v6 = vpop.permute.xlu0 %1430 }
 0x5c7   : > { %1437 = vst.msk [vmem:[#allocation3] sm:$0xff] %vm1436_vm3, %v1431_v6  ;;  %3109 = vrot.lane.b32.xlu1 %v3105_v52, %s6109_s23  ;;  %v4887_v6 = vld [vmem:[%s7663_s16] ss:$0 sm:$0xff] }
 0x5c8   : > { %v5775_v31 = vpop.eup %5774  ;;  %v3101_v54 = vpop.f32.mrf.mxu1 }
 0x5c9   : > { %v5777_v27 = vpop.eup %5776  ;;  %v3106_v30 = vmul.f32 %v5773_v44, %v3101_v54  ;;  %v1818_v24 = vmul.f32 %v5775_v31, %v7031_v39 }
 0x5ca   : > { %v5374_v35 = vpop.f32.mrf.mxu1  ;;  %v1565_v62 = vpop.permute.xlu0 %1564  ;;  %v2334_v4 = vmul.f32 %v5777_v27, %v7069_v48  ;;  %v5932_v27 = vld [vmem:[#allocation2 + $0x30] sm:$0xff] }
 0x5cb   : > { %3111 = vrot.lane.b32.xlu0 %v3106_v30, %s6109_s23  ;;  %1820 = vst.msk [vmem:[#allocation3 + $0x10] sm:$0xff] %vm1186_vm1, %v1818_v24 }
 0x5cc   : > { %v5779_v41 = vpop.eup %5778  ;;  %2336 = vst.msk [vmem:[#allocation3 + $0x28] sm:$0xff] %vm1186_vm1, %v2334_v4 }
 0x5cd   : > { %v5781_v1 = vpop.eup %5780  ;;  %v2333_v63 = vmul.f32 %v5779_v41, %v7066_v16  ;;  %v5933_v41 = vld [vmem:[#allocation2 + $0x10] sm:$0xff] }
 0x5ce   : > { %v1697_v53 = vpop.permute.xlu0 %1696  ;;  %v2849_v55 = vmul.f32 %v5781_v1, %v2844_v8 }
 0x5cf   : > { %2335 = vst.msk [vmem:[#allocation3 + $0x20] sm:$0xff] %vm1186_vm1, %v2333_v63  ;;  %v5934_v63 = vld [vmem:[#allocation2] sm:$0xff] }
 0x5d0   : > { %v5783_v2 = vpop.eup %5782  ;;  %2851 = vst.msk [vmem:[#allocation3 + $0x38] sm:$0xff] %vm1186_vm1, %v2849_v55  ;;  %v5935_v55 = vld [vmem:[#allocation2 + $0x18] sm:$0xff] }
 0x5d1   : > { %v2848_v39 = vmul.f32 %v5783_v2, %v2841_v57  ;;  %v5785_v17 = vpop.eup %5784 }
 0x5d2   : > { %v1951_v3 = vpop.permute.xlu0 %1950  ;;  %v5787_v57 = vpop.eup %5786 }
 0x5d3   : > { %1955 = vst.msk [vmem:[#allocation3 + $0x18] sm:$0xff] %vm1436_vm3, %v1951_v3 }
 0x5d4   : > { %2850 = vst.msk [vmem:[#allocation3 + $0x30] sm:$0xff] %vm1186_vm1, %v2848_v39 }
 0x5d5   : > { %v1433_v48 = vpop.permute.xlu1 %1432 }
 0x5d6   : > { %1438 = vst.msk [vmem:[#allocation3 + $0x8] sm:$0xff] %vm1436_vm3, %v1433_v48 }
 0x5d7   : > { %1570 = vst.msk [vmem:[#allocation3 + $0x8] sm:$0xff] %vm1568_vm4, %v1565_v62 }
 0x5d8   : > { %1702 = vst.msk [vmem:[#allocation3 + $0x8] sm:$0xff] %vm1700_vm5, %v1697_v53 }
 0x5d9   : > { %v1563_v16 = vpop.permute.xlu1 %1562 }
 0x5da   : > { %1569 = vst.msk [vmem:[#allocation3] sm:$0xff] %vm1568_vm4, %v1563_v16 }
 0x5dd   : > { %v1695_v14 = vpop.permute.xlu1 %1694 }
 0x5de   : > { %1701 = vst.msk [vmem:[#allocation3] sm:$0xff] %vm1700_vm5, %v1695_v14 }
 0x5df   : > { %v2082_v21 = vpop.permute.xlu0 %2081  ;;  %v3249_v59 = vld [vmem:[#allocation3 + $0x8] sm:$0xff] }
 0x5e0   : > { %2086 = vst.msk [vmem:[#allocation3 + $0x18] sm:$0xff] %vm1568_vm4, %v2082_v21  ;;  %v5936_v21 = vld [vmem:[#allocation2 + $0x8] sm:$0xff] }
 0x5e1   : > { %v1949_v29 = vpop.permute.xlu1 %1948 }
 0x5e2   : > { %1954 = vst.msk [vmem:[#allocation3 + $0x10] sm:$0xff] %vm1436_vm3, %v1949_v29 }
 0x5e5   : > { %v2080_v47 = vpop.permute.xlu1 %2079  ;;  %v3248_v49 = vld [vmem:[#allocation3] sm:$0xff] }
 0x5e6   : > { %2085 = vst.msk [vmem:[#allocation3 + $0x10] sm:$0xff] %vm1568_vm4, %v2080_v47  ;;  %v3256_v36 = vpack.c.bf16 %v3249_v59, %v3248_v49  ;;  %v5937_v59 = vld [vmem:[#allocation2 + $0x28] sm:$0xff] }
 0x5e7   : > { %v2213_v12 = vpop.permute.xlu0 %2212 }
 0x5e8   : > { %2217 = vst.msk [vmem:[#allocation3 + $0x18] sm:$0xff] %vm1700_vm5, %v2213_v12  ;;  %5403 = vmatprep.mubr.bf16.mxu0 %v3256_v36 }
 0x5e9   : > { %v2211_v33 = vpop.permute.xlu1 %2210 }
 0x5ea   : > { %2216 = vst.msk [vmem:[#allocation3 + $0x10] sm:$0xff] %vm1700_vm5, %v2211_v33  ;;  %v5938_v33 = vld [vmem:[#allocation2 + $0x20] sm:$0xff] }
 0x5ef   : > { %v3229_v26 = vpop.f32.mrf.mxu1  ;;  %v3251_v38 = vld [vmem:[#allocation3 + $0x18] sm:$0xff] }
 0x5f0   : > { %v3236_v20 = vmul.f32 %v5785_v17, %v3229_v26  ;;  %v5939_v26 = vld [vmem:[#allocation2 + $0x38] sm:$0xff] }
 0x5f1   : > { %v5385_v5 = vpop.f32.mrf.mxu1  ;;  %v3250_v42 = vld [vmem:[#allocation3 + $0x10] sm:$0xff] }
 0x5f2   : > { %3240 = vrot.lane.b32.xlu1 %v3236_v20, %s6108_s11  ;;  %v3257_v40 = vpack.c.bf16 %v3251_v38, %v3250_v42 }
 0x5f3   : > { %v3232_v28 = vpop.f32.mrf.mxu1  ;;  %v2464_v19 = vpop.permute.xlu1 %2463 }
 0x5f4   : > { %v3237_v15 = vmul.f32 %v5787_v57, %v3232_v28  ;;  %2469 = vst.msk [vmem:[#allocation3 + $0x20] sm:$0xff] %vm1436_vm3, %v2464_v19  ;;  %5404 = vmatmul.mubr.bf16.vlgmr.msra.gmra.mxu0 %v3257_v40 }
 0x5f5   : > { %v5386_v8 = vpop.f32.mrf.mxu1 }
 0x5f6   : > { %3242 = vrot.lane.b32.xlu0 %v3237_v15, %s6108_s11 }
 0x5f7   : > { %v2466_v34 = vpop.permute.xlu0 %2465 }
 0x5f8   : > { %2470 = vst.msk [vmem:[#allocation3 + $0x28] sm:$0xff] %vm1436_vm3, %v2466_v34 }
 0x5fb   : > { %v2595_v37 = vpop.permute.xlu1 %2594 }
 0x5fc   : > { %2600 = vst.msk [vmem:[#allocation3 + $0x20] sm:$0xff] %vm1568_vm4, %v2595_v37 }
 0x5ff   : > { %v2597_v60 = vpop.permute.xlu0 %2596 }
 0x600   : > { %2601 = vst.msk [vmem:[#allocation3 + $0x28] sm:$0xff] %vm1568_vm4, %v2597_v60 }
 0x621   : > { %v2726_v32 = vpop.permute.xlu1 %2725 }
 0x622   : > { %2731 = vst.msk [vmem:[#allocation3 + $0x20] sm:$0xff] %vm1700_vm5, %v2726_v32 }
 0x625   : > { %v2728_v7 = vpop.permute.xlu0 %2727 }
 0x626   : > { %2732 = vst.msk [vmem:[#allocation3 + $0x28] sm:$0xff] %vm1700_vm5, %v2728_v7 }
 0x629   : > { %v3252_v25 = vld [vmem:[#allocation3 + $0x20] sm:$0xff] }
 0x62d   : > { %v3253_v10 = vld [vmem:[#allocation3 + $0x28] sm:$0xff] }
 0x62e   : > { %v3258_v23 = vpack.c.bf16 %v3253_v10, %v3252_v25 }
 0x630   : > { %5407 = vmatprep.mubr.bf16.mxu0 %v3258_v23  ;;  %v5564_v23 = vld [vmem:[%s7664_s25 + $0xe0] ss:$16 sps:$4 sm:$0xff]  }
 0x631   : > { %v2979_v58 = vpop.permute.xlu1 %2978 }
 0x632   : > { %2984 = vst.msk [vmem:[#allocation3 + $0x30] sm:$0xff] %vm1436_vm3, %v2979_v58  ;;  %v5566_v58 = vld [vmem:[%s7664_s25 + $0xe4] ss:$16 sps:$4 sm:$0xff]  }
 0x633   : > { %3740 = vmatprep.subr.bf16.mxu1 %v5566_v58 }
 0x634   : > { %3741 = vmatpush1.bf16.msra.mxu1 %v5564_v23 }
 0x635   : > { %v2981_v51 = vpop.permute.xlu0 %2980 }
 0x636   : > { %2985 = vst.msk [vmem:[#allocation3 + $0x38] sm:$0xff] %vm1436_vm3, %v2981_v51  ;;  %v5567_v51 = vld [vmem:[%s7664_s25 + $0xe8] ss:$16 sps:$4 sm:$0xff]  }
 0x639   : > { %v3110_v18 = vpop.permute.xlu1 %3109 }
 0x63a   : > { %3115 = vst.msk [vmem:[#allocation3 + $0x30] sm:$0xff] %vm1568_vm4, %v3110_v18  ;;  %v5569_v18 = vld [vmem:[%s7664_s25 + $0xec] ss:$16 sps:$4 sm:$0xff]  }
 0x63b   : > { %3813 = vmatprep.subr.bf16.mxu0 %v5569_v18 }
 0x63c   : > { %3814 = vmatpush1.bf16.msra.mxu0 %v5567_v51 }
 0x63d   : > { %v3112_v0 = vpop.permute.xlu0 %3111 }
 0x63e   : > { %3116 = vst.msk [vmem:[#allocation3 + $0x38] sm:$0xff] %vm1568_vm4, %v3112_v0  ;;  %v5572_v0 = vld [vmem:[%s7664_s25 + $0xc4] ss:$16 sps:$4 sm:$0xff]  }
 0x63f   : > { %3742 = vmatprep.subr.bf16.mxu1 %v5572_v0 }
 0x664   : > { %v3241_v45 = vpop.permute.xlu1 %3240 }
 0x665   : > { %3246 = vst.msk [vmem:[#allocation3 + $0x30] sm:$0xff] %vm1700_vm5, %v3241_v45  ;;  %v5575_v45 = vld [vmem:[%s7664_s25 + $0xcc] ss:$16 sps:$4 sm:$0xff]  }
 0x666   : > { %3815 = vmatprep.subr.bf16.mxu0 %v5575_v45 }
 0x668   : > { %v3243_v43 = vpop.permute.xlu0 %3242 }
 0x669   : > { %3247 = vst.msk [vmem:[#allocation3 + $0x38] sm:$0xff] %vm1700_vm5, %v3243_v43  ;;  %v5570_v43 = vld [vmem:[%s7664_s25 + $0xc0] ss:$16 sps:$4 sm:$0xff]  }
 0x66a   : > { %3743 = vmatpush1.bf16.msra.mxu1 %v5570_v43 }
 0x66c   : > { %v3254_v46 = vld [vmem:[#allocation3 + $0x30] sm:$0xff] }
 0x670   : > { %v3255_v50 = vld [vmem:[#allocation3 + $0x38] sm:$0xff] }
 0x671   : > { %v3259_v52 = vpack.c.bf16 %v3255_v50, %v3254_v46  ;;  %v5573_v46 = vld [vmem:[%s7664_s25 + $0xc8] ss:$16 sps:$4 sm:$0xff]   ;;  %v5578_v50 = vld [vmem:[%s7664_s25 + $0xa4] ss:$16 sps:$4 sm:$0xff]  }
 0x672   : > { %3816 = vmatpush1.bf16.msra.mxu0 %v5573_v46  ;;  %3744 = vmatprep.subr.bf16.mxu1 %v5578_v50 }
 0x673   : > { %5408 = vmatmul.mubr.bf16.gmra.mxu0 %v3259_v52  ;;  %v5581_v52 = vld [vmem:[%s7664_s25 + $0xac] ss:$16 sps:$4 sm:$0xff]  }
 0x674   : > { %3845 = vmatprep.mubr.bf16.mxu0 %v6105_v61  ;;  %3817 = vmatprep.subr.bf16.mxu0 %v5581_v52 }
 0x6b4   : > { %v5405_v56 = vpop.f32.mrf.mxu0 }
 0x6b5   : > { %v3374_v4 = vadd.f32 %v5405_v56, %v4887_v6  ;;  %v5576_v56 = vld [vmem:[%s7664_s25 + $0xa0] ss:$16 sps:$4 sm:$0xff]  }
 0x6b6   : > { %v3365_v44 = vpop.f32.mrf.mxu0  ;;  %3745 = vmatpush1.bf16.msra.mxu1 %v5576_v56 }
 0x6b7   : > { %v3366_v31 = vadd.f32 %v4887_v6, %v3365_v44  ;;  %v7138_v2 = vadd.f32 %v5935_v55, %v3374_v4  ;;  %v5584_v44 = vld [vmem:[%s7664_s25 + $0x84] ss:$16 sps:$4 sm:$0xff]   ;;  %v5593_v4 = vld [vmem:[%s7664_s25 + $0x6c] ss:$16 sps:$4 sm:$0xff]   ;;  %v5594_v55 = vld [vmem:[%s7664_s25 + $0x40] ss:$16 sps:$4 sm:$0xff]  }
 0x6b8   : > { %v5406_v54 = vpop.f32.mrf.mxu0  ;;  %3746 = vmatprep.subr.bf16.mxu1 %v5584_v44 }
 0x6b9   : > { %v7129_v30 = vadd.f32 %v5932_v27, %v3366_v31  ;;  %v3377_v24 = vadd.f32 %v5406_v54, %v4887_v6  ;;  %v5587_v31 = vld [vmem:[%s7664_s25 + $0x8c] ss:$16 sps:$4 sm:$0xff]   ;;  %v5582_v54 = vld [vmem:[%s7664_s25 + $0x80] ss:$16 sps:$4 sm:$0xff]   ;;  %v5585_v27 = vld [vmem:[%s7664_s25 + $0x88] ss:$16 sps:$4 sm:$0xff]  }
 0x6ba   : > { %v3368_v35 = vpop.f32.mrf.mxu0  ;;  %3747 = vmatpush1.bf16.msra.mxu1 %v5582_v54 }
 0x6bb   : > { %v3369_v62 = vadd.f32 %v4887_v6, %v3368_v35  ;;  %3406 = vadd.xlane.f32.xlu1 %v7129_v30  ;;  %v7132_v1 = vadd.f32 %v5933_v41, %v3377_v24  ;;  %v5588_v24 = vld [vmem:[%s7664_s25 + $0x60] ss:$16 sps:$4 sm:$0xff]   ;;  %v5590_v35 = vld [vmem:[%s7664_s25 + $0x64] ss:$16 sps:$4 sm:$0xff]  }
 0x6bc   : > { %v5596_v41 = vld [vmem:[%s7664_s25 + $0x44] ss:$16 sps:$4 sm:$0xff]   ;;  %3748 = vmatprep.subr.bf16.mxu1 %v5590_v35 }
 0x6bd   : > { %v7134_v53 = vadd.f32 %v5934_v63, %v3369_v62  ;;  %v5591_v62 = vld [vmem:[%s7664_s25 + $0x68] ss:$16 sps:$4 sm:$0xff]   ;;  %v5599_v63 = vld [vmem:[%s7664_s25 + $0x4c] ss:$16 sps:$4 sm:$0xff]  }
 0x6be   : > { %3749 = vmatpush1.bf16.msra.mxu1 %v5588_v24 }
 0x6bf   : > { %3408 = vadd.xlane.f32.xlu0 %v7134_v53  ;;  %3412 = vadd.xlane.f32.xlu1 %v7132_v1 }
 0x6c0   : > { %3750 = vmatprep.subr.bf16.mxu1 %v5596_v41 }
 0x6c2   : > { %3751 = vmatpush1.bf16.msra.mxu1 %v5594_v55 }
 0x6c3   : > { %3410 = vadd.xlane.f32.xlu0 %v7138_v2 }
 0x733   : > { %v5409_v39 = vpop.f32.mrf.mxu0 }
 0x734   : > { %v3390_v14 = vadd.f32 %v5409_v39, %v4887_v6  ;;  %v5597_v39 = vld [vmem:[%s7664_s25 + $0x48] ss:$16 sps:$4 sm:$0xff]  }
 0x735   : > { %v3381_v3 = vpop.f32.mrf.mxu0 }
 0x736   : > { %v3382_v48 = vadd.f32 %v4887_v6, %v3381_v3  ;;  %v7144_v36 = vadd.f32 %v5937_v59, %v3390_v14  ;;  %v5602_v3 = vld [vmem:[%s7664_s25 + $0x24] ss:$16 sps:$4 sm:$0xff]   ;;  %v5603_v14 = vld [vmem:[%s7664_s25 + $0x28] ss:$16 sps:$4 sm:$0xff]  }
 0x737   : > { %v5410_v16 = vpop.f32.mrf.mxu0  ;;  %3752 = vmatprep.subr.bf16.mxu1 %v5602_v3  ;;  %v5609_v59 = vld [vmem:[%s7664_s25 + $0x8] ss:$16 sps:$4 sm:$0xff]  }
 0x738   : > { %v7141_v29 = vadd.f32 %v5936_v21, %v3382_v48  ;;  %v3393_v12 = vadd.f32 %v5410_v16, %v4887_v6  ;;  %v5605_v48 = vld [vmem:[%s7664_s25 + $0x2c] ss:$16 sps:$4 sm:$0xff]   ;;  %v5600_v16 = vld [vmem:[%s7664_s25 + $0x20] ss:$16 sps:$4 sm:$0xff]   ;;  %v5608_v21 = vld [vmem:[%s7664_s25 + $0x4] ss:$16 sps:$4 sm:$0xff]  }
 0x739   : > { %v3384_v47 = vpop.f32.mrf.mxu0  ;;  %3753 = vmatpush1.bf16.msra.mxu1 %v5600_v16 }
 0x73a   : > { %v3385_v49 = vadd.f32 %v4887_v6, %v3384_v47  ;;  %3414 = vadd.xlane.f32.xlu0 %v7141_v29  ;;  %v7150_v20 = vadd.f32 %v5939_v26, %v3393_v12  ;;  %v5579_v6 = vld [vmem:[%s7664_s25 + $0xa8] ss:$16 sps:$4 sm:$0xff]   ;;  %v5611_v47 = vld [vmem:[%s7664_s25 + $0xc] ss:$16 sps:$4 sm:$0xff]   ;;  %3754 = vmatprep.subr.bf16.mxu1 %v5608_v21 }
 0x73b   : > { %3818 = vmatpush1.bf16.msra.mxu0 %v5579_v6 }
 0x73c   : > { %v7146_v17 = vadd.f32 %v5938_v33, %v3385_v49  ;;  %3819 = vmatprep.subr.bf16.mxu0 %v5587_v31  ;;  %v5606_v49 = vld [vmem:[%s7664_s25] ss:$16 sps:$4 sm:$0xff]  }
 0x73d   : > { %3755 = vmatpush1.bf16.msra.mxu1 %v5606_v49  ;;  %v7257_v49 = vld [vmem:[%s6379_s14 + $0xf8] sm:$0xff]  }
 0x73e   : > { %3416 = vadd.xlane.f32.xlu1 %v7146_v17  ;;  %3418 = vadd.xlane.f32.xlu0 %v7144_v36 }
 0x73f   : > { %3820 = vmatpush1.bf16.msra.mxu0 %v5585_v27  ;;  %v7231_v27 = vld [vmem:[%s698_s21] ss:$0 sm:$0xff] }
 0x740   : > { %3821 = vmatprep.subr.bf16.mxu0 %v5593_v4  ;;  %v7240_v4 = vld [vmem:[%s701_s15] ss:$0 sm:$0xff] }
 0x742   : > { %3420 = vadd.xlane.f32.xlu1 %v7150_v20 }
 0x743   : > { %3822 = vmatpush1.bf16.msra.mxu0 %v5591_v62 }
 0x744   : > { %v3407_v5 = vpop.xlane.xlu1 %3406  ;;  %3823 = vmatprep.subr.bf16.mxu0 %v5599_v63 }
 0x745   : > { %v3422_v42 = vmul.f32 0.0078125, %v3407_v5 }
 0x747   : > { %v7154_v38 = vsub.f32 %v7129_v30, %v3422_v42  ;;  %3824 = vmatpush1.bf16.msra.mxu0 %v5597_v39 }
 0x748   : > { %v3413_v40 = vpop.xlane.xlu1 %3412  ;;  %v3409_v57 = vpop.xlane.xlu0 %3408  ;;  %3825 = vmatprep.subr.bf16.mxu0 %v5605_v48 }
 0x749   : > { %v3425_v28 = vmul.f32 0.0078125, %v3413_v40  ;;  %v3423_v19 = vmul.f32 0.0078125, %v3409_v57  ;;  %v3438_v15 = vmul.f32 %v7154_v38, %v7154_v38 }
 0x74b   : > { %v7159_v8 = vsub.f32 %v7134_v53, %v3423_v19  ;;  %3446 = vadd.xlane.f32.xlu0 %v3438_v15  ;;  %v7162_v37 = vsub.f32 %v7132_v1, %v3425_v28  ;;  %3826 = vmatpush1.bf16.msra.mxu0 %v5603_v14 }
 0x74c   : > { %v3411_v34 = vpop.xlane.xlu0 %3410  ;;  %3827 = vmatprep.subr.bf16.mxu0 %v5611_v47  ;;  %v5612_v47 = vld [vmem:[%s6379_s14 + $0x78] sm:$0xff]  }
 0x74d   : > { %v3424_v60 = vmul.f32 0.0078125, %v3411_v34  ;;  %v3439_v32 = vmul.f32 %v7159_v8, %v7159_v8  ;;  %v3441_v25 = vmul.f32 %v7162_v37, %v7162_v37  ;;  %5091 = vmatprep.subr.bf16.mxu1 %v5612_v47 }
 0x74f   : > { %v7167_v7 = vsub.f32 %v7138_v2, %v3424_v60  ;;  %3448 = vadd.xlane.f32.xlu1 %v3439_v32  ;;  %3828 = vmatpush1.bf16.msra.mxu0 %v5609_v59  ;;  %v5614_v59 = vld [vmem:[%s6379_s14 + $0x38] sm:$0xff]  }
 0x750   : > { %5131 = vmatprep.subr.bf16.mxu0 %v7257_v49 }
 0x751   : > { %v3440_v10 = vmul.f32 %v7167_v7, %v7167_v7 }
 0x753   : > { %3452 = vadd.xlane.f32.xlu1 %v3441_v25  ;;  %3450 = vadd.xlane.f32.xlu0 %v3440_v10 }
 0x7c3   : > { %v3415_v12 = vpop.xlane.xlu0 %3414 }
 0x7c4   : > { %v3426_v33 = vmul.f32 0.0078125, %v3415_v12  ;;  %v7261_v12 = vld [vmem:[%s6379_s14 + $0xb8] sm:$0xff]  }
 0x7c6   : > { %v7206_v26 = vsub.f32 %v7141_v29, %v3426_v33  ;;  %v5616_v33 = vld [vmem:[%s6379_s14 + $0x70] sm:$0xff]  }
 0x7c7   : > { %v3417_v5 = vpop.xlane.xlu1 %3416  ;;  %v3419_v42 = vpop.xlane.xlu0 %3418 }
 0x7c8   : > { %v3427_v40 = vmul.f32 0.0078125, %v3417_v5  ;;  %v3428_v57 = vmul.f32 0.0078125, %v3419_v42  ;;  %v3442_v28 = vmul.f32 %v7206_v26, %v7206_v26  ;;  %v7267_v5 = vld [vmem:[%s6379_s14 + $0xf0] sm:$0xff]  }
 0x7c9   : > { %v5618_v42 = vld [vmem:[%s6379_s14 + $0x30] sm:$0xff]  }
 0x7ca   : > { %v7211_v19 = vsub.f32 %v7146_v17, %v3427_v40  ;;  %v7214_v15 = vsub.f32 %v7144_v36, %v3428_v57  ;;  %3454 = vadd.xlane.f32.xlu0 %v3442_v28  ;;  %v7271_v40 = vld [vmem:[%s6379_s14 + $0xb0] sm:$0xff]   ;;  %v5620_v57 = vld [vmem:[%s6379_s14 + $0x68] sm:$0xff]  }
 0x7cb   : > { %v3421_v34 = vpop.xlane.xlu1 %3420  ;;  %v7277_v28 = vld [vmem:[%s6379_s14 + $0xe8] sm:$0xff]  }
 0x7cc   : > { %v3429_v60 = vmul.f32 0.0078125, %v3421_v34  ;;  %v3443_v32 = vmul.f32 %v7211_v19, %v7211_v19  ;;  %v3444_v25 = vmul.f32 %v7214_v15, %v7214_v15  ;;  %v5622_v34 = vld [vmem:[%s6379_s14 + $0x28] sm:$0xff]  }
 0x7ce   : > { %v7221_v10 = vsub.f32 %v7150_v20, %v3429_v60  ;;  %3456 = vadd.xlane.f32.xlu1 %v3443_v32  ;;  %3458 = vadd.xlane.f32.xlu0 %v3444_v25  ;;  %v7281_v60 = vld [vmem:[%s6379_s14 + $0xa8] sm:$0xff]   ;;  %v5624_v32 = vld [vmem:[%s6379_s14 + $0x60] sm:$0xff]  }
 0x7cf   : > { %v7287_v25 = vld [vmem:[%s6379_s14 + $0xe0] sm:$0xff]  }
 0x7d0   : > { %v3445_v23 = vmul.f32 %v7221_v10, %v7221_v10 }
 0x7d2   : > { %3460 = vadd.xlane.f32.xlu1 %v3445_v23  ;;  %v5626_v23 = vld [vmem:[%s6379_s14 + $0x20] sm:$0xff]  }
 0x7d4   : > { %v3447_v58 = vpop.xlane.xlu0 %3446 }
 0x7d5   : > { %v3462_v51 = vmul.f32 0.0078125, %v3447_v58  ;;  %v7291_v58 = vld [vmem:[%s6379_s14 + $0xa0] sm:$0xff]  }
 0x7d7   : > { %v3470_v18 = vadd.f32 1e-05, %v3462_v51 }
 0x7d8   : > { %v3449_v0 = vpop.xlane.xlu1 %3448 }
 0x7d9   : > { %5788 = vrsqrt.f32 %v3470_v18  ;;  %v3463_v45 = vmul.f32 0.0078125, %v3449_v0  ;;  %v5628_v18 = vld [vmem:[%s6379_s14 + $0x58] sm:$0xff]  }
 0x7da   : > { %v7297_v0 = vld [vmem:[%s6379_s14 + $0xd8] sm:$0xff]  }
 0x7db   : > { %v3471_v43 = vadd.f32 1e-05, %v3463_v45 }
 0x7dc   : > { %v3453_v46 = vpop.xlane.xlu1 %3452  ;;  %v3451_v50 = vpop.xlane.xlu0 %3450 }
 0x7dd   : > { %5790 = vrsqrt.f32 %v3471_v43  ;;  %v3465_v52 = vmul.f32 0.0078125, %v3453_v46  ;;  %v3464_v56 = vmul.f32 0.0078125, %v3451_v50  ;;  %v5630_v43 = vld [vmem:[%s6379_s14 + $0x18] sm:$0xff]  }
 0x7de   : > { %v7301_v46 = vld [vmem:[%s6379_s14 + $0x98] sm:$0xff]  }
 0x7df   : > { %v3473_v6 = vadd.f32 1e-05, %v3465_v52  ;;  %v3472_v44 = vadd.f32 1e-05, %v3464_v56 }
 0x7e1   : > { %5792 = vrsqrt.f32 %v3473_v6  ;;  %v5632_v6 = vld [vmem:[%s6379_s14 + $0x50] sm:$0xff]  }
 0x7e2   : > { %5794 = vrsqrt.f32 %v3472_v44  ;;  %v7307_v44 = vld [vmem:[%s6379_s14 + $0xd0] sm:$0xff]  }
 0x7e6   : > { %v5789_v31 = vpop.eup %5788 }
 0x7e7   : > { %v3486_v54 = vmul.f32 %v5789_v31, %v7154_v38 }
 0x7e9   : > { %v3500_v62 = vmul.f32 %v7231_v27, %v3486_v54 }
 0x7ea   : > { %v5791_v24 = vpop.eup %5790 }
 0x7eb   : > { %v3487_v35 = vmul.f32 %v5791_v24, %v7159_v8  ;;  %v3514_v55 = vadd.f32 %v7240_v4, %v3500_v62  ;;  %v5634_v24 = vld [vmem:[%s6379_s14 + $0x10] sm:$0xff]  }
 0x7ed   : > { %v3501_v41 = vmul.f32 %v7231_v27, %v3487_v35  ;;  %v7311_v35 = vld [vmem:[%s6379_s14 + $0x90] sm:$0xff]  }
 0x7ee   : > { %v5793_v38 = vpop.eup %5792 }
 0x7ef   : > { %v5795_v63 = vpop.eup %5794  ;;  %v3515_v39 = vadd.f32 %v7240_v4, %v3501_v41  ;;  %v3489_v3 = vmul.f32 %v5793_v38, %v7162_v37 }
 0x7f0   : > { %v3488_v8 = vmul.f32 %v5795_v63, %v7167_v7  ;;  %v5636_v63 = vld [vmem:[%s6379_s14 + $0x48] sm:$0xff]  }
 0x7f1   : > { %v3522_v48 = vpack.c.bf16 %v3515_v39, %v3514_v55  ;;  %v3503_v16 = vmul.f32 %v7231_v27, %v3489_v3  ;;  %v7317_v55 = vld [vmem:[%s6379_s14 + $0xc8] sm:$0xff]  }
 0x7f2   : > { %v3502_v14 = vmul.f32 %v7231_v27, %v3488_v8  ;;  %v5638_v3 = vld [vmem:[%s6379_s14 + $0x8] sm:$0xff]  }
 0x7f3   : > { %3773 = vmatmul.mubr.bf16.vlgmr.msra.gmra.mxu1 %v3522_v48  ;;  %3846 = vmatmul.mubr.bf16.vlgmr.msra.gmra.mxu0 %v3522_v48  ;;  %v3517_v7 = vadd.f32 %v7240_v4, %v3503_v16  ;;  %v7321_v8 = vld [vmem:[%s6379_s14 + $0x88] sm:$0xff]   ;;  %v5640_v16 = vld [vmem:[%s6379_s14 + $0x40] sm:$0xff]  }
 0x7f4   : > { %3782 = vmatprep.mubr.bf16.mxu1 %v6105_v61  ;;  %3855 = vmatprep.mubr.bf16.mxu0 %v6105_v61  ;;  %v3516_v37 = vadd.f32 %v7240_v4, %v3502_v14  ;;  %v7327_v14 = vld [vmem:[%s6379_s14 + $0xc0] sm:$0xff]  }
 0x7f5   : > { %5092 = vmatpush3.bf16.msra.mxu1 %v5614_v59  ;;  %5132 = vmatpush3.bf16.msra.mxu0 %v7261_v12 }
 0x7f6   : > { %v3523_v21 = vpack.c.bf16 %v3517_v7, %v3516_v37  ;;  %5093 = vmatprep.subr.bf16.mxu1 %v5616_v33  ;;  %5133 = vmatprep.subr.bf16.mxu0 %v7267_v5  ;;  %v5642_v37 = vld [vmem:[%s6379_s14] sm:$0xff]  }
 0x7f7   : > { %v7331_v7 = vld [vmem:[%s6379_s14 + $0x80] sm:$0xff]  }
 0x7f9   : > { %5094 = vmatpush3.bf16.msra.mxu1 %v5618_v42  ;;  %5134 = vmatpush3.bf16.msra.mxu0 %v7271_v40 }
 0x7fa   : > { %5095 = vmatprep.subr.bf16.mxu1 %v5620_v57  ;;  %5135 = vmatprep.subr.bf16.mxu0 %v7277_v28 }
 0x7fb   : > { %3783 = vmatmul.mubr.bf16.gmra.mxu1 %v3523_v21  ;;  %3856 = vmatmul.mubr.bf16.gmra.mxu0 %v3523_v21 }
 0x7fc   : > { %3792 = vmatprep.mubr.bf16.mxu1 %v6105_v61  ;;  %3865 = vmatprep.mubr.bf16.mxu0 %v6105_v61 }
 0x7fd   : > { %5096 = vmatpush3.bf16.msra.mxu1 %v5622_v34  ;;  %5136 = vmatpush3.bf16.msra.mxu0 %v7281_v60 }
 0x7fe   : > { %5097 = vmatprep.subr.bf16.mxu1 %v5624_v32  ;;  %5137 = vmatprep.subr.bf16.mxu0 %v7287_v25 }
 0x801   : > { %5098 = vmatpush3.bf16.msra.mxu1 %v5626_v23  ;;  %5138 = vmatpush3.bf16.msra.mxu0 %v7291_v58 }
 0x802   : > { %5099 = vmatprep.subr.bf16.mxu1 %v5628_v18  ;;  %5139 = vmatprep.subr.bf16.mxu0 %v7297_v0 }
 0x805   : > { %5100 = vmatpush3.bf16.msra.mxu1 %v5630_v43  ;;  %5140 = vmatpush3.bf16.msra.mxu0 %v7301_v46 }
 0x806   : > { %5101 = vmatprep.subr.bf16.mxu1 %v5632_v6  ;;  %5141 = vmatprep.subr.bf16.mxu0 %v7307_v44 }
 0x809   : > { %5102 = vmatpush3.bf16.msra.mxu1 %v5634_v24  ;;  %5142 = vmatpush3.bf16.msra.mxu0 %v7311_v35 }
 0x80a   : > { %5103 = vmatprep.subr.bf16.mxu1 %v5636_v63  ;;  %5143 = vmatprep.subr.bf16.mxu0 %v7317_v55 }
 0x80d   : > { %5104 = vmatpush3.bf16.msra.mxu1 %v5638_v3  ;;  %5144 = vmatpush3.bf16.msra.mxu0 %v7321_v8 }
 0x80e   : > { %5105 = vmatprep.subr.bf16.mxu1 %v5640_v16  ;;  %5145 = vmatprep.subr.bf16.mxu0 %v7327_v14 }
 0x811   : > { %5106 = vmatpush3.bf16.msra.mxu1 %v5642_v37  ;;  %5146 = vmatpush3.bf16.msra.mxu0 %v7331_v7 }
 0x812   : > { %5411 = vmatprep.subr.bf16.mxu1 %v7257_v49 }
 0x853   : > { %v3455_v51 = vpop.xlane.xlu0 %3454 }
 0x854   : > { %v3466_v45 = vmul.f32 0.0078125, %v3455_v51 }
 0x856   : > { %v3474_v50 = vadd.f32 1e-05, %v3466_v45 }
 0x857   : > { %v3457_v52 = vpop.xlane.xlu1 %3456  ;;  %v3459_v56 = vpop.xlane.xlu0 %3458 }
 0x858   : > { %5796 = vrsqrt.f32 %v3474_v50  ;;  %v3467_v31 = vmul.f32 0.0078125, %v3457_v52  ;;  %v3468_v54 = vmul.f32 0.0078125, %v3459_v56 }
 0x85a   : > { %v3475_v62 = vadd.f32 1e-05, %v3467_v31  ;;  %v3476_v41 = vadd.f32 1e-05, %v3468_v54 }
 0x85b   : > { %v3461_v38 = vpop.xlane.xlu1 %3460 }
 0x85c   : > { %5798 = vrsqrt.f32 %v3475_v62  ;;  %v3469_v39 = vmul.f32 0.0078125, %v3461_v38 }
 0x85d   : > { %5800 = vrsqrt.f32 %v3476_v41 }
 0x85e   : > { %v3477_v48 = vadd.f32 1e-05, %v3469_v39 }
 0x860   : > { %5802 = vrsqrt.f32 %v3477_v48 }
 0x865   : > { %v5797_v21 = vpop.eup %5796 }
 0x866   : > { %v3490_v47 = vmul.f32 %v5797_v21, %v7206_v26 }
 0x868   : > { %v3504_v42 = vmul.f32 %v7231_v27, %v3490_v47 }
 0x869   : > { %v5799_v59 = vpop.eup %5798 }
 0x86a   : > { %v3491_v33 = vmul.f32 %v5799_v59, %v7211_v19  ;;  %v5801_v57 = vpop.eup %5800  ;;  %v3518_v23 = vadd.f32 %v7240_v4, %v3504_v42 }
 0x86b   : > { %v3492_v18 = vmul.f32 %v5801_v57, %v7214_v15  ;;  %v3558_v15 = vld [vmem:[%s6372_s6] sm:$0xf] }
 0x86c   : > { %v3505_v34 = vmul.f32 %v7231_v27, %v3491_v33  ;;  %v7354_v56 = vrot.slane %v3558_v15, %v904_v11 }
 0x86d   : > { %v5803_v32 = vpop.eup %5802  ;;  %v3506_v19 = vmul.f32 %v7231_v27, %v3492_v18 }
 0x86e   : > { %v3519_v51 = vadd.f32 %v7240_v4, %v3505_v34  ;;  %v3493_v49 = vmul.f32 %v5803_v32, %v7221_v10  ;;  %v3574_v10 = vsub.s32 3, %v6474_v9 }
 0x86f   : > { %v3520_v50 = vadd.f32 %v7240_v4, %v3506_v19 }
 0x870   : > { %v3524_v45 = vpack.c.bf16 %v3519_v51, %v3518_v23  ;;  %v3507_v26 = vmul.f32 %v7231_v27, %v3493_v49  ;;  %v7358_v27 = vrot.slane %v3558_v15, %v912_v22  ;;  %v7364_v6 = vrot.slane %v3558_v15, %v3574_v10 }
 0x872   : > { %3793 = vmatmul.mubr.bf16.gmra.mxu1 %v3524_v45  ;;  %3866 = vmatmul.mubr.bf16.gmra.mxu0 %v3524_v45  ;;  %v3521_v43 = vadd.f32 %v7240_v4, %v3507_v26 }
 0x873   : > { %3802 = vmatprep.mubr.bf16.mxu1 %v6105_v61  ;;  %3875 = vmatprep.mubr.bf16.mxu0 %v6105_v61  ;;  %v7362_v61 = vrot.slane %v3558_v15, %v908_v13 }
 0x874   : > { %v3525_v52 = vpack.c.bf16 %v3521_v43, %v3520_v50 }
 0x87a   : > { %3803 = vmatmul.mubr.bf16.gmra.mxu1 %v3525_v52  ;;  %3876 = vmatmul.mubr.bf16.gmra.mxu0 %v3525_v52 }
 0x8b3   : > { %v3774_v4 = vpop.f32.mrf.mxu1  ;;  %v3847_v31 = vpop.f32.mrf.mxu0 }
 0x8b4   : > { %v7367_v54 = vadd.f32 %v3774_v4, %v7354_v56  ;;  %v7370_v24 = vadd.f32 %v3847_v31, %v7358_v27 }
 0x8b5   : > { %v3776_v11 = vpop.f32.mrf.mxu1  ;;  %v3849_v62 = vpop.f32.mrf.mxu0 }
 0x8b6   : > { %v4930_v41 = vmul.f32 -1.702, %v7367_v54  ;;  %v4932_v22 = vmul.f32 -1.702, %v7370_v24  ;;  %v7375_v9 = vadd.f32 %v3776_v11, %v7362_v61  ;;  %v7378_v13 = vadd.f32 %v3849_v62, %v7364_v6 }
 0x8b7   : > { %v3778_v38 = vpop.f32.mrf.mxu1  ;;  %v3851_v63 = vpop.f32.mrf.mxu0 }
 0x8b8   : > { %v3950_v39 = vmul.f32 1.442695, %v4930_v41  ;;  %v3954_v3 = vmul.f32 1.442695, %v4932_v22  ;;  %v4931_v48 = vmul.f32 -1.702, %v7375_v9  ;;  %v7382_v16 = vadd.f32 %v3778_v38, %v7354_v56 }
 0x8b9   : > { %v4933_v37 = vmul.f32 -1.702, %v7378_v13  ;;  %v7386_v21 = vadd.f32 %v3851_v63, %v7358_v27  ;;  %v3780_v47 = vpop.f32.mrf.mxu1  ;;  %v3853_v59 = vpop.f32.mrf.mxu0 }
 0x8ba   : > { %5804 = vpow2.f32 %v3950_v39  ;;  %v3952_v33 = vmul.f32 1.442695, %v4931_v48  ;;  %v4934_v42 = vmul.f32 -1.702, %v7382_v16  ;;  %v7390_v57 = vadd.f32 %v3780_v47, %v7362_v61 }
 0x8bb   : > { %5806 = vpow2.f32 %v3954_v3  ;;  %v3956_v34 = vmul.f32 1.442695, %v4933_v37  ;;  %v4936_v32 = vmul.f32 -1.702, %v7386_v21  ;;  %v7394_v23 = vadd.f32 %v3853_v59, %v7364_v6  ;;  %v3784_v51 = vpop.f32.mrf.mxu1  ;;  %v3857_v18 = vpop.f32.mrf.mxu0 }
 0x8bc   : > { %5808 = vpow2.f32 %v3952_v33  ;;  %v3958_v49 = vmul.f32 1.442695, %v4934_v42  ;;  %v4935_v45 = vmul.f32 -1.702, %v7390_v57  ;;  %v7398_v26 = vadd.f32 %v3784_v51, %v7354_v56 }
 0x8bd   : > { %5810 = vpow2.f32 %v3956_v34  ;;  %v3962_v19 = vmul.f32 1.442695, %v4936_v32  ;;  %v4937_v43 = vmul.f32 -1.702, %v7394_v23  ;;  %v7402_v50 = vadd.f32 %v3857_v18, %v7358_v27  ;;  %v3786_v52 = vpop.f32.mrf.mxu1  ;;  %v3859_v15 = vpop.f32.mrf.mxu0 }
 0x8be   : > { %5812 = vpow2.f32 %v3958_v49  ;;  %v3960_v10 = vmul.f32 1.442695, %v4935_v45  ;;  %v4938_v4 = vmul.f32 -1.702, %v7398_v26  ;;  %v7406_v31 = vadd.f32 %v3786_v52, %v7362_v61 }
 0x8bf   : > { %5814 = vpow2.f32 %v3962_v19  ;;  %v3964_v11 = vmul.f32 1.442695, %v4937_v43  ;;  %v4940_v62 = vmul.f32 -1.702, %v7402_v50  ;;  %v7410_v41 = vadd.f32 %v3859_v15, %v7364_v6  ;;  %v3788_v22 = vpop.f32.mrf.mxu1  ;;  %v3861_v38 = vpop.f32.mrf.mxu0 }
 0x8c0   : > { %5816 = vpow2.f32 %v3960_v10  ;;  %v3966_v63 = vmul.f32 1.442695, %v4938_v4  ;;  %v4939_v39 = vmul.f32 -1.702, %v7406_v31  ;;  %v7414_v3 = vadd.f32 %v3788_v22, %v7354_v56 }
 0x8c1   : > { %5818 = vpow2.f32 %v3964_v11  ;;  %v3970_v48 = vmul.f32 1.442695, %v4940_v62  ;;  %v4941_v37 = vmul.f32 -1.702, %v7410_v41  ;;  %v7418_v47 = vadd.f32 %v3861_v38, %v7358_v27  ;;  %v3790_v59 = vpop.f32.mrf.mxu1  ;;  %v3863_v33 = vpop.f32.mrf.mxu0 }
 0x8c2   : > { %5820 = vpow2.f32 %v3966_v63  ;;  %v3968_v42 = vmul.f32 1.442695, %v4939_v39  ;;  %v4942_v34 = vmul.f32 -1.702, %v7414_v3  ;;  %v7422_v32 = vadd.f32 %v3790_v59, %v7362_v61 }
 0x8c3   : > { %5822 = vpow2.f32 %v3970_v48  ;;  %v3972_v51 = vmul.f32 1.442695, %v4941_v37  ;;  %v4944_v18 = vmul.f32 -1.702, %v7418_v47  ;;  %v7426_v49 = vadd.f32 %v3863_v33, %v7364_v6 }
 0x8c4   : > { %5824 = vpow2.f32 %v3968_v42  ;;  %v3974_v45 = vmul.f32 1.442695, %v4942_v34  ;;  %v4943_v19 = vmul.f32 -1.702, %v7422_v32 }
 0x8c5   : > { %5826 = vpow2.f32 %v3972_v51  ;;  %v3978_v43 = vmul.f32 1.442695, %v4944_v18  ;;  %v4945_v52 = vmul.f32 -1.702, %v7426_v49 }
 0x8c6   : > { %5828 = vpow2.f32 %v3974_v45  ;;  %v3976_v15 = vmul.f32 1.442695, %v4943_v19 }
 0x8c7   : > { %v5805_v10 = vpop.eup %5804  ;;  %5830 = vpow2.f32 %v3978_v43  ;;  %v3980_v4 = vmul.f32 1.442695, %v4945_v52 }
 0x8c8   : > { %v5807_v11 = vpop.eup %5806  ;;  %v4014_v62 = vadd.f32 1.0, %v5805_v10  ;;  %5832 = vpow2.f32 %v3976_v15 }
 0x8c9   : > { %v5809_v22 = vpop.eup %5808  ;;  %v4016_v38 = vadd.f32 1.0, %v5807_v11  ;;  %5834 = vpow2.f32 %v3980_v4 }
 0x8ca   : > { %v5811_v63 = vpop.eup %5810  ;;  %5836 = vrcp.f32 %v4014_v62  ;;  %v4015_v39 = vadd.f32 1.0, %v5809_v22 }
 0x8cb   : > { %v5813_v48 = vpop.eup %5812  ;;  %5838 = vrcp.f32 %v4016_v38  ;;  %v4017_v37 = vadd.f32 1.0, %v5811_v63 }
 0x8cc   : > { %v5815_v59 = vpop.eup %5814  ;;  %5840 = vrcp.f32 %v4015_v39  ;;  %v4018_v33 = vadd.f32 1.0, %v5813_v48 }
 0x8cd   : > { %v5817_v42 = vpop.eup %5816  ;;  %5842 = vrcp.f32 %v4017_v37  ;;  %v4020_v34 = vadd.f32 1.0, %v5815_v59 }
 0x8ce   : > { %v5819_v51 = vpop.eup %5818  ;;  %5844 = vrcp.f32 %v4018_v33  ;;  %v4019_v18 = vadd.f32 1.0, %v5817_v42 }
 0x8cf   : > { %v5821_v45 = vpop.eup %5820  ;;  %5846 = vrcp.f32 %v4020_v34  ;;  %v4021_v19 = vadd.f32 1.0, %v5819_v51 }
 0x8d0   : > { %v5823_v43 = vpop.eup %5822  ;;  %5848 = vrcp.f32 %v4019_v18  ;;  %v4022_v52 = vadd.f32 1.0, %v5821_v45 }
 0x8d1   : > { %v5825_v15 = vpop.eup %5824  ;;  %5850 = vrcp.f32 %v4021_v19  ;;  %v4024_v10 = vadd.f32 1.0, %v5823_v43 }
 0x8d2   : > { %v5827_v4 = vpop.eup %5826  ;;  %5852 = vrcp.f32 %v4022_v52  ;;  %v4023_v11 = vadd.f32 1.0, %v5825_v15 }
 0x8d3   : > { %v5829_v62 = vpop.eup %5828  ;;  %5854 = vrcp.f32 %v4024_v10  ;;  %v4025_v22 = vadd.f32 1.0, %v5827_v4 }
 0x8d4   : > { %v5831_v38 = vpop.eup %5830  ;;  %5856 = vrcp.f32 %v4023_v11  ;;  %v4026_v63 = vadd.f32 1.0, %v5829_v62 }
 0x8d5   : > { %v5833_v39 = vpop.eup %5832  ;;  %5858 = vrcp.f32 %v4025_v22  ;;  %v4028_v48 = vadd.f32 1.0, %v5831_v38 }
 0x8d6   : > { %v5835_v37 = vpop.eup %5834  ;;  %5860 = vrcp.f32 %v4026_v63  ;;  %v4027_v59 = vadd.f32 1.0, %v5833_v39 }
 0x8d7   : > { %v5837_v33 = vpop.eup %5836  ;;  %5862 = vrcp.f32 %v4028_v48  ;;  %v4029_v42 = vadd.f32 1.0, %v5835_v37 }
 0x8d8   : > { %v5839_v34 = vpop.eup %5838  ;;  %5864 = vrcp.f32 %v4027_v59  ;;  %v4110_v22 = vmul.f32 %v5837_v33, %v7367_v54 }
 0x8d9   : > { %v5841_v51 = vpop.eup %5840  ;;  %5866 = vrcp.f32 %v4029_v42  ;;  %v4112_v48 = vmul.f32 %v5839_v34, %v7370_v24 }
 0x8da   : > { %v5843_v18 = vpop.eup %5842  ;;  %v4111_v10 = vmul.f32 %v5841_v51, %v7375_v9 }
 0x8db   : > { %v5845_v45 = vpop.eup %5844  ;;  %v4113_v38 = vmul.f32 %v5843_v18, %v7378_v13 }
 0x8dc   : > { %v5847_v19 = vpop.eup %5846  ;;  %v4114_v52 = vmul.f32 %v5845_v45, %v7382_v16 }
 0x8dd   : > { %v5849_v43 = vpop.eup %5848  ;;  %v4116_v4 = vmul.f32 %v5847_v19, %v7386_v21 }
 0x8de   : > { %v5851_v15 = vpop.eup %5850  ;;  %v4115_v11 = vmul.f32 %v5849_v43, %v7390_v57  ;;  %v4142_v16 = vpack.c.bf16 %v4114_v52, %v4110_v22 }
 0x8df   : > { %v5853_v62 = vpop.eup %5852  ;;  %v4117_v63 = vmul.f32 %v5851_v15, %v7394_v23  ;;  %v4144_v9 = vpack.c.bf16 %v4116_v4, %v4112_v48 }
 0x8e0   : > { %v5855_v39 = vpop.eup %5854  ;;  %v4143_v37 = vpack.c.bf16 %v4115_v11, %v4111_v10  ;;  %v4118_v51 = vmul.f32 %v5853_v62, %v7398_v26 }
 0x8e1   : > { %v5857_v59 = vpop.eup %5856  ;;  %v4145_v42 = vpack.c.bf16 %v4117_v63, %v4113_v38 }
 0x8e2   : > { %v5859_v45 = vpop.eup %5858  ;;  %4453 = vmatprep.mubr.bf16.mxu1 %v4143_v37  ;;  %v4119_v23 = vmul.f32 %v5857_v59, %v7406_v31 }
 0x8e3   : > { %v5861_v21 = vpop.eup %5860  ;;  %4518 = vmatprep.mubr.bf16.mxu0 %v4145_v42  ;;  %4454 = vmatmul.mubr.bf16.vlgmr.msra.gmra.mxu1 %v4142_v16  ;;  %v4121_v18 = vmul.f32 %v5859_v45, %v7410_v41 }
 0x8e4   : > { %v5863_v57 = vpop.eup %5862  ;;  %4519 = vmatmul.mubr.bf16.vlgmr.msra.gmra.mxu0 %v4144_v9  ;;  %5419 = vmatpush3.bf16.msra.mxu1 %v7261_v12  ;;  %v4122_v13 = vmul.f32 %v5861_v21, %v7414_v3  ;;  %v4120_v12 = vmul.f32 %v5855_v39, %v7402_v50 }
 0x8e5   : > { %v5865_v54 = vpop.eup %5864  ;;  %5412 = vmatprep.subr.bf16.mxu1 %v7267_v5  ;;  %v4124_v33 = vmul.f32 %v5863_v57, %v7418_v47 }
 0x8e6   : > { %v5867_v24 = vpop.eup %5866  ;;  %v4123_v34 = vmul.f32 %v5865_v54, %v7422_v32  ;;  %v4146_v5 = vpack.c.bf16 %v4122_v13, %v4118_v51 }
 0x8e7   : > { %v4125_v19 = vmul.f32 %v5867_v24, %v7426_v49  ;;  %v4148_v31 = vpack.c.bf16 %v4124_v33, %v4120_v12 }
 0x8e8   : > { %v4147_v43 = vpack.c.bf16 %v4123_v34, %v4119_v23  ;;  %5420 = vmatpush3.bf16.msra.mxu1 %v7271_v40 }
 0x8e9   : > { %v4149_v3 = vpack.c.bf16 %v4125_v19, %v4121_v18  ;;  %5413 = vmatprep.subr.bf16.mxu1 %v7277_v28 }
 0x8ea   : > { %4461 = vmatprep.mubr.bf16.mxu1 %v4147_v43 }
 0x8eb   : > { %4526 = vmatprep.mubr.bf16.mxu0 %v4149_v3  ;;  %4462 = vmatmul.mubr.bf16.gmra.mxu1 %v4146_v5 }
 0x8ec   : > { %4527 = vmatmul.mubr.bf16.gmra.mxu0 %v4148_v31  ;;  %5421 = vmatpush3.bf16.msra.mxu1 %v7281_v60 }
 0x8ed   : > { %5414 = vmatprep.subr.bf16.mxu1 %v7287_v25 }
 0x8f0   : > { %5422 = vmatpush3.bf16.msra.mxu1 %v7291_v58 }
 0x8f1   : > { %5415 = vmatprep.subr.bf16.mxu1 %v7297_v0 }
 0x8f4   : > { %5423 = vmatpush3.bf16.msra.mxu1 %v7301_v46 }
 0x8f5   : > { %5416 = vmatprep.subr.bf16.mxu1 %v7307_v44 }
 0x8f8   : > { %5424 = vmatpush3.bf16.msra.mxu1 %v7311_v35 }
 0x8f9   : > { %5417 = vmatprep.subr.bf16.mxu1 %v7317_v55 }
 0x8fc   : > { %5425 = vmatpush3.bf16.msra.mxu1 %v7321_v8 }
 0x8fd   : > { %5418 = vmatprep.subr.bf16.mxu1 %v7327_v14 }
 0x900   : > { %5426 = vmatpush3.bf16.msra.mxu1 %v7331_v7 }
 0x932   : > { %v3794_v40 = vpop.f32.mrf.mxu1  ;;  %v3867_v28 = vpop.f32.mrf.mxu0 }
 0x933   : > { %v7462_v60 = vadd.f32 %v3794_v40, %v7354_v56  ;;  %v7496_v42 = vadd.f32 %v3867_v28, %v7358_v27 }
 0x934   : > { %v3796_v25 = vpop.f32.mrf.mxu1  ;;  %v3869_v58 = vpop.f32.mrf.mxu0 }
 0x935   : > { %v4946_v0 = vmul.f32 -1.702, %v7462_v60  ;;  %v7466_v46 = vadd.f32 %v3796_v25, %v7362_v61  ;;  %v7469_v44 = vadd.f32 %v3869_v58, %v7364_v6  ;;  %v4948_v12 = vmul.f32 -1.702, %v7496_v42 }
 0x936   : > { %v3798_v35 = vpop.f32.mrf.mxu1  ;;  %v3871_v55 = vpop.f32.mrf.mxu0 }
 0x937   : > { %v3982_v8 = vmul.f32 1.442695, %v4946_v0  ;;  %v4947_v14 = vmul.f32 -1.702, %v7466_v46  ;;  %v7473_v7 = vadd.f32 %v3798_v35, %v7354_v56  ;;  %v4949_v26 = vmul.f32 -1.702, %v7469_v44 }
 0x938   : > { %v3800_v50 = vpop.f32.mrf.mxu1  ;;  %v3873_v41 = vpop.f32.mrf.mxu0  ;;  %v7488_v38 = vadd.f32 %v3871_v55, %v7358_v27  ;;  %v3986_v58 = vmul.f32 1.442695, %v4948_v12 }
 0x939   : > { %v3984_v47 = vmul.f32 1.442695, %v4947_v14  ;;  %v4950_v32 = vmul.f32 -1.702, %v7473_v7  ;;  %v7478_v49 = vadd.f32 %v3800_v50, %v7362_v61  ;;  %5868 = vpow2.f32 %v3982_v8 }
 0x93a   : > { %v3988_v52 = vmul.f32 1.442695, %v4949_v26  ;;  %v7481_v15 = vadd.f32 %v3873_v41, %v7364_v6  ;;  %v3804_v10 = vpop.f32.mrf.mxu1  ;;  %v3877_v4 = vpop.f32.mrf.mxu0  ;;  %v4952_v23 = vmul.f32 -1.702, %v7488_v38 }
 0x93b   : > { %5870 = vpow2.f32 %v3984_v47  ;;  %v3990_v11 = vmul.f32 1.442695, %v4950_v32  ;;  %v4951_v62 = vmul.f32 -1.702, %v7478_v49  ;;  %v7485_v22 = vadd.f32 %v3804_v10, %v7354_v56 }
 0x93c   : > { %v4953_v63 = vmul.f32 -1.702, %v7481_v15  ;;  %v3806_v39 = vpop.f32.mrf.mxu1  ;;  %v3879_v48 = vpop.f32.mrf.mxu0  ;;  %v3994_v31 = vmul.f32 1.442695, %v4952_v23 }
 0x93d   : > { %5872 = vpow2.f32 %v3990_v11  ;;  %v3992_v37 = vmul.f32 1.442695, %v4951_v62  ;;  %v4954_v59 = vmul.f32 -1.702, %v7485_v22  ;;  %v7493_v16 = vadd.f32 %v3806_v39, %v7362_v61 }
 0x93e   : > { %5874 = vpow2.f32 %v3988_v52  ;;  %v3996_v45 = vmul.f32 1.442695, %v4953_v63  ;;  %v7499_v9 = vadd.f32 %v3879_v48, %v7364_v6  ;;  %v3808_v21 = vpop.f32.mrf.mxu1  ;;  %v3881_v57 = vpop.f32.mrf.mxu0 }
 0x93f   : > { %5876 = vpow2.f32 %v3992_v37  ;;  %v3998_v54 = vmul.f32 1.442695, %v4954_v59  ;;  %v4955_v13 = vmul.f32 -1.702, %v7493_v16  ;;  %v7503_v24 = vadd.f32 %v3808_v21, %v7354_v56 }
 0x940   : > { %5878 = vpow2.f32 %v3996_v45  ;;  %v3810_v33 = vpop.f32.mrf.mxu1  ;;  %v3883_v34 = vpop.f32.mrf.mxu0  ;;  %v4957_v56 = vmul.f32 -1.702, %v7499_v9  ;;  %v7517_v40 = vadd.f32 %v3881_v57, %v7358_v27 }
 0x941   : > { %v4000_v51 = vmul.f32 1.442695, %v4955_v13  ;;  %v4958_v18 = vmul.f32 -1.702, %v7503_v24  ;;  %v7508_v19 = vadd.f32 %v3810_v33, %v7362_v61  ;;  %5880 = vpow2.f32 %v3998_v54 }
 0x942   : > { %v7512_v43 = vadd.f32 %v3883_v34, %v7364_v6  ;;  %v7521_v61 = vadd.f32 %v3877_v4, %v7358_v27  ;;  %v4004_v35 = vmul.f32 1.442695, %v4957_v56  ;;  %v4960_v8 = vmul.f32 -1.702, %v7517_v40 }
 0x943   : > { %5882 = vpow2.f32 %v4000_v51  ;;  %v4006_v3 = vmul.f32 1.442695, %v4958_v18  ;;  %v4959_v5 = vmul.f32 -1.702, %v7508_v19 }
 0x944   : > { %v4961_v28 = vmul.f32 -1.702, %v7512_v43  ;;  %v4956_v26 = vmul.f32 -1.702, %v7521_v61  ;;  %v4010_v52 = vmul.f32 1.442695, %v4960_v8 }
 0x945   : > { %5884 = vpow2.f32 %v4006_v3  ;;  %v4008_v25 = vmul.f32 1.442695, %v4959_v5 }
 0x946   : > { %v4012_v6 = vmul.f32 1.442695, %v4961_v28  ;;  %v5869_v0 = vpop.eup %5868  ;;  %v4002_v11 = vmul.f32 1.442695, %v4956_v26 }
 0x947   : > { %5886 = vpow2.f32 %v4008_v25  ;;  %v4030_v41 = vadd.f32 1.0, %v5869_v0 }
 0x948   : > { %v5871_v55 = vpop.eup %5870  ;;  %5888 = vpow2.f32 %v3994_v31 }
 0x949   : > { %v4031_v14 = vadd.f32 1.0, %v5871_v55  ;;  %5890 = vpow2.f32 %v4012_v6 }
 0x94a   : > { %v5873_v50 = vpop.eup %5872  ;;  %5892 = vpow2.f32 %v3986_v58 }
 0x94b   : > { %v5875_v27 = vpop.eup %5874  ;;  %v4034_v47 = vadd.f32 1.0, %v5873_v50  ;;  %5894 = vpow2.f32 %v4004_v35 }
 0x94c   : > { %v5877_v32 = vpop.eup %5876  ;;  %5896 = vrcp.f32 %v4031_v14  ;;  %v4033_v62 = vadd.f32 1.0, %v5875_v27 }
 0x94d   : > { %v5879_v10 = vpop.eup %5878  ;;  %5898 = vrcp.f32 %v4034_v47  ;;  %v4035_v4 = vadd.f32 1.0, %v5877_v32 }
 0x94e   : > { %5900 = vrcp.f32 %v4030_v41  ;;  %v5881_v63 = vpop.eup %5880  ;;  %v4037_v39 = vadd.f32 1.0, %v5879_v10 }
 0x94f   : > { %5902 = vrcp.f32 %v4035_v4  ;;  %v4038_v45 = vadd.f32 1.0, %v5881_v63 }
 0x950   : > { %v5883_v48 = vpop.eup %5882  ;;  %5904 = vpow2.f32 %v4010_v52 }
 0x951   : > { %5906 = vpow2.f32 %v4002_v11  ;;  %v4039_v37 = vadd.f32 1.0, %v5883_v48 }
 0x952   : > { %v5885_v59 = vpop.eup %5884  ;;  %5908 = vrcp.f32 %v4033_v62 }
 0x953   : > { %5910 = vrcp.f32 %v4037_v39  ;;  %v4042_v21 = vadd.f32 1.0, %v5885_v59 }
 0x954   : > { %v5887_v57 = vpop.eup %5886  ;;  %5912 = vrcp.f32 %v4039_v37 }
 0x955   : > { %v5889_v54 = vpop.eup %5888  ;;  %5914 = vrcp.f32 %v4042_v21  ;;  %v4043_v13 = vadd.f32 1.0, %v5887_v57 }
 0x956   : > { %v5891_v23 = vpop.eup %5890  ;;  %5916 = vrcp.f32 %v4038_v45  ;;  %v4036_v51 = vadd.f32 1.0, %v5889_v54 }
 0x957   : > { %v5893_v33 = vpop.eup %5892  ;;  %5918 = vrcp.f32 %v4043_v13  ;;  %v4045_v12 = vadd.f32 1.0, %v5891_v23 }
 0x958   : > { %v5895_v34 = vpop.eup %5894  ;;  %v4032_v3 = vadd.f32 1.0, %v5893_v33  ;;  %5920 = vrcp.f32 %v4036_v51 }
 0x959   : > { %v5897_v18 = vpop.eup %5896  ;;  %v4041_v31 = vadd.f32 1.0, %v5895_v34  ;;  %5922 = vrcp.f32 %v4045_v12 }
 0x95a   : > { %v5899_v56 = vpop.eup %5898  ;;  %v4127_v6 = vmul.f32 %v5897_v18, %v7466_v46  ;;  %5924 = vrcp.f32 %v4032_v3 }
 0x95b   : > { %v5901_v5 = vpop.eup %5900  ;;  %v4130_v25 = vmul.f32 %v5899_v56, %v7473_v7  ;;  %5926 = vrcp.f32 %v4041_v31 }
 0x95c   : > { %v5903_v28 = vpop.eup %5902  ;;  %v4126_v55 = vmul.f32 %v5901_v5, %v7462_v60 }
 0x95d   : > { %v5905_v58 = vpop.eup %5904  ;;  %v4131_v0 = vmul.f32 %v5903_v28, %v7478_v49 }
 0x95e   : > { %v5907_v35 = vpop.eup %5906  ;;  %v4044_v50 = vadd.f32 1.0, %v5905_v58  ;;  %v4150_v41 = vpack.c.bf16 %v4130_v25, %v4126_v55 }
 0x95f   : > { %v5909_v8 = vpop.eup %5908  ;;  %v4151_v14 = vpack.c.bf16 %v4131_v0, %v4127_v6  ;;  %v4040_v47 = vadd.f32 1.0, %v5907_v35 }
 0x960   : > { %v5911_v26 = vpop.eup %5910  ;;  %5928 = vrcp.f32 %v4044_v50  ;;  %v4129_v11 = vmul.f32 %v5909_v8, %v7469_v44 }
 0x961   : > { %v5913_v27 = vpop.eup %5912  ;;  %4469 = vmatprep.mubr.bf16.mxu1 %v4151_v14  ;;  %v4133_v52 = vmul.f32 %v5911_v26, %v7481_v15  ;;  %5930 = vrcp.f32 %v4040_v47 }
 0x962   : > { %v5915_v7 = vpop.eup %5914  ;;  %4470 = vmatmul.mubr.bf16.gmra.mxu1 %v4150_v41  ;;  %v4135_v60 = vmul.f32 %v5913_v27, %v7493_v16 }
 0x963   : > { %v5917_v32 = vpop.eup %5916  ;;  %v4138_v49 = vmul.f32 %v5915_v7, %v7503_v24  ;;  %v4153_v48 = vpack.c.bf16 %v4133_v52, %v4129_v11 }
 0x964   : > { %v5919_v46 = vpop.eup %5918  ;;  %v4134_v4 = vmul.f32 %v5917_v32, %v7485_v22 }
 0x965   : > { %v4139_v10 = vmul.f32 %v5919_v46, %v7508_v19  ;;  %v5921_v39 = vpop.eup %5920 }
 0x966   : > { %v4154_v63 = vpack.c.bf16 %v4138_v49, %v4134_v4  ;;  %v5923_v37 = vpop.eup %5922  ;;  %v4132_v15 = vmul.f32 %v5921_v39, %v7488_v38 }
 0x967   : > { %v4155_v62 = vpack.c.bf16 %v4139_v10, %v4135_v60  ;;  %v5925_v24 = vpop.eup %5924  ;;  %v4141_v16 = vmul.f32 %v5923_v37, %v7512_v43 }
 0x968   : > { %v5927_v59 = vpop.eup %5926  ;;  %v4128_v22 = vmul.f32 %v5925_v24, %v7496_v42  ;;  %v7546_v42 = vld [vmem:[%s708_s3] ss:$0 sm:$0xff] }
 0x969   : > { %4477 = vmatprep.mubr.bf16.mxu1 %v4155_v62  ;;  %v4137_v19 = vmul.f32 %v5927_v59, %v7499_v9 }
 0x96a   : > { %4478 = vmatmul.mubr.bf16.gmra.mxu1 %v4154_v63  ;;  %v4152_v44 = vpack.c.bf16 %v4132_v15, %v4128_v22 }
 0x96b   : > { %4534 = vmatprep.mubr.bf16.mxu1 %v4153_v48  ;;  %v4157_v21 = vpack.c.bf16 %v4141_v16, %v4137_v19 }
 0x96d   : > { %v5929_v45 = vpop.eup %5928 }
 0x96e   : > { %v5931_v57 = vpop.eup %5930  ;;  %v4140_v54 = vmul.f32 %v5929_v45, %v7517_v40 }
 0x96f   : > { %v4136_v13 = vmul.f32 %v5931_v57, %v7521_v61 }
 0x971   : > { %v4156_v23 = vpack.c.bf16 %v4140_v54, %v4136_v13 }
 0x972   : > { %4535 = vmatmul.mubr.bf16.vlgmr.msra.gmra.mxu1 %v4152_v44 }
 0x973   : > { %4542 = vmatprep.mubr.bf16.mxu1 %v4157_v21 }
 0x97a   : > { %4543 = vmatmul.mubr.bf16.gmra.mxu1 %v4156_v23 }
 0x9a3   : > { %v5107_v38 = vpop.f32.mrf.mxu1 }
 0x9a4   : > { %v5147_v33 = vpop.f32.mrf.mxu0 }
 0x9a5   : > { %v5108_v9 = vpop.f32.mrf.mxu1 }
 0x9a6   : > { %v5109_v43 = vadd.f32 %v5108_v9, %v5107_v38  ;;  %v5148_v34 = vpop.f32.mrf.mxu0 }
 0x9a7   : > { %v5110_v51 = vpop.f32.mrf.mxu1  ;;  %v5149_v12 = vadd.f32 %v5148_v34, %v5147_v33 }
 0x9a8   : > { %v4456_v18 = vadd.f32 %v5109_v43, %v7546_v42  ;;  %v5150_v40 = vpop.f32.mrf.mxu0 }
 0x9a9   : > { %v5111_v56 = vpop.f32.mrf.mxu1 }
 0x9aa   : > { %v4521_v61 = vadd.f32 %v5149_v12, %v4456_v18  ;;  %v5112_v3 = vadd.f32 %v5111_v56, %v5110_v51  ;;  %v5151_v5 = vpop.f32.mrf.mxu0 }
 0x9ab   : > { %v5113_v31 = vpop.f32.mrf.mxu1  ;;  %v5152_v58 = vadd.f32 %v5151_v5, %v5150_v40 }
 0x9ac   : > { %v7550_v28 = vadd.f32 %v4521_v61, %v7129_v30  ;;  %v4459_v25 = vadd.f32 %v5112_v3, %v7546_v42  ;;  %v5153_v6 = vpop.f32.mrf.mxu0 }
 0x9ad   : > { %v5114_v0 = vpop.f32.mrf.mxu1 }
 0x9ae   : > { %4559 = vst [vmem:[#allocation2 + $0x30] sm:$0xff] %v7550_v28  ;;  %v4524_v35 = vadd.f32 %v5152_v58, %v4459_v25  ;;  %v5115_v55 = vadd.f32 %v5114_v0, %v5113_v31  ;;  %v5154_v8 = vpop.f32.mrf.mxu0 }
 0x9af   : > { %v5116_v14 = vpop.f32.mrf.mxu1  ;;  %v5155_v41 = vadd.f32 %v5154_v8, %v5153_v6 }
 0x9b0   : > { %v4552_v26 = vadd.f32 %v4524_v35, %v7134_v53  ;;  %v4464_v50 = vadd.f32 %v5115_v55, %v7546_v42  ;;  %v5156_v27 = vpop.f32.mrf.mxu0 }
 0x9b1   : > { %v5117_v7 = vpop.f32.mrf.mxu1 }
 0x9b2   : > { %4560 = vst [vmem:[#allocation2] sm:$0xff] %v4552_v26  ;;  %v4529_v30 = vadd.f32 %v5155_v41, %v4464_v50  ;;  %v5118_v47 = vadd.f32 %v5117_v7, %v5116_v14  ;;  %v5157_v32 = vpop.f32.mrf.mxu0 }
 0x9b3   : > { %v5158_v52 = vadd.f32 %v5157_v32, %v5156_v27 }
 0x9b4   : > { %v4553_v46 = vadd.f32 %v4529_v30, %v7138_v2  ;;  %v4467_v49 = vadd.f32 %v5118_v47, %v7546_v42 }
 0x9b6   : > { %4561 = vst [vmem:[#allocation2 + $0x18] sm:$0xff] %v4553_v46  ;;  %v4532_v60 = vadd.f32 %v5158_v52, %v4467_v49 }
 0x9b8   : > { %v4554_v10 = vadd.f32 %v4532_v60, %v7132_v1 }
 0x9ba   : > { %4562 = vst [vmem:[#allocation2 + $0x10] sm:$0xff] %v4554_v10 }
 0xa22   : > { %v5119_v53 = vpop.f32.mrf.mxu1 }
 0xa24   : > { %v5120_v4 = vpop.f32.mrf.mxu1 }
 0xa25   : > { %v5121_v24 = vadd.f32 %v5120_v4, %v5119_v53 }
 0xa26   : > { %v5122_v11 = vpop.f32.mrf.mxu1 }
 0xa27   : > { %v4472_v2 = vadd.f32 %v5121_v24, %v7546_v42 }
 0xa28   : > { %v5123_v62 = vpop.f32.mrf.mxu1 }
 0xa29   : > { %v5124_v16 = vadd.f32 %v5123_v62, %v5122_v11 }
 0xa2a   : > { %v5125_v63 = vpop.f32.mrf.mxu1 }
 0xa2b   : > { %v4475_v1 = vadd.f32 %v5124_v16, %v7546_v42 }
 0xa2c   : > { %v5126_v39 = vpop.f32.mrf.mxu1 }
 0xa2d   : > { %v5127_v21 = vadd.f32 %v5126_v39, %v5125_v63 }
 0xa2e   : > { %v5128_v48 = vpop.f32.mrf.mxu1 }
 0xa2f   : > { %v4480_v33 = vadd.f32 %v5127_v21, %v7546_v42 }
 0xa30   : > { %v5129_v37 = vpop.f32.mrf.mxu1 }
 0xa31   : > { %v5130_v9 = vadd.f32 %v5129_v37, %v5128_v48 }
 0xa32   : > { %v5159_v59 = vpop.f32.mrf.mxu1 }
 0xa33   : > { %v4483_v40 = vadd.f32 %v5130_v9, %v7546_v42 }
 0xa34   : > { %v5160_v15 = vpop.f32.mrf.mxu1 }
 0xa35   : > { %v5161_v22 = vadd.f32 %v5160_v15, %v5159_v59 }
 0xa36   : > { %v5162_v19 = vpop.f32.mrf.mxu1 }
 0xa37   : > { %v4537_v44 = vadd.f32 %v5161_v22, %v4472_v2 }
 0xa38   : > { %v5163_v45 = vpop.f32.mrf.mxu1 }
 0xa39   : > { %v4555_v57 = vadd.f32 %v4537_v44, %v7141_v29  ;;  %v5164_v54 = vadd.f32 %v5163_v45, %v5162_v19 }
 0xa3a   : > { %v5165_v13 = vpop.f32.mrf.mxu1 }
 0xa3b   : > { %4563 = vst [vmem:[#allocation2 + $0x8] sm:$0xff] %v4555_v57  ;;  %v4540_v23 = vadd.f32 %v5164_v54, %v4475_v1 }
 0xa3c   : > { %v5166_v38 = vpop.f32.mrf.mxu1 }
 0xa3d   : > { %v4556_v43 = vadd.f32 %v4540_v23, %v7146_v17  ;;  %v5167_v34 = vadd.f32 %v5166_v38, %v5165_v13 }
 0xa3e   : > { %v5168_v51 = vpop.f32.mrf.mxu1 }
 0xa3f   : > { %4564 = vst [vmem:[#allocation2 + $0x20] sm:$0xff] %v4556_v43  ;;  %v4545_v18 = vadd.f32 %v5167_v34, %v4480_v33 }
 0xa40   : > { %v5169_v12 = vpop.f32.mrf.mxu1 }
 0xa41   : > { %v4557_v56 = vadd.f32 %v4545_v18, %v7144_v36  ;;  %v5170_v29 = vadd.f32 %v5169_v12, %v5168_v51 }
 0xa43   : > { %4565 = vst [vmem:[#allocation2 + $0x28] sm:$0xff] %v4557_v56  ;;  %v4548_v61 = vadd.f32 %v5170_v29, %v4483_v40  ;;  %4570 = sbr.rel (%p4995_p7) target bundleno = 2636 (0xa4c), region = 92 }
 0xa45   : > { %v4558_v3 = vadd.f32 %v4548_v61, %v7150_v20 }
 0xa47   : > { %4566 = vst [vmem:[#allocation2 + $0x38] sm:$0xff] %v4558_v3 }
 0xa48   : > { %4571 = vst [vmem:[%s6377_s9] sm:$0xff] %v7550_v28  ;;  %4572 = vst [vmem:[%s6377_s9 + $0x8] sm:$0xff] %v4552_v26 }
 0xa49   : > { %4573 = vst [vmem:[%s6377_s9 + $0x10] sm:$0xff] %v4553_v46  ;;  %4574 = vst [vmem:[%s6377_s9 + $0x18] sm:$0xff] %v4554_v10 }
 0xa4a   : > { %4575 = vst [vmem:[%s6377_s9 + $0x20] sm:$0xff] %v4555_v57  ;;  %4576 = vst [vmem:[%s6377_s9 + $0x28] sm:$0xff] %v4556_v43 }
 0xa4b   : > { %4577 = vst [vmem:[%s6377_s9 + $0x30] sm:$0xff] %v4557_v56  ;;  %4578 = vst [vmem:[%s6377_s9 + $0x38] sm:$0xff] %v4558_v3 }
 0xa4c PF: > { %s7668_s28 = sld [smem:[#allocation15_spill]] }
 0xa4d   : > { %s7669_s25 = sld [smem:[#allocation11_spill]] }
 0xa4e   : > { %s7670_s26 = sld [smem:[#allocation12_spill]] }
 0xa4f   : > { %s7671_s27 = sld [smem:[#allocation18_spill]] }
 0xa50   : > { %s7673_s29 = sld [smem:[#allocation14_spill]] }
 0xa51   : > { %s7674_s30 = sld [smem:[#allocation16_spill]] }
 0xa52   : > { %s29_s15 = sadd.s32 1, %s7668_s28   ;;  %s7672_s28 = sld [smem:[#allocation13_spill]] }
 0xa53   : > { %p26_p1 = scmp.ge.s32.totalorder %s29_s15, 6   ;;  %s7675_s14 = sld [smem:[#allocation17_spill]] }
 0xa55   :  { %28 = sbr.rel (!%p26_p1) target bundleno = 20 (0x14), region = 174 }
 0xa5a   :  { %4603 = vsyncpa [#allocation5], 1 }
 0xa5b   :  { %4605 = vsyncpa [#allocation5 + $0x1], 1 }
 0xa5c   :  { %4606 = vsyncpa [#allocation7], 1 }
 0xa5d   :  { %4608 = vsyncpa [#allocation7 + $0x1], 1 }

</bundles_post_ra>
